<compile_context>
chip_gen: v7x
topology: tpu7x:2x2x1
jax: 0.10.0
libtpu: 0.0.40
codegen_flags: <defaults>
</compile_context>

<pallas_src>
import functools

import jax
import jax.numpy as jnp
from jax import lax
from jax.experimental import pallas as pl
from jax.experimental.pallas import tpu as pltpu

K = 7                      # conv kernel size
PAD = 3                    # conv padding
MAX_TB = 16                # cap on images per grid step (bounds vreg pressure)
TARGET_X_BYTES = 1 << 20   # aim for ~1 MiB of x per grid step


def _shift_lanes(m, d, tb, hw):
    """Return s with s[:, p] = m[:, p + d] for 0 <= p + d < hw, else 0 (static d)."""
    if d == 0:
        return m
    if d >= hw or -d >= hw:  # only possible for degenerate tiny H (< 4 rows)
        return jnp.zeros((tb, hw), m.dtype)
    if d > 0:
        return jnp.concatenate([m[:, d:], jnp.zeros((tb, d), m.dtype)], axis=1)
    return jnp.concatenate([jnp.zeros((tb, -d), m.dtype), m[:, :hw + d]], axis=1)


def _spatial_attention_kernel(params_ref, wmask_ref, x_ref, o_ref, *, H, W, C, TB):
    """One grid step = TB images, lane-dense (TB, H*W) layout throughout.

    params_ref : SMEM (99,) f32     -- 98 conv weights ((c, kh, kw) row-major) + bias
    wmask_ref  : VMEM (7, H*W) f32  -- per-kw width-validity mask (constant)
    x_ref      : VMEM (TB, C, H*W)  -- input tile, native dtype
    o_ref      : VMEM (TB, 1, H*W)  -- output tile, x dtype
    """
    HW = H * W

    # ---- channel mean / max, chunked over C (only (TB, HW) f32 stays live) ----
    CK = 8
    ssum = jnp.zeros((TB, HW), jnp.float32)
    smax = None
    for c0 in range(0, C, CK):
        ck = min(CK, C - c0)
        xc = x_ref[:, c0:c0 + ck, :]                        # (TB, ck, HW) native dtype
        ssum = ssum + jnp.sum(xc.astype(jnp.float32), axis=1)
        cm = jnp.max(xc, axis=1)                            # exact in bf16
        smax = cm if smax is None else jnp.maximum(smax, cm)
    avg = ssum * (1.0 / C)                                  # (TB, HW) f32
    mx = smax.astype(jnp.float32)                           # (TB, HW) f32

    # ---- 7x7 conv, padding=3, on the flattened lane-dense maps ----------------
    # out[p] += wt[c,kh,kw] * map_c[p + d] * wmask[kw][p],  d = (kh-3)*W + (kw-3).
    # The zero-fill of the lane shift handles height out-of-range; the width mask
    # handles row wrap-around of the flattened index.
    wmasks = [wmask_ref[i:i + 1, :] for i in range(K)]      # hoisted (1, HW) rows
    acc = jnp.zeros((TB, HW), jnp.float32)
    for c, m in enumerate((avg, mx)):
        for kh in range(K):
            for kwi in range(K):
                d = (kh - PAD) * W + (kwi - PAD)
                s = _shift_lanes(m, d, TB, HW)
                wt = params_ref[(c * K + kh) * K + kwi]     # SMEM scalar
                acc = acc + (s * wmasks[kwi]) * wt
    acc = acc + params_ref[2 * K * K]                       # bias

    # Lane-dense, unmasked full-lane store (HW is a multiple of 128 at test shape).
    o_ref[:, 0, :] = jax.nn.sigmoid(acc).astype(o_ref.dtype)


def spatial_attention(x, weight, bias):
    """x: (N, C, H, W); weight: (1, 2, 7, 7); bias: (1,). Returns (N, 1, H, W) in x.dtype."""
    N, C, H, W = x.shape
    HW = H * W
    itemsize = jnp.dtype(x.dtype).itemsize

    # Lane-dense views (free reshapes in the wrapper, not in the kernel).
    x_flat = x.reshape(N, C, HW)

    # SMEM params: 98 conv weights (channel-major, then kh, kw) followed by the bias.
    params = jnp.concatenate([weight.reshape(-1).astype(jnp.float32),
                              bias.reshape(-1).astype(jnp.float32)])

    # Per-kw width-validity mask in f32, lane-dense over the flattened H*W axis.
    col = jnp.arange(HW, dtype=jnp.int32) % W                       # w coordinate of p
    off = jnp.arange(K, dtype=jnp.int32)[:, None] - PAD             # kw - 3
    wmask = ((col[None, :] + off >= 0) & (col[None, :] + off < W)).astype(jnp.float32)

    # ---- batch tile: ~1 MiB of x per grid step, divides N, >=2 steps if N > 1 ----
    per_image = C * HW * itemsize
    tb = max(1, min(N, MAX_TB, TARGET_X_BYTES // max(per_image, 1)))
    while N % tb:
        tb -= 1
    if N > 1 and N // tb < 2:           # give both v7x TensorCores at least one step
        tb = max(1, tb // 2)
        while N % tb:
            tb -= 1
    grid = (N // tb,)

    # ---- scoped-VMEM budget: actual block bytes + headroom, generation-aware cap ----
    est = (2 * tb * C * HW * itemsize   # x block (double-buffered)
           + 2 * tb * HW * itemsize     # output block (double-buffered)
           + 2 * K * HW * 4)            # width mask (constant, still double-buffered)
    try:
        vmem_cap = int(pltpu.get_tpu_info().vmem_capacity_bytes)
    except Exception:
        vmem_cap = 64 << 20             # conservative (v7x per-core VMEM)
    vmem_limit = int(min(max(est + (8 << 20), 16 << 20), int(vmem_cap * 3 // 4)))

    kernel = functools.partial(_spatial_attention_kernel, H=H, W=W, C=C, TB=tb)

    out_flat = pl.pallas_call(
        kernel,
        out_shape=jax.ShapeDtypeStruct((N, 1, HW), x.dtype),
        grid=grid,
        in_specs=[
            pl.BlockSpec(memory_space=pltpu.MemorySpace.SMEM),      # params (99,)
            pl.BlockSpec((K, HW), lambda b: (0, 0)),                # width mask (constant)
            pl.BlockSpec((tb, C, HW), lambda b: (b, 0, 0)),         # x tile
        ],
        out_specs=pl.BlockSpec((tb, 1, HW), lambda b: (b, 0, 0)),
        compiler_params=pltpu.CompilerParams(
            dimension_semantics=("parallel",),
            vmem_limit_bytes=vmem_limit,
        ),
    )(params, wmask, x_flat)

    return out_flat.reshape(N, 1, H, W)


def spatial_attention_ref(x, weight, bias):
    """Pure-JAX reference mirroring the PyTorch forward (f32)."""
    xf = x.astype(jnp.float32)
    avg = jnp.mean(xf, axis=1, keepdims=True)
    mx = jnp.max(xf, axis=1, keepdims=True)
    cat = jnp.concatenate([avg, mx], axis=1)
    y = lax.conv_general_dilated(
        cat, weight.astype(jnp.float32), window_strides=(1, 1),
        padding=[(PAD, PAD), (PAD, PAD)],
        dimension_numbers=("NCHW", "OIHW", "NCHW"))
    y = y + bias.reshape(1, 1, 1, 1).astype(jnp.float32)
    return jax.nn.sigmoid(y)


if __name__ == "__main__":
    key = jax.random.PRNGKey(0)
    kx, kwt, kb = jax.random.split(key, 3)

    N, C, H, W = 2, 4, 16, 16
    x = jax.random.normal(kx, (N, C, H, W), dtype=jnp.float32)

    # Deterministic synthetic parameters (shapes match nn.Conv2d(2, 1, 7, padding=3)).
    fan_in = 2 * K * K
    bound = 1.0 / (fan_in ** 0.5)
    weight = jax.random.uniform(kwt, (1, 2, K, K), jnp.float32, -bound, bound)
    bias = jax.random.uniform(kb, (1,), jnp.float32, -bound, bound)

    out = spatial_attention(x, weight, bias)
    out = jax.block_until_ready(out)

    ref = spatial_attention_ref(x, weight, bias)
    assert out.shape == (N, 1, H, W), out.shape
    out_f32 = out.astype(jnp.float32)
    max_err = jnp.max(jnp.abs(out_f32 - ref))
    assert jnp.allclose(out_f32, ref, atol=1e-4, rtol=1e-4), f"max abs err {max_err}"

    print("KERNEL_OK")
</pallas_src>

<mosaic_0001>
module attributes {stable_mosaic.version = 11 : i64} {
  func.func @_spatial_attention_kernel(%arg0: i32, %arg1: memref<99xf32, #tpu.memory_space<smem>>, %arg2: memref<7x256xf32, #tpu.memory_space<vmem>>, %arg3: memref<1x4x256xf32, #tpu.memory_space<vmem>>, %arg4: memref<1x1x256xf32, #tpu.memory_space<vmem>>) attributes {dimension_semantics = [#tpu.dimension_semantics<parallel>], iteration_bounds = array<i64: 2>, scalar_prefetch = 0 : i64, scratch_operands = 0 : i64, tpu.core_type = #tpu.core_type<tc>, window_params = [{transform_indices = @transform_0, window_bounds = array<i64: 99>}, {pipeline_mode = #tpu.pipeline_mode<synchronous>, transform_indices = @transform_1, window_bounds = array<i64: 7, 256>}, {transform_indices = @transform_2, window_bounds = array<i64: 1, 4, 256>}, {transform_indices = @transform_3, window_bounds = array<i64: 1, 1, 256>}]} {
    %cst = arith.constant 0.000000e+00 : f32
    %0 = vector.broadcast %cst : f32 to vector<1x256xf32>
    %c0 = arith.constant 0 : index
    %c0_0 = arith.constant 0 : index
    %c0_1 = arith.constant 0 : index
    %1 = vector.load %arg3[%c0, %c0_0, %c0_1] : memref<1x4x256xf32, #tpu.memory_space<vmem>>, vector<1x4x256xf32>
    %cst_2 = arith.constant dense<0.000000e+00> : vector<1x256xf32>
    %2 = vector.multi_reduction <add>, %1, %cst_2 [1] : vector<1x4x256xf32> to vector<1x256xf32>
    %3 = arith.addf %0, %2 : vector<1x256xf32>
    %cst_3 = arith.constant dense<0xFF800000> : vector<1x256xf32>
    %4 = vector.multi_reduction <maximumf>, %1, %cst_3 [1] : vector<1x4x256xf32> to vector<1x256xf32>
    %cst_4 = arith.constant 2.500000e-01 : f32
    %5 = vector.broadcast %cst_4 : f32 to vector<1x256xf32>
    %6 = arith.mulf %3, %5 : vector<1x256xf32>
    %c0_5 = arith.constant 0 : index
    %c0_6 = arith.constant 0 : index
    %7 = vector.load %arg2[%c0_5, %c0_6] : memref<7x256xf32, #tpu.memory_space<vmem>>, vector<1x256xf32>
    %c1 = arith.constant 1 : index
    %c0_7 = arith.constant 0 : index
    %8 = vector.load %arg2[%c1, %c0_7] : memref<7x256xf32, #tpu.memory_space<vmem>>, vector<1x256xf32>
    %c2 = arith.constant 2 : index
    %c0_8 = arith.constant 0 : index
    %9 = vector.load %arg2[%c2, %c0_8] : memref<7x256xf32, #tpu.memory_space<vmem>>, vector<1x256xf32>
    %c3 = arith.constant 3 : index
    %c0_9 = arith.constant 0 : index
    %10 = vector.load %arg2[%c3, %c0_9] : memref<7x256xf32, #tpu.memory_space<vmem>>, vector<1x256xf32>
    %c4 = arith.constant 4 : index
    %c0_10 = arith.constant 0 : index
    %11 = vector.load %arg2[%c4, %c0_10] : memref<7x256xf32, #tpu.memory_space<vmem>>, vector<1x256xf32>
    %c5 = arith.constant 5 : index
    %c0_11 = arith.constant 0 : index
    %12 = vector.load %arg2[%c5, %c0_11] : memref<7x256xf32, #tpu.memory_space<vmem>>, vector<1x256xf32>
    %c6 = arith.constant 6 : index
    %c0_12 = arith.constant 0 : index
    %13 = vector.load %arg2[%c6, %c0_12] : memref<7x256xf32, #tpu.memory_space<vmem>>, vector<1x256xf32>
    %cst_13 = arith.constant 0.000000e+00 : f32
    %14 = vector.broadcast %cst_13 : f32 to vector<1x256xf32>
    %cst_14 = arith.constant 0.000000e+00 : f32
    %15 = vector.broadcast %cst_14 : f32 to vector<1x51xf32>
    %16 = vector.extract_strided_slice %6 {offsets = [0, 0], sizes = [1, 205], strides = [1, 1]} : vector<1x256xf32> to vector<1x205xf32>
    %17 = tpu.concatenate %15, %16 in 1 : vector<1x51xf32>, vector<1x205xf32> -> vector<1x256xf32>
    %c0_15 = arith.constant 0 : index
    %18 = memref.load %arg1[%c0_15] : memref<99xf32, #tpu.memory_space<smem>>
    %19 = arith.mulf %17, %7 : vector<1x256xf32>
    %20 = vector.broadcast %18 : f32 to vector<1x256xf32>
    %21 = arith.mulf %19, %20 : vector<1x256xf32>
    %22 = arith.addf %14, %21 : vector<1x256xf32>
    %cst_16 = arith.constant 0.000000e+00 : f32
    %23 = vector.broadcast %cst_16 : f32 to vector<1x50xf32>
    %24 = vector.extract_strided_slice %6 {offsets = [0, 0], sizes = [1, 206], strides = [1, 1]} : vector<1x256xf32> to vector<1x206xf32>
    %25 = tpu.concatenate %23, %24 in 1 : vector<1x50xf32>, vector<1x206xf32> -> vector<1x256xf32>
    %c1_17 = arith.constant 1 : index
    %26 = memref.load %arg1[%c1_17] : memref<99xf32, #tpu.memory_space<smem>>
    %27 = arith.mulf %25, %8 : vector<1x256xf32>
    %28 = vector.broadcast %26 : f32 to vector<1x256xf32>
    %29 = arith.mulf %27, %28 : vector<1x256xf32>
    %30 = arith.addf %22, %29 : vector<1x256xf32>
    %cst_18 = arith.constant 0.000000e+00 : f32
    %31 = vector.broadcast %cst_18 : f32 to vector<1x49xf32>
    %32 = vector.extract_strided_slice %6 {offsets = [0, 0], sizes = [1, 207], strides = [1, 1]} : vector<1x256xf32> to vector<1x207xf32>
    %33 = tpu.concatenate %31, %32 in 1 : vector<1x49xf32>, vector<1x207xf32> -> vector<1x256xf32>
    %c2_19 = arith.constant 2 : index
    %34 = memref.load %arg1[%c2_19] : memref<99xf32, #tpu.memory_space<smem>>
    %35 = arith.mulf %33, %9 : vector<1x256xf32>
    %36 = vector.broadcast %34 : f32 to vector<1x256xf32>
    %37 = arith.mulf %35, %36 : vector<1x256xf32>
    %38 = arith.addf %30, %37 : vector<1x256xf32>
    %cst_20 = arith.constant 0.000000e+00 : f32
    %39 = vector.broadcast %cst_20 : f32 to vector<1x48xf32>
    %40 = vector.extract_strided_slice %6 {offsets = [0, 0], sizes = [1, 208], strides = [1, 1]} : vector<1x256xf32> to vector<1x208xf32>
    %41 = tpu.concatenate %39, %40 in 1 : vector<1x48xf32>, vector<1x208xf32> -> vector<1x256xf32>
    %c3_21 = arith.constant 3 : index
    %42 = memref.load %arg1[%c3_21] : memref<99xf32, #tpu.memory_space<smem>>
    %43 = arith.mulf %41, %10 : vector<1x256xf32>
    %44 = vector.broadcast %42 : f32 to vector<1x256xf32>
    %45 = arith.mulf %43, %44 : vector<1x256xf32>
    %46 = arith.addf %38, %45 : vector<1x256xf32>
    %cst_22 = arith.constant 0.000000e+00 : f32
    %47 = vector.broadcast %cst_22 : f32 to vector<1x47xf32>
    %48 = vector.extract_strided_slice %6 {offsets = [0, 0], sizes = [1, 209], strides = [1, 1]} : vector<1x256xf32> to vector<1x209xf32>
    %49 = tpu.concatenate %47, %48 in 1 : vector<1x47xf32>, vector<1x209xf32> -> vector<1x256xf32>
    %c4_23 = arith.constant 4 : index
    %50 = memref.load %arg1[%c4_23] : memref<99xf32, #tpu.memory_space<smem>>
    %51 = arith.mulf %49, %11 : vector<1x256xf32>
    %52 = vector.broadcast %50 : f32 to vector<1x256xf32>
    %53 = arith.mulf %51, %52 : vector<1x256xf32>
    %54 = arith.addf %46, %53 : vector<1x256xf32>
    %cst_24 = arith.constant 0.000000e+00 : f32
    %55 = vector.broadcast %cst_24 : f32 to vector<1x46xf32>
    %56 = vector.extract_strided_slice %6 {offsets = [0, 0], sizes = [1, 210], strides = [1, 1]} : vector<1x256xf32> to vector<1x210xf32>
    %57 = tpu.concatenate %55, %56 in 1 : vector<1x46xf32>, vector<1x210xf32> -> vector<1x256xf32>
    %c5_25 = arith.constant 5 : index
    %58 = memref.load %arg1[%c5_25] : memref<99xf32, #tpu.memory_space<smem>>
    %59 = arith.mulf %57, %12 : vector<1x256xf32>
    %60 = vector.broadcast %58 : f32 to vector<1x256xf32>
    %61 = arith.mulf %59, %60 : vector<1x256xf32>
    %62 = arith.addf %54, %61 : vector<1x256xf32>
    %cst_26 = arith.constant 0.000000e+00 : f32
    %63 = vector.broadcast %cst_26 : f32 to vector<1x45xf32>
    %64 = vector.extract_strided_slice %6 {offsets = [0, 0], sizes = [1, 211], strides = [1, 1]} : vector<1x256xf32> to vector<1x211xf32>
    %65 = tpu.concatenate %63, %64 in 1 : vector<1x45xf32>, vector<1x211xf32> -> vector<1x256xf32>
    %c6_27 = arith.constant 6 : index
    %66 = memref.load %arg1[%c6_27] : memref<99xf32, #tpu.memory_space<smem>>
    %67 = arith.mulf %65, %13 : vector<1x256xf32>
    %68 = vector.broadcast %66 : f32 to vector<1x256xf32>
    %69 = arith.mulf %67, %68 : vector<1x256xf32>
    %70 = arith.addf %62, %69 : vector<1x256xf32>
    %cst_28 = arith.constant 0.000000e+00 : f32
    %71 = vector.broadcast %cst_28 : f32 to vector<1x35xf32>
    %72 = vector.extract_strided_slice %6 {offsets = [0, 0], sizes = [1, 221], strides = [1, 1]} : vector<1x256xf32> to vector<1x221xf32>
    %73 = tpu.concatenate %71, %72 in 1 : vector<1x35xf32>, vector<1x221xf32> -> vector<1x256xf32>
    %c7 = arith.constant 7 : index
    %74 = memref.load %arg1[%c7] : memref<99xf32, #tpu.memory_space<smem>>
    %75 = arith.mulf %73, %7 : vector<1x256xf32>
    %76 = vector.broadcast %74 : f32 to vector<1x256xf32>
    %77 = arith.mulf %75, %76 : vector<1x256xf32>
    %78 = arith.addf %70, %77 : vector<1x256xf32>
    %cst_29 = arith.constant 0.000000e+00 : f32
    %79 = vector.broadcast %cst_29 : f32 to vector<1x34xf32>
    %80 = vector.extract_strided_slice %6 {offsets = [0, 0], sizes = [1, 222], strides = [1, 1]} : vector<1x256xf32> to vector<1x222xf32>
    %81 = tpu.concatenate %79, %80 in 1 : vector<1x34xf32>, vector<1x222xf32> -> vector<1x256xf32>
    %c8 = arith.constant 8 : index
    %82 = memref.load %arg1[%c8] : memref<99xf32, #tpu.memory_space<smem>>
    %83 = arith.mulf %81, %8 : vector<1x256xf32>
    %84 = vector.broadcast %82 : f32 to vector<1x256xf32>
    %85 = arith.mulf %83, %84 : vector<1x256xf32>
    %86 = arith.addf %78, %85 : vector<1x256xf32>
    %cst_30 = arith.constant 0.000000e+00 : f32
    %87 = vector.broadcast %cst_30 : f32 to vector<1x33xf32>
    %88 = vector.extract_strided_slice %6 {offsets = [0, 0], sizes = [1, 223], strides = [1, 1]} : vector<1x256xf32> to vector<1x223xf32>
    %89 = tpu.concatenate %87, %88 in 1 : vector<1x33xf32>, vector<1x223xf32> -> vector<1x256xf32>
    %c9 = arith.constant 9 : index
    %90 = memref.load %arg1[%c9] : memref<99xf32, #tpu.memory_space<smem>>
    %91 = arith.mulf %89, %9 : vector<1x256xf32>
    %92 = vector.broadcast %90 : f32 to vector<1x256xf32>
    %93 = arith.mulf %91, %92 : vector<1x256xf32>
    %94 = arith.addf %86, %93 : vector<1x256xf32>
    %cst_31 = arith.constant 0.000000e+00 : f32
    %95 = vector.broadcast %cst_31 : f32 to vector<1x32xf32>
    %96 = vector.extract_strided_slice %6 {offsets = [0, 0], sizes = [1, 224], strides = [1, 1]} : vector<1x256xf32> to vector<1x224xf32>
    %97 = tpu.concatenate %95, %96 in 1 : vector<1x32xf32>, vector<1x224xf32> -> vector<1x256xf32>
    %c10 = arith.constant 10 : index
    %98 = memref.load %arg1[%c10] : memref<99xf32, #tpu.memory_space<smem>>
    %99 = arith.mulf %97, %10 : vector<1x256xf32>
    %100 = vector.broadcast %98 : f32 to vector<1x256xf32>
    %101 = arith.mulf %99, %100 : vector<1x256xf32>
    %102 = arith.addf %94, %101 : vector<1x256xf32>
    %cst_32 = arith.constant 0.000000e+00 : f32
    %103 = vector.broadcast %cst_32 : f32 to vector<1x31xf32>
    %104 = vector.extract_strided_slice %6 {offsets = [0, 0], sizes = [1, 225], strides = [1, 1]} : vector<1x256xf32> to vector<1x225xf32>
    %105 = tpu.concatenate %103, %104 in 1 : vector<1x31xf32>, vector<1x225xf32> -> vector<1x256xf32>
    %c11 = arith.constant 11 : index
    %106 = memref.load %arg1[%c11] : memref<99xf32, #tpu.memory_space<smem>>
    %107 = arith.mulf %105, %11 : vector<1x256xf32>
    %108 = vector.broadcast %106 : f32 to vector<1x256xf32>
    %109 = arith.mulf %107, %108 : vector<1x256xf32>
    %110 = arith.addf %102, %109 : vector<1x256xf32>
    %cst_33 = arith.constant 0.000000e+00 : f32
    %111 = vector.broadcast %cst_33 : f32 to vector<1x30xf32>
    %112 = vector.extract_strided_slice %6 {offsets = [0, 0], sizes = [1, 226], strides = [1, 1]} : vector<1x256xf32> to vector<1x226xf32>
    %113 = tpu.concatenate %111, %112 in 1 : vector<1x30xf32>, vector<1x226xf32> -> vector<1x256xf32>
    %c12 = arith.constant 12 : index
    %114 = memref.load %arg1[%c12] : memref<99xf32, #tpu.memory_space<smem>>
    %115 = arith.mulf %113, %12 : vector<1x256xf32>
    %116 = vector.broadcast %114 : f32 to vector<1x256xf32>
    %117 = arith.mulf %115, %116 : vector<1x256xf32>
    %118 = arith.addf %110, %117 : vector<1x256xf32>
    %cst_34 = arith.constant 0.000000e+00 : f32
    %119 = vector.broadcast %cst_34 : f32 to vector<1x29xf32>
    %120 = vector.extract_strided_slice %6 {offsets = [0, 0], sizes = [1, 227], strides = [1, 1]} : vector<1x256xf32> to vector<1x227xf32>
    %121 = tpu.concatenate %119, %120 in 1 : vector<1x29xf32>, vector<1x227xf32> -> vector<1x256xf32>
    %c13 = arith.constant 13 : index
    %122 = memref.load %arg1[%c13] : memref<99xf32, #tpu.memory_space<smem>>
    %123 = arith.mulf %121, %13 : vector<1x256xf32>
    %124 = vector.broadcast %122 : f32 to vector<1x256xf32>
    %125 = arith.mulf %123, %124 : vector<1x256xf32>
    %126 = arith.addf %118, %125 : vector<1x256xf32>
    %cst_35 = arith.constant 0.000000e+00 : f32
    %127 = vector.broadcast %cst_35 : f32 to vector<1x19xf32>
    %128 = vector.extract_strided_slice %6 {offsets = [0, 0], sizes = [1, 237], strides = [1, 1]} : vector<1x256xf32> to vector<1x237xf32>
    %129 = tpu.concatenate %127, %128 in 1 : vector<1x19xf32>, vector<1x237xf32> -> vector<1x256xf32>
    %c14 = arith.constant 14 : index
    %130 = memref.load %arg1[%c14] : memref<99xf32, #tpu.memory_space<smem>>
    %131 = arith.mulf %129, %7 : vector<1x256xf32>
    %132 = vector.broadcast %130 : f32 to vector<1x256xf32>
    %133 = arith.mulf %131, %132 : vector<1x256xf32>
    %134 = arith.addf %126, %133 : vector<1x256xf32>
    %cst_36 = arith.constant 0.000000e+00 : f32
    %135 = vector.broadcast %cst_36 : f32 to vector<1x18xf32>
    %136 = vector.extract_strided_slice %6 {offsets = [0, 0], sizes = [1, 238], strides = [1, 1]} : vector<1x256xf32> to vector<1x238xf32>
    %137 = tpu.concatenate %135, %136 in 1 : vector<1x18xf32>, vector<1x238xf32> -> vector<1x256xf32>
    %c15 = arith.constant 15 : index
    %138 = memref.load %arg1[%c15] : memref<99xf32, #tpu.memory_space<smem>>
    %139 = arith.mulf %137, %8 : vector<1x256xf32>
    %140 = vector.broadcast %138 : f32 to vector<1x256xf32>
    %141 = arith.mulf %139, %140 : vector<1x256xf32>
    %142 = arith.addf %134, %141 : vector<1x256xf32>
    %cst_37 = arith.constant 0.000000e+00 : f32
    %143 = vector.broadcast %cst_37 : f32 to vector<1x17xf32>
    %144 = vector.extract_strided_slice %6 {offsets = [0, 0], sizes = [1, 239], strides = [1, 1]} : vector<1x256xf32> to vector<1x239xf32>
    %145 = tpu.concatenate %143, %144 in 1 : vector<1x17xf32>, vector<1x239xf32> -> vector<1x256xf32>
    %c16 = arith.constant 16 : index
    %146 = memref.load %arg1[%c16] : memref<99xf32, #tpu.memory_space<smem>>
    %147 = arith.mulf %145, %9 : vector<1x256xf32>
    %148 = vector.broadcast %146 : f32 to vector<1x256xf32>
    %149 = arith.mulf %147, %148 : vector<1x256xf32>
    %150 = arith.addf %142, %149 : vector<1x256xf32>
    %cst_38 = arith.constant 0.000000e+00 : f32
    %151 = vector.broadcast %cst_38 : f32 to vector<1x16xf32>
    %152 = vector.extract_strided_slice %6 {offsets = [0, 0], sizes = [1, 240], strides = [1, 1]} : vector<1x256xf32> to vector<1x240xf32>
    %153 = tpu.concatenate %151, %152 in 1 : vector<1x16xf32>, vector<1x240xf32> -> vector<1x256xf32>
    %c17 = arith.constant 17 : index
    %154 = memref.load %arg1[%c17] : memref<99xf32, #tpu.memory_space<smem>>
    %155 = arith.mulf %153, %10 : vector<1x256xf32>
    %156 = vector.broadcast %154 : f32 to vector<1x256xf32>
    %157 = arith.mulf %155, %156 : vector<1x256xf32>
    %158 = arith.addf %150, %157 : vector<1x256xf32>
    %cst_39 = arith.constant 0.000000e+00 : f32
    %159 = vector.broadcast %cst_39 : f32 to vector<1x15xf32>
    %160 = vector.extract_strided_slice %6 {offsets = [0, 0], sizes = [1, 241], strides = [1, 1]} : vector<1x256xf32> to vector<1x241xf32>
    %161 = tpu.concatenate %159, %160 in 1 : vector<1x15xf32>, vector<1x241xf32> -> vector<1x256xf32>
    %c18 = arith.constant 18 : index
    %162 = memref.load %arg1[%c18] : memref<99xf32, #tpu.memory_space<smem>>
    %163 = arith.mulf %161, %11 : vector<1x256xf32>
    %164 = vector.broadcast %162 : f32 to vector<1x256xf32>
    %165 = arith.mulf %163, %164 : vector<1x256xf32>
    %166 = arith.addf %158, %165 : vector<1x256xf32>
    %cst_40 = arith.constant 0.000000e+00 : f32
    %167 = vector.broadcast %cst_40 : f32 to vector<1x14xf32>
    %168 = vector.extract_strided_slice %6 {offsets = [0, 0], sizes = [1, 242], strides = [1, 1]} : vector<1x256xf32> to vector<1x242xf32>
    %169 = tpu.concatenate %167, %168 in 1 : vector<1x14xf32>, vector<1x242xf32> -> vector<1x256xf32>
    %c19 = arith.constant 19 : index
    %170 = memref.load %arg1[%c19] : memref<99xf32, #tpu.memory_space<smem>>
    %171 = arith.mulf %169, %12 : vector<1x256xf32>
    %172 = vector.broadcast %170 : f32 to vector<1x256xf32>
    %173 = arith.mulf %171, %172 : vector<1x256xf32>
    %174 = arith.addf %166, %173 : vector<1x256xf32>
    %cst_41 = arith.constant 0.000000e+00 : f32
    %175 = vector.broadcast %cst_41 : f32 to vector<1x13xf32>
    %176 = vector.extract_strided_slice %6 {offsets = [0, 0], sizes = [1, 243], strides = [1, 1]} : vector<1x256xf32> to vector<1x243xf32>
    %177 = tpu.concatenate %175, %176 in 1 : vector<1x13xf32>, vector<1x243xf32> -> vector<1x256xf32>
    %c20 = arith.constant 20 : index
    %178 = memref.load %arg1[%c20] : memref<99xf32, #tpu.memory_space<smem>>
    %179 = arith.mulf %177, %13 : vector<1x256xf32>
    %180 = vector.broadcast %178 : f32 to vector<1x256xf32>
    %181 = arith.mulf %179, %180 : vector<1x256xf32>
    %182 = arith.addf %174, %181 : vector<1x256xf32>
    %cst_42 = arith.constant 0.000000e+00 : f32
    %183 = vector.broadcast %cst_42 : f32 to vector<1x3xf32>
    %184 = vector.extract_strided_slice %6 {offsets = [0, 0], sizes = [1, 253], strides = [1, 1]} : vector<1x256xf32> to vector<1x253xf32>
    %185 = tpu.concatenate %183, %184 in 1 : vector<1x3xf32>, vector<1x253xf32> -> vector<1x256xf32>
    %c21 = arith.constant 21 : index
    %186 = memref.load %arg1[%c21] : memref<99xf32, #tpu.memory_space<smem>>
    %187 = arith.mulf %185, %7 : vector<1x256xf32>
    %188 = vector.broadcast %186 : f32 to vector<1x256xf32>
    %189 = arith.mulf %187, %188 : vector<1x256xf32>
    %190 = arith.addf %182, %189 : vector<1x256xf32>
    %cst_43 = arith.constant 0.000000e+00 : f32
    %191 = vector.broadcast %cst_43 : f32 to vector<1x2xf32>
    %192 = vector.extract_strided_slice %6 {offsets = [0, 0], sizes = [1, 254], strides = [1, 1]} : vector<1x256xf32> to vector<1x254xf32>
    %193 = tpu.concatenate %191, %192 in 1 : vector<1x2xf32>, vector<1x254xf32> -> vector<1x256xf32>
    %c22 = arith.constant 22 : index
    %194 = memref.load %arg1[%c22] : memref<99xf32, #tpu.memory_space<smem>>
    %195 = arith.mulf %193, %8 : vector<1x256xf32>
    %196 = vector.broadcast %194 : f32 to vector<1x256xf32>
    %197 = arith.mulf %195, %196 : vector<1x256xf32>
    %198 = arith.addf %190, %197 : vector<1x256xf32>
    %cst_44 = arith.constant 0.000000e+00 : f32
    %199 = vector.broadcast %cst_44 : f32 to vector<1x1xf32>
    %200 = vector.extract_strided_slice %6 {offsets = [0, 0], sizes = [1, 255], strides = [1, 1]} : vector<1x256xf32> to vector<1x255xf32>
    %201 = tpu.concatenate %199, %200 in 1 : vector<1x1xf32>, vector<1x255xf32> -> vector<1x256xf32>
    %c23 = arith.constant 23 : index
    %202 = memref.load %arg1[%c23] : memref<99xf32, #tpu.memory_space<smem>>
    %203 = arith.mulf %201, %9 : vector<1x256xf32>
    %204 = vector.broadcast %202 : f32 to vector<1x256xf32>
    %205 = arith.mulf %203, %204 : vector<1x256xf32>
    %206 = arith.addf %198, %205 : vector<1x256xf32>
    %c24 = arith.constant 24 : index
    %207 = memref.load %arg1[%c24] : memref<99xf32, #tpu.memory_space<smem>>
    %208 = arith.mulf %6, %10 : vector<1x256xf32>
    %209 = vector.broadcast %207 : f32 to vector<1x256xf32>
    %210 = arith.mulf %208, %209 : vector<1x256xf32>
    %211 = arith.addf %206, %210 : vector<1x256xf32>
    %212 = vector.extract_strided_slice %6 {offsets = [0, 1], sizes = [1, 255], strides = [1, 1]} : vector<1x256xf32> to vector<1x255xf32>
    %cst_45 = arith.constant 0.000000e+00 : f32
    %213 = vector.broadcast %cst_45 : f32 to vector<1x1xf32>
    %214 = tpu.concatenate %212, %213 in 1 : vector<1x255xf32>, vector<1x1xf32> -> vector<1x256xf32>
    %c25 = arith.constant 25 : index
    %215 = memref.load %arg1[%c25] : memref<99xf32, #tpu.memory_space<smem>>
    %216 = arith.mulf %214, %11 : vector<1x256xf32>
    %217 = vector.broadcast %215 : f32 to vector<1x256xf32>
    %218 = arith.mulf %216, %217 : vector<1x256xf32>
    %219 = arith.addf %211, %218 : vector<1x256xf32>
    %220 = vector.extract_strided_slice %6 {offsets = [0, 2], sizes = [1, 254], strides = [1, 1]} : vector<1x256xf32> to vector<1x254xf32>
    %cst_46 = arith.constant 0.000000e+00 : f32
    %221 = vector.broadcast %cst_46 : f32 to vector<1x2xf32>
    %222 = tpu.concatenate %220, %221 in 1 : vector<1x254xf32>, vector<1x2xf32> -> vector<1x256xf32>
    %c26 = arith.constant 26 : index
    %223 = memref.load %arg1[%c26] : memref<99xf32, #tpu.memory_space<smem>>
    %224 = arith.mulf %222, %12 : vector<1x256xf32>
    %225 = vector.broadcast %223 : f32 to vector<1x256xf32>
    %226 = arith.mulf %224, %225 : vector<1x256xf32>
    %227 = arith.addf %219, %226 : vector<1x256xf32>
    %228 = vector.extract_strided_slice %6 {offsets = [0, 3], sizes = [1, 253], strides = [1, 1]} : vector<1x256xf32> to vector<1x253xf32>
    %cst_47 = arith.constant 0.000000e+00 : f32
    %229 = vector.broadcast %cst_47 : f32 to vector<1x3xf32>
    %230 = tpu.concatenate %228, %229 in 1 : vector<1x253xf32>, vector<1x3xf32> -> vector<1x256xf32>
    %c27 = arith.constant 27 : index
    %231 = memref.load %arg1[%c27] : memref<99xf32, #tpu.memory_space<smem>>
    %232 = arith.mulf %230, %13 : vector<1x256xf32>
    %233 = vector.broadcast %231 : f32 to vector<1x256xf32>
    %234 = arith.mulf %232, %233 : vector<1x256xf32>
    %235 = arith.addf %227, %234 : vector<1x256xf32>
    %236 = vector.extract_strided_slice %6 {offsets = [0, 13], sizes = [1, 243], strides = [1, 1]} : vector<1x256xf32> to vector<1x243xf32>
    %cst_48 = arith.constant 0.000000e+00 : f32
    %237 = vector.broadcast %cst_48 : f32 to vector<1x13xf32>
    %238 = tpu.concatenate %236, %237 in 1 : vector<1x243xf32>, vector<1x13xf32> -> vector<1x256xf32>
    %c28 = arith.constant 28 : index
    %239 = memref.load %arg1[%c28] : memref<99xf32, #tpu.memory_space<smem>>
    %240 = arith.mulf %238, %7 : vector<1x256xf32>
    %241 = vector.broadcast %239 : f32 to vector<1x256xf32>
    %242 = arith.mulf %240, %241 : vector<1x256xf32>
    %243 = arith.addf %235, %242 : vector<1x256xf32>
    %244 = vector.extract_strided_slice %6 {offsets = [0, 14], sizes = [1, 242], strides = [1, 1]} : vector<1x256xf32> to vector<1x242xf32>
    %cst_49 = arith.constant 0.000000e+00 : f32
    %245 = vector.broadcast %cst_49 : f32 to vector<1x14xf32>
    %246 = tpu.concatenate %244, %245 in 1 : vector<1x242xf32>, vector<1x14xf32> -> vector<1x256xf32>
    %c29 = arith.constant 29 : index
    %247 = memref.load %arg1[%c29] : memref<99xf32, #tpu.memory_space<smem>>
    %248 = arith.mulf %246, %8 : vector<1x256xf32>
    %249 = vector.broadcast %247 : f32 to vector<1x256xf32>
    %250 = arith.mulf %248, %249 : vector<1x256xf32>
    %251 = arith.addf %243, %250 : vector<1x256xf32>
    %252 = vector.extract_strided_slice %6 {offsets = [0, 15], sizes = [1, 241], strides = [1, 1]} : vector<1x256xf32> to vector<1x241xf32>
    %cst_50 = arith.constant 0.000000e+00 : f32
    %253 = vector.broadcast %cst_50 : f32 to vector<1x15xf32>
    %254 = tpu.concatenate %252, %253 in 1 : vector<1x241xf32>, vector<1x15xf32> -> vector<1x256xf32>
    %c30 = arith.constant 30 : index
    %255 = memref.load %arg1[%c30] : memref<99xf32, #tpu.memory_space<smem>>
    %256 = arith.mulf %254, %9 : vector<1x256xf32>
    %257 = vector.broadcast %255 : f32 to vector<1x256xf32>
    %258 = arith.mulf %256, %257 : vector<1x256xf32>
    %259 = arith.addf %251, %258 : vector<1x256xf32>
    %260 = vector.extract_strided_slice %6 {offsets = [0, 16], sizes = [1, 240], strides = [1, 1]} : vector<1x256xf32> to vector<1x240xf32>
    %cst_51 = arith.constant 0.000000e+00 : f32
    %261 = vector.broadcast %cst_51 : f32 to vector<1x16xf32>
    %262 = tpu.concatenate %260, %261 in 1 : vector<1x240xf32>, vector<1x16xf32> -> vector<1x256xf32>
    %c31 = arith.constant 31 : index
    %263 = memref.load %arg1[%c31] : memref<99xf32, #tpu.memory_space<smem>>
    %264 = arith.mulf %262, %10 : vector<1x256xf32>
    %265 = vector.broadcast %263 : f32 to vector<1x256xf32>
    %266 = arith.mulf %264, %265 : vector<1x256xf32>
    %267 = arith.addf %259, %266 : vector<1x256xf32>
    %268 = vector.extract_strided_slice %6 {offsets = [0, 17], sizes = [1, 239], strides = [1, 1]} : vector<1x256xf32> to vector<1x239xf32>
    %cst_52 = arith.constant 0.000000e+00 : f32
    %269 = vector.broadcast %cst_52 : f32 to vector<1x17xf32>
    %270 = tpu.concatenate %268, %269 in 1 : vector<1x239xf32>, vector<1x17xf32> -> vector<1x256xf32>
    %c32 = arith.constant 32 : index
    %271 = memref.load %arg1[%c32] : memref<99xf32, #tpu.memory_space<smem>>
    %272 = arith.mulf %270, %11 : vector<1x256xf32>
    %273 = vector.broadcast %271 : f32 to vector<1x256xf32>
    %274 = arith.mulf %272, %273 : vector<1x256xf32>
    %275 = arith.addf %267, %274 : vector<1x256xf32>
    %276 = vector.extract_strided_slice %6 {offsets = [0, 18], sizes = [1, 238], strides = [1, 1]} : vector<1x256xf32> to vector<1x238xf32>
    %cst_53 = arith.constant 0.000000e+00 : f32
    %277 = vector.broadcast %cst_53 : f32 to vector<1x18xf32>
    %278 = tpu.concatenate %276, %277 in 1 : vector<1x238xf32>, vector<1x18xf32> -> vector<1x256xf32>
    %c33 = arith.constant 33 : index
    %279 = memref.load %arg1[%c33] : memref<99xf32, #tpu.memory_space<smem>>
    %280 = arith.mulf %278, %12 : vector<1x256xf32>
    %281 = vector.broadcast %279 : f32 to vector<1x256xf32>
    %282 = arith.mulf %280, %281 : vector<1x256xf32>
    %283 = arith.addf %275, %282 : vector<1x256xf32>
    %284 = vector.extract_strided_slice %6 {offsets = [0, 19], sizes = [1, 237], strides = [1, 1]} : vector<1x256xf32> to vector<1x237xf32>
    %cst_54 = arith.constant 0.000000e+00 : f32
    %285 = vector.broadcast %cst_54 : f32 to vector<1x19xf32>
    %286 = tpu.concatenate %284, %285 in 1 : vector<1x237xf32>, vector<1x19xf32> -> vector<1x256xf32>
    %c34 = arith.constant 34 : index
    %287 = memref.load %arg1[%c34] : memref<99xf32, #tpu.memory_space<smem>>
    %288 = arith.mulf %286, %13 : vector<1x256xf32>
    %289 = vector.broadcast %287 : f32 to vector<1x256xf32>
    %290 = arith.mulf %288, %289 : vector<1x256xf32>
    %291 = arith.addf %283, %290 : vector<1x256xf32>
    %292 = vector.extract_strided_slice %6 {offsets = [0, 29], sizes = [1, 227], strides = [1, 1]} : vector<1x256xf32> to vector<1x227xf32>
    %cst_55 = arith.constant 0.000000e+00 : f32
    %293 = vector.broadcast %cst_55 : f32 to vector<1x29xf32>
    %294 = tpu.concatenate %292, %293 in 1 : vector<1x227xf32>, vector<1x29xf32> -> vector<1x256xf32>
    %c35 = arith.constant 35 : index
    %295 = memref.load %arg1[%c35] : memref<99xf32, #tpu.memory_space<smem>>
    %296 = arith.mulf %294, %7 : vector<1x256xf32>
    %297 = vector.broadcast %295 : f32 to vector<1x256xf32>
    %298 = arith.mulf %296, %297 : vector<1x256xf32>
    %299 = arith.addf %291, %298 : vector<1x256xf32>
    %300 = vector.extract_strided_slice %6 {offsets = [0, 30], sizes = [1, 226], strides = [1, 1]} : vector<1x256xf32> to vector<1x226xf32>
    %cst_56 = arith.constant 0.000000e+00 : f32
    %301 = vector.broadcast %cst_56 : f32 to vector<1x30xf32>
    %302 = tpu.concatenate %300, %301 in 1 : vector<1x226xf32>, vector<1x30xf32> -> vector<1x256xf32>
    %c36 = arith.constant 36 : index
    %303 = memref.load %arg1[%c36] : memref<99xf32, #tpu.memory_space<smem>>
    %304 = arith.mulf %302, %8 : vector<1x256xf32>
    %305 = vector.broadcast %303 : f32 to vector<1x256xf32>
    %306 = arith.mulf %304, %305 : vector<1x256xf32>
    %307 = arith.addf %299, %306 : vector<1x256xf32>
    %308 = vector.extract_strided_slice %6 {offsets = [0, 31], sizes = [1, 225], strides = [1, 1]} : vector<1x256xf32> to vector<1x225xf32>
    %cst_57 = arith.constant 0.000000e+00 : f32
    %309 = vector.broadcast %cst_57 : f32 to vector<1x31xf32>
    %310 = tpu.concatenate %308, %309 in 1 : vector<1x225xf32>, vector<1x31xf32> -> vector<1x256xf32>
    %c37 = arith.constant 37 : index
    %311 = memref.load %arg1[%c37] : memref<99xf32, #tpu.memory_space<smem>>
    %312 = arith.mulf %310, %9 : vector<1x256xf32>
    %313 = vector.broadcast %311 : f32 to vector<1x256xf32>
    %314 = arith.mulf %312, %313 : vector<1x256xf32>
    %315 = arith.addf %307, %314 : vector<1x256xf32>
    %316 = vector.extract_strided_slice %6 {offsets = [0, 32], sizes = [1, 224], strides = [1, 1]} : vector<1x256xf32> to vector<1x224xf32>
    %cst_58 = arith.constant 0.000000e+00 : f32
    %317 = vector.broadcast %cst_58 : f32 to vector<1x32xf32>
    %318 = tpu.concatenate %316, %317 in 1 : vector<1x224xf32>, vector<1x32xf32> -> vector<1x256xf32>
    %c38 = arith.constant 38 : index
    %319 = memref.load %arg1[%c38] : memref<99xf32, #tpu.memory_space<smem>>
    %320 = arith.mulf %318, %10 : vector<1x256xf32>
    %321 = vector.broadcast %319 : f32 to vector<1x256xf32>
    %322 = arith.mulf %320, %321 : vector<1x256xf32>
    %323 = arith.addf %315, %322 : vector<1x256xf32>
    %324 = vector.extract_strided_slice %6 {offsets = [0, 33], sizes = [1, 223], strides = [1, 1]} : vector<1x256xf32> to vector<1x223xf32>
    %cst_59 = arith.constant 0.000000e+00 : f32
    %325 = vector.broadcast %cst_59 : f32 to vector<1x33xf32>
    %326 = tpu.concatenate %324, %325 in 1 : vector<1x223xf32>, vector<1x33xf32> -> vector<1x256xf32>
    %c39 = arith.constant 39 : index
    %327 = memref.load %arg1[%c39] : memref<99xf32, #tpu.memory_space<smem>>
    %328 = arith.mulf %326, %11 : vector<1x256xf32>
    %329 = vector.broadcast %327 : f32 to vector<1x256xf32>
    %330 = arith.mulf %328, %329 : vector<1x256xf32>
    %331 = arith.addf %323, %330 : vector<1x256xf32>
    %332 = vector.extract_strided_slice %6 {offsets = [0, 34], sizes = [1, 222], strides = [1, 1]} : vector<1x256xf32> to vector<1x222xf32>
    %cst_60 = arith.constant 0.000000e+00 : f32
    %333 = vector.broadcast %cst_60 : f32 to vector<1x34xf32>
    %334 = tpu.concatenate %332, %333 in 1 : vector<1x222xf32>, vector<1x34xf32> -> vector<1x256xf32>
    %c40 = arith.constant 40 : index
    %335 = memref.load %arg1[%c40] : memref<99xf32, #tpu.memory_space<smem>>
    %336 = arith.mulf %334, %12 : vector<1x256xf32>
    %337 = vector.broadcast %335 : f32 to vector<1x256xf32>
    %338 = arith.mulf %336, %337 : vector<1x256xf32>
    %339 = arith.addf %331, %338 : vector<1x256xf32>
    %340 = vector.extract_strided_slice %6 {offsets = [0, 35], sizes = [1, 221], strides = [1, 1]} : vector<1x256xf32> to vector<1x221xf32>
    %cst_61 = arith.constant 0.000000e+00 : f32
    %341 = vector.broadcast %cst_61 : f32 to vector<1x35xf32>
    %342 = tpu.concatenate %340, %341 in 1 : vector<1x221xf32>, vector<1x35xf32> -> vector<1x256xf32>
    %c41 = arith.constant 41 : index
    %343 = memref.load %arg1[%c41] : memref<99xf32, #tpu.memory_space<smem>>
    %344 = arith.mulf %342, %13 : vector<1x256xf32>
    %345 = vector.broadcast %343 : f32 to vector<1x256xf32>
    %346 = arith.mulf %344, %345 : vector<1x256xf32>
    %347 = arith.addf %339, %346 : vector<1x256xf32>
    %348 = vector.extract_strided_slice %6 {offsets = [0, 45], sizes = [1, 211], strides = [1, 1]} : vector<1x256xf32> to vector<1x211xf32>
    %cst_62 = arith.constant 0.000000e+00 : f32
    %349 = vector.broadcast %cst_62 : f32 to vector<1x45xf32>
    %350 = tpu.concatenate %348, %349 in 1 : vector<1x211xf32>, vector<1x45xf32> -> vector<1x256xf32>
    %c42 = arith.constant 42 : index
    %351 = memref.load %arg1[%c42] : memref<99xf32, #tpu.memory_space<smem>>
    %352 = arith.mulf %350, %7 : vector<1x256xf32>
    %353 = vector.broadcast %351 : f32 to vector<1x256xf32>
    %354 = arith.mulf %352, %353 : vector<1x256xf32>
    %355 = arith.addf %347, %354 : vector<1x256xf32>
    %356 = vector.extract_strided_slice %6 {offsets = [0, 46], sizes = [1, 210], strides = [1, 1]} : vector<1x256xf32> to vector<1x210xf32>
    %cst_63 = arith.constant 0.000000e+00 : f32
    %357 = vector.broadcast %cst_63 : f32 to vector<1x46xf32>
    %358 = tpu.concatenate %356, %357 in 1 : vector<1x210xf32>, vector<1x46xf32> -> vector<1x256xf32>
    %c43 = arith.constant 43 : index
    %359 = memref.load %arg1[%c43] : memref<99xf32, #tpu.memory_space<smem>>
    %360 = arith.mulf %358, %8 : vector<1x256xf32>
    %361 = vector.broadcast %359 : f32 to vector<1x256xf32>
    %362 = arith.mulf %360, %361 : vector<1x256xf32>
    %363 = arith.addf %355, %362 : vector<1x256xf32>
    %364 = vector.extract_strided_slice %6 {offsets = [0, 47], sizes = [1, 209], strides = [1, 1]} : vector<1x256xf32> to vector<1x209xf32>
    %cst_64 = arith.constant 0.000000e+00 : f32
    %365 = vector.broadcast %cst_64 : f32 to vector<1x47xf32>
    %366 = tpu.concatenate %364, %365 in 1 : vector<1x209xf32>, vector<1x47xf32> -> vector<1x256xf32>
    %c44 = arith.constant 44 : index
    %367 = memref.load %arg1[%c44] : memref<99xf32, #tpu.memory_space<smem>>
    %368 = arith.mulf %366, %9 : vector<1x256xf32>
    %369 = vector.broadcast %367 : f32 to vector<1x256xf32>
    %370 = arith.mulf %368, %369 : vector<1x256xf32>
    %371 = arith.addf %363, %370 : vector<1x256xf32>
    %372 = vector.extract_strided_slice %6 {offsets = [0, 48], sizes = [1, 208], strides = [1, 1]} : vector<1x256xf32> to vector<1x208xf32>
    %cst_65 = arith.constant 0.000000e+00 : f32
    %373 = vector.broadcast %cst_65 : f32 to vector<1x48xf32>
    %374 = tpu.concatenate %372, %373 in 1 : vector<1x208xf32>, vector<1x48xf32> -> vector<1x256xf32>
    %c45 = arith.constant 45 : index
    %375 = memref.load %arg1[%c45] : memref<99xf32, #tpu.memory_space<smem>>
    %376 = arith.mulf %374, %10 : vector<1x256xf32>
    %377 = vector.broadcast %375 : f32 to vector<1x256xf32>
    %378 = arith.mulf %376, %377 : vector<1x256xf32>
    %379 = arith.addf %371, %378 : vector<1x256xf32>
    %380 = vector.extract_strided_slice %6 {offsets = [0, 49], sizes = [1, 207], strides = [1, 1]} : vector<1x256xf32> to vector<1x207xf32>
    %cst_66 = arith.constant 0.000000e+00 : f32
    %381 = vector.broadcast %cst_66 : f32 to vector<1x49xf32>
    %382 = tpu.concatenate %380, %381 in 1 : vector<1x207xf32>, vector<1x49xf32> -> vector<1x256xf32>
    %c46 = arith.constant 46 : index
    %383 = memref.load %arg1[%c46] : memref<99xf32, #tpu.memory_space<smem>>
    %384 = arith.mulf %382, %11 : vector<1x256xf32>
    %385 = vector.broadcast %383 : f32 to vector<1x256xf32>
    %386 = arith.mulf %384, %385 : vector<1x256xf32>
    %387 = arith.addf %379, %386 : vector<1x256xf32>
    %388 = vector.extract_strided_slice %6 {offsets = [0, 50], sizes = [1, 206], strides = [1, 1]} : vector<1x256xf32> to vector<1x206xf32>
    %cst_67 = arith.constant 0.000000e+00 : f32
    %389 = vector.broadcast %cst_67 : f32 to vector<1x50xf32>
    %390 = tpu.concatenate %388, %389 in 1 : vector<1x206xf32>, vector<1x50xf32> -> vector<1x256xf32>
    %c47 = arith.constant 47 : index
    %391 = memref.load %arg1[%c47] : memref<99xf32, #tpu.memory_space<smem>>
    %392 = arith.mulf %390, %12 : vector<1x256xf32>
    %393 = vector.broadcast %391 : f32 to vector<1x256xf32>
    %394 = arith.mulf %392, %393 : vector<1x256xf32>
    %395 = arith.addf %387, %394 : vector<1x256xf32>
    %396 = vector.extract_strided_slice %6 {offsets = [0, 51], sizes = [1, 205], strides = [1, 1]} : vector<1x256xf32> to vector<1x205xf32>
    %cst_68 = arith.constant 0.000000e+00 : f32
    %397 = vector.broadcast %cst_68 : f32 to vector<1x51xf32>
    %398 = tpu.concatenate %396, %397 in 1 : vector<1x205xf32>, vector<1x51xf32> -> vector<1x256xf32>
    %c48 = arith.constant 48 : index
    %399 = memref.load %arg1[%c48] : memref<99xf32, #tpu.memory_space<smem>>
    %400 = arith.mulf %398, %13 : vector<1x256xf32>
    %401 = vector.broadcast %399 : f32 to vector<1x256xf32>
    %402 = arith.mulf %400, %401 : vector<1x256xf32>
    %403 = arith.addf %395, %402 : vector<1x256xf32>
    %cst_69 = arith.constant 0.000000e+00 : f32
    %404 = vector.broadcast %cst_69 : f32 to vector<1x51xf32>
    %405 = vector.extract_strided_slice %4 {offsets = [0, 0], sizes = [1, 205], strides = [1, 1]} : vector<1x256xf32> to vector<1x205xf32>
    %406 = tpu.concatenate %404, %405 in 1 : vector<1x51xf32>, vector<1x205xf32> -> vector<1x256xf32>
    %c49 = arith.constant 49 : index
    %407 = memref.load %arg1[%c49] : memref<99xf32, #tpu.memory_space<smem>>
    %408 = arith.mulf %406, %7 : vector<1x256xf32>
    %409 = vector.broadcast %407 : f32 to vector<1x256xf32>
    %410 = arith.mulf %408, %409 : vector<1x256xf32>
    %411 = arith.addf %403, %410 : vector<1x256xf32>
    %cst_70 = arith.constant 0.000000e+00 : f32
    %412 = vector.broadcast %cst_70 : f32 to vector<1x50xf32>
    %413 = vector.extract_strided_slice %4 {offsets = [0, 0], sizes = [1, 206], strides = [1, 1]} : vector<1x256xf32> to vector<1x206xf32>
    %414 = tpu.concatenate %412, %413 in 1 : vector<1x50xf32>, vector<1x206xf32> -> vector<1x256xf32>
    %c50 = arith.constant 50 : index
    %415 = memref.load %arg1[%c50] : memref<99xf32, #tpu.memory_space<smem>>
    %416 = arith.mulf %414, %8 : vector<1x256xf32>
    %417 = vector.broadcast %415 : f32 to vector<1x256xf32>
    %418 = arith.mulf %416, %417 : vector<1x256xf32>
    %419 = arith.addf %411, %418 : vector<1x256xf32>
    %cst_71 = arith.constant 0.000000e+00 : f32
    %420 = vector.broadcast %cst_71 : f32 to vector<1x49xf32>
    %421 = vector.extract_strided_slice %4 {offsets = [0, 0], sizes = [1, 207], strides = [1, 1]} : vector<1x256xf32> to vector<1x207xf32>
    %422 = tpu.concatenate %420, %421 in 1 : vector<1x49xf32>, vector<1x207xf32> -> vector<1x256xf32>
    %c51 = arith.constant 51 : index
    %423 = memref.load %arg1[%c51] : memref<99xf32, #tpu.memory_space<smem>>
    %424 = arith.mulf %422, %9 : vector<1x256xf32>
    %425 = vector.broadcast %423 : f32 to vector<1x256xf32>
    %426 = arith.mulf %424, %425 : vector<1x256xf32>
    %427 = arith.addf %419, %426 : vector<1x256xf32>
    %cst_72 = arith.constant 0.000000e+00 : f32
    %428 = vector.broadcast %cst_72 : f32 to vector<1x48xf32>
    %429 = vector.extract_strided_slice %4 {offsets = [0, 0], sizes = [1, 208], strides = [1, 1]} : vector<1x256xf32> to vector<1x208xf32>
    %430 = tpu.concatenate %428, %429 in 1 : vector<1x48xf32>, vector<1x208xf32> -> vector<1x256xf32>
    %c52 = arith.constant 52 : index
    %431 = memref.load %arg1[%c52] : memref<99xf32, #tpu.memory_space<smem>>
    %432 = arith.mulf %430, %10 : vector<1x256xf32>
    %433 = vector.broadcast %431 : f32 to vector<1x256xf32>
    %434 = arith.mulf %432, %433 : vector<1x256xf32>
    %435 = arith.addf %427, %434 : vector<1x256xf32>
    %cst_73 = arith.constant 0.000000e+00 : f32
    %436 = vector.broadcast %cst_73 : f32 to vector<1x47xf32>
    %437 = vector.extract_strided_slice %4 {offsets = [0, 0], sizes = [1, 209], strides = [1, 1]} : vector<1x256xf32> to vector<1x209xf32>
    %438 = tpu.concatenate %436, %437 in 1 : vector<1x47xf32>, vector<1x209xf32> -> vector<1x256xf32>
    %c53 = arith.constant 53 : index
    %439 = memref.load %arg1[%c53] : memref<99xf32, #tpu.memory_space<smem>>
    %440 = arith.mulf %438, %11 : vector<1x256xf32>
    %441 = vector.broadcast %439 : f32 to vector<1x256xf32>
    %442 = arith.mulf %440, %441 : vector<1x256xf32>
    %443 = arith.addf %435, %442 : vector<1x256xf32>
    %cst_74 = arith.constant 0.000000e+00 : f32
    %444 = vector.broadcast %cst_74 : f32 to vector<1x46xf32>
    %445 = vector.extract_strided_slice %4 {offsets = [0, 0], sizes = [1, 210], strides = [1, 1]} : vector<1x256xf32> to vector<1x210xf32>
    %446 = tpu.concatenate %444, %445 in 1 : vector<1x46xf32>, vector<1x210xf32> -> vector<1x256xf32>
    %c54 = arith.constant 54 : index
    %447 = memref.load %arg1[%c54] : memref<99xf32, #tpu.memory_space<smem>>
    %448 = arith.mulf %446, %12 : vector<1x256xf32>
    %449 = vector.broadcast %447 : f32 to vector<1x256xf32>
    %450 = arith.mulf %448, %449 : vector<1x256xf32>
    %451 = arith.addf %443, %450 : vector<1x256xf32>
    %cst_75 = arith.constant 0.000000e+00 : f32
    %452 = vector.broadcast %cst_75 : f32 to vector<1x45xf32>
    %453 = vector.extract_strided_slice %4 {offsets = [0, 0], sizes = [1, 211], strides = [1, 1]} : vector<1x256xf32> to vector<1x211xf32>
    %454 = tpu.concatenate %452, %453 in 1 : vector<1x45xf32>, vector<1x211xf32> -> vector<1x256xf32>
    %c55 = arith.constant 55 : index
    %455 = memref.load %arg1[%c55] : memref<99xf32, #tpu.memory_space<smem>>
    %456 = arith.mulf %454, %13 : vector<1x256xf32>
    %457 = vector.broadcast %455 : f32 to vector<1x256xf32>
    %458 = arith.mulf %456, %457 : vector<1x256xf32>
    %459 = arith.addf %451, %458 : vector<1x256xf32>
    %cst_76 = arith.constant 0.000000e+00 : f32
    %460 = vector.broadcast %cst_76 : f32 to vector<1x35xf32>
    %461 = vector.extract_strided_slice %4 {offsets = [0, 0], sizes = [1, 221], strides = [1, 1]} : vector<1x256xf32> to vector<1x221xf32>
    %462 = tpu.concatenate %460, %461 in 1 : vector<1x35xf32>, vector<1x221xf32> -> vector<1x256xf32>
    %c56 = arith.constant 56 : index
    %463 = memref.load %arg1[%c56] : memref<99xf32, #tpu.memory_space<smem>>
    %464 = arith.mulf %462, %7 : vector<1x256xf32>
    %465 = vector.broadcast %463 : f32 to vector<1x256xf32>
    %466 = arith.mulf %464, %465 : vector<1x256xf32>
    %467 = arith.addf %459, %466 : vector<1x256xf32>
    %cst_77 = arith.constant 0.000000e+00 : f32
    %468 = vector.broadcast %cst_77 : f32 to vector<1x34xf32>
    %469 = vector.extract_strided_slice %4 {offsets = [0, 0], sizes = [1, 222], strides = [1, 1]} : vector<1x256xf32> to vector<1x222xf32>
    %470 = tpu.concatenate %468, %469 in 1 : vector<1x34xf32>, vector<1x222xf32> -> vector<1x256xf32>
    %c57 = arith.constant 57 : index
    %471 = memref.load %arg1[%c57] : memref<99xf32, #tpu.memory_space<smem>>
    %472 = arith.mulf %470, %8 : vector<1x256xf32>
    %473 = vector.broadcast %471 : f32 to vector<1x256xf32>
    %474 = arith.mulf %472, %473 : vector<1x256xf32>
    %475 = arith.addf %467, %474 : vector<1x256xf32>
    %cst_78 = arith.constant 0.000000e+00 : f32
    %476 = vector.broadcast %cst_78 : f32 to vector<1x33xf32>
    %477 = vector.extract_strided_slice %4 {offsets = [0, 0], sizes = [1, 223], strides = [1, 1]} : vector<1x256xf32> to vector<1x223xf32>
    %478 = tpu.concatenate %476, %477 in 1 : vector<1x33xf32>, vector<1x223xf32> -> vector<1x256xf32>
    %c58 = arith.constant 58 : index
    %479 = memref.load %arg1[%c58] : memref<99xf32, #tpu.memory_space<smem>>
    %480 = arith.mulf %478, %9 : vector<1x256xf32>
    %481 = vector.broadcast %479 : f32 to vector<1x256xf32>
    %482 = arith.mulf %480, %481 : vector<1x256xf32>
    %483 = arith.addf %475, %482 : vector<1x256xf32>
    %cst_79 = arith.constant 0.000000e+00 : f32
    %484 = vector.broadcast %cst_79 : f32 to vector<1x32xf32>
    %485 = vector.extract_strided_slice %4 {offsets = [0, 0], sizes = [1, 224], strides = [1, 1]} : vector<1x256xf32> to vector<1x224xf32>
    %486 = tpu.concatenate %484, %485 in 1 : vector<1x32xf32>, vector<1x224xf32> -> vector<1x256xf32>
    %c59 = arith.constant 59 : index
    %487 = memref.load %arg1[%c59] : memref<99xf32, #tpu.memory_space<smem>>
    %488 = arith.mulf %486, %10 : vector<1x256xf32>
    %489 = vector.broadcast %487 : f32 to vector<1x256xf32>
    %490 = arith.mulf %488, %489 : vector<1x256xf32>
    %491 = arith.addf %483, %490 : vector<1x256xf32>
    %cst_80 = arith.constant 0.000000e+00 : f32
    %492 = vector.broadcast %cst_80 : f32 to vector<1x31xf32>
    %493 = vector.extract_strided_slice %4 {offsets = [0, 0], sizes = [1, 225], strides = [1, 1]} : vector<1x256xf32> to vector<1x225xf32>
    %494 = tpu.concatenate %492, %493 in 1 : vector<1x31xf32>, vector<1x225xf32> -> vector<1x256xf32>
    %c60 = arith.constant 60 : index
    %495 = memref.load %arg1[%c60] : memref<99xf32, #tpu.memory_space<smem>>
    %496 = arith.mulf %494, %11 : vector<1x256xf32>
    %497 = vector.broadcast %495 : f32 to vector<1x256xf32>
    %498 = arith.mulf %496, %497 : vector<1x256xf32>
    %499 = arith.addf %491, %498 : vector<1x256xf32>
    %cst_81 = arith.constant 0.000000e+00 : f32
    %500 = vector.broadcast %cst_81 : f32 to vector<1x30xf32>
    %501 = vector.extract_strided_slice %4 {offsets = [0, 0], sizes = [1, 226], strides = [1, 1]} : vector<1x256xf32> to vector<1x226xf32>
    %502 = tpu.concatenate %500, %501 in 1 : vector<1x30xf32>, vector<1x226xf32> -> vector<1x256xf32>
    %c61 = arith.constant 61 : index
    %503 = memref.load %arg1[%c61] : memref<99xf32, #tpu.memory_space<smem>>
    %504 = arith.mulf %502, %12 : vector<1x256xf32>
    %505 = vector.broadcast %503 : f32 to vector<1x256xf32>
    %506 = arith.mulf %504, %505 : vector<1x256xf32>
    %507 = arith.addf %499, %506 : vector<1x256xf32>
    %cst_82 = arith.constant 0.000000e+00 : f32
    %508 = vector.broadcast %cst_82 : f32 to vector<1x29xf32>
    %509 = vector.extract_strided_slice %4 {offsets = [0, 0], sizes = [1, 227], strides = [1, 1]} : vector<1x256xf32> to vector<1x227xf32>
    %510 = tpu.concatenate %508, %509 in 1 : vector<1x29xf32>, vector<1x227xf32> -> vector<1x256xf32>
    %c62 = arith.constant 62 : index
    %511 = memref.load %arg1[%c62] : memref<99xf32, #tpu.memory_space<smem>>
    %512 = arith.mulf %510, %13 : vector<1x256xf32>
    %513 = vector.broadcast %511 : f32 to vector<1x256xf32>
    %514 = arith.mulf %512, %513 : vector<1x256xf32>
    %515 = arith.addf %507, %514 : vector<1x256xf32>
    %cst_83 = arith.constant 0.000000e+00 : f32
    %516 = vector.broadcast %cst_83 : f32 to vector<1x19xf32>
    %517 = vector.extract_strided_slice %4 {offsets = [0, 0], sizes = [1, 237], strides = [1, 1]} : vector<1x256xf32> to vector<1x237xf32>
    %518 = tpu.concatenate %516, %517 in 1 : vector<1x19xf32>, vector<1x237xf32> -> vector<1x256xf32>
    %c63 = arith.constant 63 : index
    %519 = memref.load %arg1[%c63] : memref<99xf32, #tpu.memory_space<smem>>
    %520 = arith.mulf %518, %7 : vector<1x256xf32>
    %521 = vector.broadcast %519 : f32 to vector<1x256xf32>
    %522 = arith.mulf %520, %521 : vector<1x256xf32>
    %523 = arith.addf %515, %522 : vector<1x256xf32>
    %cst_84 = arith.constant 0.000000e+00 : f32
    %524 = vector.broadcast %cst_84 : f32 to vector<1x18xf32>
    %525 = vector.extract_strided_slice %4 {offsets = [0, 0], sizes = [1, 238], strides = [1, 1]} : vector<1x256xf32> to vector<1x238xf32>
    %526 = tpu.concatenate %524, %525 in 1 : vector<1x18xf32>, vector<1x238xf32> -> vector<1x256xf32>
    %c64 = arith.constant 64 : index
    %527 = memref.load %arg1[%c64] : memref<99xf32, #tpu.memory_space<smem>>
    %528 = arith.mulf %526, %8 : vector<1x256xf32>
    %529 = vector.broadcast %527 : f32 to vector<1x256xf32>
    %530 = arith.mulf %528, %529 : vector<1x256xf32>
    %531 = arith.addf %523, %530 : vector<1x256xf32>
    %cst_85 = arith.constant 0.000000e+00 : f32
    %532 = vector.broadcast %cst_85 : f32 to vector<1x17xf32>
    %533 = vector.extract_strided_slice %4 {offsets = [0, 0], sizes = [1, 239], strides = [1, 1]} : vector<1x256xf32> to vector<1x239xf32>
    %534 = tpu.concatenate %532, %533 in 1 : vector<1x17xf32>, vector<1x239xf32> -> vector<1x256xf32>
    %c65 = arith.constant 65 : index
    %535 = memref.load %arg1[%c65] : memref<99xf32, #tpu.memory_space<smem>>
    %536 = arith.mulf %534, %9 : vector<1x256xf32>
    %537 = vector.broadcast %535 : f32 to vector<1x256xf32>
    %538 = arith.mulf %536, %537 : vector<1x256xf32>
    %539 = arith.addf %531, %538 : vector<1x256xf32>
    %cst_86 = arith.constant 0.000000e+00 : f32
    %540 = vector.broadcast %cst_86 : f32 to vector<1x16xf32>
    %541 = vector.extract_strided_slice %4 {offsets = [0, 0], sizes = [1, 240], strides = [1, 1]} : vector<1x256xf32> to vector<1x240xf32>
    %542 = tpu.concatenate %540, %541 in 1 : vector<1x16xf32>, vector<1x240xf32> -> vector<1x256xf32>
    %c66 = arith.constant 66 : index
    %543 = memref.load %arg1[%c66] : memref<99xf32, #tpu.memory_space<smem>>
    %544 = arith.mulf %542, %10 : vector<1x256xf32>
    %545 = vector.broadcast %543 : f32 to vector<1x256xf32>
    %546 = arith.mulf %544, %545 : vector<1x256xf32>
    %547 = arith.addf %539, %546 : vector<1x256xf32>
    %cst_87 = arith.constant 0.000000e+00 : f32
    %548 = vector.broadcast %cst_87 : f32 to vector<1x15xf32>
    %549 = vector.extract_strided_slice %4 {offsets = [0, 0], sizes = [1, 241], strides = [1, 1]} : vector<1x256xf32> to vector<1x241xf32>
    %550 = tpu.concatenate %548, %549 in 1 : vector<1x15xf32>, vector<1x241xf32> -> vector<1x256xf32>
    %c67 = arith.constant 67 : index
    %551 = memref.load %arg1[%c67] : memref<99xf32, #tpu.memory_space<smem>>
    %552 = arith.mulf %550, %11 : vector<1x256xf32>
    %553 = vector.broadcast %551 : f32 to vector<1x256xf32>
    %554 = arith.mulf %552, %553 : vector<1x256xf32>
    %555 = arith.addf %547, %554 : vector<1x256xf32>
    %cst_88 = arith.constant 0.000000e+00 : f32
    %556 = vector.broadcast %cst_88 : f32 to vector<1x14xf32>
    %557 = vector.extract_strided_slice %4 {offsets = [0, 0], sizes = [1, 242], strides = [1, 1]} : vector<1x256xf32> to vector<1x242xf32>
    %558 = tpu.concatenate %556, %557 in 1 : vector<1x14xf32>, vector<1x242xf32> -> vector<1x256xf32>
    %c68 = arith.constant 68 : index
    %559 = memref.load %arg1[%c68] : memref<99xf32, #tpu.memory_space<smem>>
    %560 = arith.mulf %558, %12 : vector<1x256xf32>
    %561 = vector.broadcast %559 : f32 to vector<1x256xf32>
    %562 = arith.mulf %560, %561 : vector<1x256xf32>
    %563 = arith.addf %555, %562 : vector<1x256xf32>
    %cst_89 = arith.constant 0.000000e+00 : f32
    %564 = vector.broadcast %cst_89 : f32 to vector<1x13xf32>
    %565 = vector.extract_strided_slice %4 {offsets = [0, 0], sizes = [1, 243], strides = [1, 1]} : vector<1x256xf32> to vector<1x243xf32>
    %566 = tpu.concatenate %564, %565 in 1 : vector<1x13xf32>, vector<1x243xf32> -> vector<1x256xf32>
    %c69 = arith.constant 69 : index
    %567 = memref.load %arg1[%c69] : memref<99xf32, #tpu.memory_space<smem>>
    %568 = arith.mulf %566, %13 : vector<1x256xf32>
    %569 = vector.broadcast %567 : f32 to vector<1x256xf32>
    %570 = arith.mulf %568, %569 : vector<1x256xf32>
    %571 = arith.addf %563, %570 : vector<1x256xf32>
    %cst_90 = arith.constant 0.000000e+00 : f32
    %572 = vector.broadcast %cst_90 : f32 to vector<1x3xf32>
    %573 = vector.extract_strided_slice %4 {offsets = [0, 0], sizes = [1, 253], strides = [1, 1]} : vector<1x256xf32> to vector<1x253xf32>
    %574 = tpu.concatenate %572, %573 in 1 : vector<1x3xf32>, vector<1x253xf32> -> vector<1x256xf32>
    %c70 = arith.constant 70 : index
    %575 = memref.load %arg1[%c70] : memref<99xf32, #tpu.memory_space<smem>>
    %576 = arith.mulf %574, %7 : vector<1x256xf32>
    %577 = vector.broadcast %575 : f32 to vector<1x256xf32>
    %578 = arith.mulf %576, %577 : vector<1x256xf32>
    %579 = arith.addf %571, %578 : vector<1x256xf32>
    %cst_91 = arith.constant 0.000000e+00 : f32
    %580 = vector.broadcast %cst_91 : f32 to vector<1x2xf32>
    %581 = vector.extract_strided_slice %4 {offsets = [0, 0], sizes = [1, 254], strides = [1, 1]} : vector<1x256xf32> to vector<1x254xf32>
    %582 = tpu.concatenate %580, %581 in 1 : vector<1x2xf32>, vector<1x254xf32> -> vector<1x256xf32>
    %c71 = arith.constant 71 : index
    %583 = memref.load %arg1[%c71] : memref<99xf32, #tpu.memory_space<smem>>
    %584 = arith.mulf %582, %8 : vector<1x256xf32>
    %585 = vector.broadcast %583 : f32 to vector<1x256xf32>
    %586 = arith.mulf %584, %585 : vector<1x256xf32>
    %587 = arith.addf %579, %586 : vector<1x256xf32>
    %cst_92 = arith.constant 0.000000e+00 : f32
    %588 = vector.broadcast %cst_92 : f32 to vector<1x1xf32>
    %589 = vector.extract_strided_slice %4 {offsets = [0, 0], sizes = [1, 255], strides = [1, 1]} : vector<1x256xf32> to vector<1x255xf32>
    %590 = tpu.concatenate %588, %589 in 1 : vector<1x1xf32>, vector<1x255xf32> -> vector<1x256xf32>
    %c72 = arith.constant 72 : index
    %591 = memref.load %arg1[%c72] : memref<99xf32, #tpu.memory_space<smem>>
    %592 = arith.mulf %590, %9 : vector<1x256xf32>
    %593 = vector.broadcast %591 : f32 to vector<1x256xf32>
    %594 = arith.mulf %592, %593 : vector<1x256xf32>
    %595 = arith.addf %587, %594 : vector<1x256xf32>
    %c73 = arith.constant 73 : index
    %596 = memref.load %arg1[%c73] : memref<99xf32, #tpu.memory_space<smem>>
    %597 = arith.mulf %4, %10 : vector<1x256xf32>
    %598 = vector.broadcast %596 : f32 to vector<1x256xf32>
    %599 = arith.mulf %597, %598 : vector<1x256xf32>
    %600 = arith.addf %595, %599 : vector<1x256xf32>
    %601 = vector.extract_strided_slice %4 {offsets = [0, 1], sizes = [1, 255], strides = [1, 1]} : vector<1x256xf32> to vector<1x255xf32>
    %cst_93 = arith.constant 0.000000e+00 : f32
    %602 = vector.broadcast %cst_93 : f32 to vector<1x1xf32>
    %603 = tpu.concatenate %601, %602 in 1 : vector<1x255xf32>, vector<1x1xf32> -> vector<1x256xf32>
    %c74 = arith.constant 74 : index
    %604 = memref.load %arg1[%c74] : memref<99xf32, #tpu.memory_space<smem>>
    %605 = arith.mulf %603, %11 : vector<1x256xf32>
    %606 = vector.broadcast %604 : f32 to vector<1x256xf32>
    %607 = arith.mulf %605, %606 : vector<1x256xf32>
    %608 = arith.addf %600, %607 : vector<1x256xf32>
    %609 = vector.extract_strided_slice %4 {offsets = [0, 2], sizes = [1, 254], strides = [1, 1]} : vector<1x256xf32> to vector<1x254xf32>
    %cst_94 = arith.constant 0.000000e+00 : f32
    %610 = vector.broadcast %cst_94 : f32 to vector<1x2xf32>
    %611 = tpu.concatenate %609, %610 in 1 : vector<1x254xf32>, vector<1x2xf32> -> vector<1x256xf32>
    %c75 = arith.constant 75 : index
    %612 = memref.load %arg1[%c75] : memref<99xf32, #tpu.memory_space<smem>>
    %613 = arith.mulf %611, %12 : vector<1x256xf32>
    %614 = vector.broadcast %612 : f32 to vector<1x256xf32>
    %615 = arith.mulf %613, %614 : vector<1x256xf32>
    %616 = arith.addf %608, %615 : vector<1x256xf32>
    %617 = vector.extract_strided_slice %4 {offsets = [0, 3], sizes = [1, 253], strides = [1, 1]} : vector<1x256xf32> to vector<1x253xf32>
    %cst_95 = arith.constant 0.000000e+00 : f32
    %618 = vector.broadcast %cst_95 : f32 to vector<1x3xf32>
    %619 = tpu.concatenate %617, %618 in 1 : vector<1x253xf32>, vector<1x3xf32> -> vector<1x256xf32>
    %c76 = arith.constant 76 : index
    %620 = memref.load %arg1[%c76] : memref<99xf32, #tpu.memory_space<smem>>
    %621 = arith.mulf %619, %13 : vector<1x256xf32>
    %622 = vector.broadcast %620 : f32 to vector<1x256xf32>
    %623 = arith.mulf %621, %622 : vector<1x256xf32>
    %624 = arith.addf %616, %623 : vector<1x256xf32>
    %625 = vector.extract_strided_slice %4 {offsets = [0, 13], sizes = [1, 243], strides = [1, 1]} : vector<1x256xf32> to vector<1x243xf32>
    %cst_96 = arith.constant 0.000000e+00 : f32
    %626 = vector.broadcast %cst_96 : f32 to vector<1x13xf32>
    %627 = tpu.concatenate %625, %626 in 1 : vector<1x243xf32>, vector<1x13xf32> -> vector<1x256xf32>
    %c77 = arith.constant 77 : index
    %628 = memref.load %arg1[%c77] : memref<99xf32, #tpu.memory_space<smem>>
    %629 = arith.mulf %627, %7 : vector<1x256xf32>
    %630 = vector.broadcast %628 : f32 to vector<1x256xf32>
    %631 = arith.mulf %629, %630 : vector<1x256xf32>
    %632 = arith.addf %624, %631 : vector<1x256xf32>
    %633 = vector.extract_strided_slice %4 {offsets = [0, 14], sizes = [1, 242], strides = [1, 1]} : vector<1x256xf32> to vector<1x242xf32>
    %cst_97 = arith.constant 0.000000e+00 : f32
    %634 = vector.broadcast %cst_97 : f32 to vector<1x14xf32>
    %635 = tpu.concatenate %633, %634 in 1 : vector<1x242xf32>, vector<1x14xf32> -> vector<1x256xf32>
    %c78 = arith.constant 78 : index
    %636 = memref.load %arg1[%c78] : memref<99xf32, #tpu.memory_space<smem>>
    %637 = arith.mulf %635, %8 : vector<1x256xf32>
    %638 = vector.broadcast %636 : f32 to vector<1x256xf32>
    %639 = arith.mulf %637, %638 : vector<1x256xf32>
    %640 = arith.addf %632, %639 : vector<1x256xf32>
    %641 = vector.extract_strided_slice %4 {offsets = [0, 15], sizes = [1, 241], strides = [1, 1]} : vector<1x256xf32> to vector<1x241xf32>
    %cst_98 = arith.constant 0.000000e+00 : f32
    %642 = vector.broadcast %cst_98 : f32 to vector<1x15xf32>
    %643 = tpu.concatenate %641, %642 in 1 : vector<1x241xf32>, vector<1x15xf32> -> vector<1x256xf32>
    %c79 = arith.constant 79 : index
    %644 = memref.load %arg1[%c79] : memref<99xf32, #tpu.memory_space<smem>>
    %645 = arith.mulf %643, %9 : vector<1x256xf32>
    %646 = vector.broadcast %644 : f32 to vector<1x256xf32>
    %647 = arith.mulf %645, %646 : vector<1x256xf32>
    %648 = arith.addf %640, %647 : vector<1x256xf32>
    %649 = vector.extract_strided_slice %4 {offsets = [0, 16], sizes = [1, 240], strides = [1, 1]} : vector<1x256xf32> to vector<1x240xf32>
    %cst_99 = arith.constant 0.000000e+00 : f32
    %650 = vector.broadcast %cst_99 : f32 to vector<1x16xf32>
    %651 = tpu.concatenate %649, %650 in 1 : vector<1x240xf32>, vector<1x16xf32> -> vector<1x256xf32>
    %c80 = arith.constant 80 : index
    %652 = memref.load %arg1[%c80] : memref<99xf32, #tpu.memory_space<smem>>
    %653 = arith.mulf %651, %10 : vector<1x256xf32>
    %654 = vector.broadcast %652 : f32 to vector<1x256xf32>
    %655 = arith.mulf %653, %654 : vector<1x256xf32>
    %656 = arith.addf %648, %655 : vector<1x256xf32>
    %657 = vector.extract_strided_slice %4 {offsets = [0, 17], sizes = [1, 239], strides = [1, 1]} : vector<1x256xf32> to vector<1x239xf32>
    %cst_100 = arith.constant 0.000000e+00 : f32
    %658 = vector.broadcast %cst_100 : f32 to vector<1x17xf32>
    %659 = tpu.concatenate %657, %658 in 1 : vector<1x239xf32>, vector<1x17xf32> -> vector<1x256xf32>
    %c81 = arith.constant 81 : index
    %660 = memref.load %arg1[%c81] : memref<99xf32, #tpu.memory_space<smem>>
    %661 = arith.mulf %659, %11 : vector<1x256xf32>
    %662 = vector.broadcast %660 : f32 to vector<1x256xf32>
    %663 = arith.mulf %661, %662 : vector<1x256xf32>
    %664 = arith.addf %656, %663 : vector<1x256xf32>
    %665 = vector.extract_strided_slice %4 {offsets = [0, 18], sizes = [1, 238], strides = [1, 1]} : vector<1x256xf32> to vector<1x238xf32>
    %cst_101 = arith.constant 0.000000e+00 : f32
    %666 = vector.broadcast %cst_101 : f32 to vector<1x18xf32>
    %667 = tpu.concatenate %665, %666 in 1 : vector<1x238xf32>, vector<1x18xf32> -> vector<1x256xf32>
    %c82 = arith.constant 82 : index
    %668 = memref.load %arg1[%c82] : memref<99xf32, #tpu.memory_space<smem>>
    %669 = arith.mulf %667, %12 : vector<1x256xf32>
    %670 = vector.broadcast %668 : f32 to vector<1x256xf32>
    %671 = arith.mulf %669, %670 : vector<1x256xf32>
    %672 = arith.addf %664, %671 : vector<1x256xf32>
    %673 = vector.extract_strided_slice %4 {offsets = [0, 19], sizes = [1, 237], strides = [1, 1]} : vector<1x256xf32> to vector<1x237xf32>
    %cst_102 = arith.constant 0.000000e+00 : f32
    %674 = vector.broadcast %cst_102 : f32 to vector<1x19xf32>
    %675 = tpu.concatenate %673, %674 in 1 : vector<1x237xf32>, vector<1x19xf32> -> vector<1x256xf32>
    %c83 = arith.constant 83 : index
    %676 = memref.load %arg1[%c83] : memref<99xf32, #tpu.memory_space<smem>>
    %677 = arith.mulf %675, %13 : vector<1x256xf32>
    %678 = vector.broadcast %676 : f32 to vector<1x256xf32>
    %679 = arith.mulf %677, %678 : vector<1x256xf32>
    %680 = arith.addf %672, %679 : vector<1x256xf32>
    %681 = vector.extract_strided_slice %4 {offsets = [0, 29], sizes = [1, 227], strides = [1, 1]} : vector<1x256xf32> to vector<1x227xf32>
    %cst_103 = arith.constant 0.000000e+00 : f32
    %682 = vector.broadcast %cst_103 : f32 to vector<1x29xf32>
    %683 = tpu.concatenate %681, %682 in 1 : vector<1x227xf32>, vector<1x29xf32> -> vector<1x256xf32>
    %c84 = arith.constant 84 : index
    %684 = memref.load %arg1[%c84] : memref<99xf32, #tpu.memory_space<smem>>
    %685 = arith.mulf %683, %7 : vector<1x256xf32>
    %686 = vector.broadcast %684 : f32 to vector<1x256xf32>
    %687 = arith.mulf %685, %686 : vector<1x256xf32>
    %688 = arith.addf %680, %687 : vector<1x256xf32>
    %689 = vector.extract_strided_slice %4 {offsets = [0, 30], sizes = [1, 226], strides = [1, 1]} : vector<1x256xf32> to vector<1x226xf32>
    %cst_104 = arith.constant 0.000000e+00 : f32
    %690 = vector.broadcast %cst_104 : f32 to vector<1x30xf32>
    %691 = tpu.concatenate %689, %690 in 1 : vector<1x226xf32>, vector<1x30xf32> -> vector<1x256xf32>
    %c85 = arith.constant 85 : index
    %692 = memref.load %arg1[%c85] : memref<99xf32, #tpu.memory_space<smem>>
    %693 = arith.mulf %691, %8 : vector<1x256xf32>
    %694 = vector.broadcast %692 : f32 to vector<1x256xf32>
    %695 = arith.mulf %693, %694 : vector<1x256xf32>
    %696 = arith.addf %688, %695 : vector<1x256xf32>
    %697 = vector.extract_strided_slice %4 {offsets = [0, 31], sizes = [1, 225], strides = [1, 1]} : vector<1x256xf32> to vector<1x225xf32>
    %cst_105 = arith.constant 0.000000e+00 : f32
    %698 = vector.broadcast %cst_105 : f32 to vector<1x31xf32>
    %699 = tpu.concatenate %697, %698 in 1 : vector<1x225xf32>, vector<1x31xf32> -> vector<1x256xf32>
    %c86 = arith.constant 86 : index
    %700 = memref.load %arg1[%c86] : memref<99xf32, #tpu.memory_space<smem>>
    %701 = arith.mulf %699, %9 : vector<1x256xf32>
    %702 = vector.broadcast %700 : f32 to vector<1x256xf32>
    %703 = arith.mulf %701, %702 : vector<1x256xf32>
    %704 = arith.addf %696, %703 : vector<1x256xf32>
    %705 = vector.extract_strided_slice %4 {offsets = [0, 32], sizes = [1, 224], strides = [1, 1]} : vector<1x256xf32> to vector<1x224xf32>
    %cst_106 = arith.constant 0.000000e+00 : f32
    %706 = vector.broadcast %cst_106 : f32 to vector<1x32xf32>
    %707 = tpu.concatenate %705, %706 in 1 : vector<1x224xf32>, vector<1x32xf32> -> vector<1x256xf32>
    %c87 = arith.constant 87 : index
    %708 = memref.load %arg1[%c87] : memref<99xf32, #tpu.memory_space<smem>>
    %709 = arith.mulf %707, %10 : vector<1x256xf32>
    %710 = vector.broadcast %708 : f32 to vector<1x256xf32>
    %711 = arith.mulf %709, %710 : vector<1x256xf32>
    %712 = arith.addf %704, %711 : vector<1x256xf32>
    %713 = vector.extract_strided_slice %4 {offsets = [0, 33], sizes = [1, 223], strides = [1, 1]} : vector<1x256xf32> to vector<1x223xf32>
    %cst_107 = arith.constant 0.000000e+00 : f32
    %714 = vector.broadcast %cst_107 : f32 to vector<1x33xf32>
    %715 = tpu.concatenate %713, %714 in 1 : vector<1x223xf32>, vector<1x33xf32> -> vector<1x256xf32>
    %c88 = arith.constant 88 : index
    %716 = memref.load %arg1[%c88] : memref<99xf32, #tpu.memory_space<smem>>
    %717 = arith.mulf %715, %11 : vector<1x256xf32>
    %718 = vector.broadcast %716 : f32 to vector<1x256xf32>
    %719 = arith.mulf %717, %718 : vector<1x256xf32>
    %720 = arith.addf %712, %719 : vector<1x256xf32>
    %721 = vector.extract_strided_slice %4 {offsets = [0, 34], sizes = [1, 222], strides = [1, 1]} : vector<1x256xf32> to vector<1x222xf32>
    %cst_108 = arith.constant 0.000000e+00 : f32
    %722 = vector.broadcast %cst_108 : f32 to vector<1x34xf32>
    %723 = tpu.concatenate %721, %722 in 1 : vector<1x222xf32>, vector<1x34xf32> -> vector<1x256xf32>
    %c89 = arith.constant 89 : index
    %724 = memref.load %arg1[%c89] : memref<99xf32, #tpu.memory_space<smem>>
    %725 = arith.mulf %723, %12 : vector<1x256xf32>
    %726 = vector.broadcast %724 : f32 to vector<1x256xf32>
    %727 = arith.mulf %725, %726 : vector<1x256xf32>
    %728 = arith.addf %720, %727 : vector<1x256xf32>
    %729 = vector.extract_strided_slice %4 {offsets = [0, 35], sizes = [1, 221], strides = [1, 1]} : vector<1x256xf32> to vector<1x221xf32>
    %cst_109 = arith.constant 0.000000e+00 : f32
    %730 = vector.broadcast %cst_109 : f32 to vector<1x35xf32>
    %731 = tpu.concatenate %729, %730 in 1 : vector<1x221xf32>, vector<1x35xf32> -> vector<1x256xf32>
    %c90 = arith.constant 90 : index
    %732 = memref.load %arg1[%c90] : memref<99xf32, #tpu.memory_space<smem>>
    %733 = arith.mulf %731, %13 : vector<1x256xf32>
    %734 = vector.broadcast %732 : f32 to vector<1x256xf32>
    %735 = arith.mulf %733, %734 : vector<1x256xf32>
    %736 = arith.addf %728, %735 : vector<1x256xf32>
    %737 = vector.extract_strided_slice %4 {offsets = [0, 45], sizes = [1, 211], strides = [1, 1]} : vector<1x256xf32> to vector<1x211xf32>
    %cst_110 = arith.constant 0.000000e+00 : f32
    %738 = vector.broadcast %cst_110 : f32 to vector<1x45xf32>
    %739 = tpu.concatenate %737, %738 in 1 : vector<1x211xf32>, vector<1x45xf32> -> vector<1x256xf32>
    %c91 = arith.constant 91 : index
    %740 = memref.load %arg1[%c91] : memref<99xf32, #tpu.memory_space<smem>>
    %741 = arith.mulf %739, %7 : vector<1x256xf32>
    %742 = vector.broadcast %740 : f32 to vector<1x256xf32>
    %743 = arith.mulf %741, %742 : vector<1x256xf32>
    %744 = arith.addf %736, %743 : vector<1x256xf32>
    %745 = vector.extract_strided_slice %4 {offsets = [0, 46], sizes = [1, 210], strides = [1, 1]} : vector<1x256xf32> to vector<1x210xf32>
    %cst_111 = arith.constant 0.000000e+00 : f32
    %746 = vector.broadcast %cst_111 : f32 to vector<1x46xf32>
    %747 = tpu.concatenate %745, %746 in 1 : vector<1x210xf32>, vector<1x46xf32> -> vector<1x256xf32>
    %c92 = arith.constant 92 : index
    %748 = memref.load %arg1[%c92] : memref<99xf32, #tpu.memory_space<smem>>
    %749 = arith.mulf %747, %8 : vector<1x256xf32>
    %750 = vector.broadcast %748 : f32 to vector<1x256xf32>
    %751 = arith.mulf %749, %750 : vector<1x256xf32>
    %752 = arith.addf %744, %751 : vector<1x256xf32>
    %753 = vector.extract_strided_slice %4 {offsets = [0, 47], sizes = [1, 209], strides = [1, 1]} : vector<1x256xf32> to vector<1x209xf32>
    %cst_112 = arith.constant 0.000000e+00 : f32
    %754 = vector.broadcast %cst_112 : f32 to vector<1x47xf32>
    %755 = tpu.concatenate %753, %754 in 1 : vector<1x209xf32>, vector<1x47xf32> -> vector<1x256xf32>
    %c93 = arith.constant 93 : index
    %756 = memref.load %arg1[%c93] : memref<99xf32, #tpu.memory_space<smem>>
    %757 = arith.mulf %755, %9 : vector<1x256xf32>
    %758 = vector.broadcast %756 : f32 to vector<1x256xf32>
    %759 = arith.mulf %757, %758 : vector<1x256xf32>
    %760 = arith.addf %752, %759 : vector<1x256xf32>
    %761 = vector.extract_strided_slice %4 {offsets = [0, 48], sizes = [1, 208], strides = [1, 1]} : vector<1x256xf32> to vector<1x208xf32>
    %cst_113 = arith.constant 0.000000e+00 : f32
    %762 = vector.broadcast %cst_113 : f32 to vector<1x48xf32>
    %763 = tpu.concatenate %761, %762 in 1 : vector<1x208xf32>, vector<1x48xf32> -> vector<1x256xf32>
    %c94 = arith.constant 94 : index
    %764 = memref.load %arg1[%c94] : memref<99xf32, #tpu.memory_space<smem>>
    %765 = arith.mulf %763, %10 : vector<1x256xf32>
    %766 = vector.broadcast %764 : f32 to vector<1x256xf32>
    %767 = arith.mulf %765, %766 : vector<1x256xf32>
    %768 = arith.addf %760, %767 : vector<1x256xf32>
    %769 = vector.extract_strided_slice %4 {offsets = [0, 49], sizes = [1, 207], strides = [1, 1]} : vector<1x256xf32> to vector<1x207xf32>
    %cst_114 = arith.constant 0.000000e+00 : f32
    %770 = vector.broadcast %cst_114 : f32 to vector<1x49xf32>
    %771 = tpu.concatenate %769, %770 in 1 : vector<1x207xf32>, vector<1x49xf32> -> vector<1x256xf32>
    %c95 = arith.constant 95 : index
    %772 = memref.load %arg1[%c95] : memref<99xf32, #tpu.memory_space<smem>>
    %773 = arith.mulf %771, %11 : vector<1x256xf32>
    %774 = vector.broadcast %772 : f32 to vector<1x256xf32>
    %775 = arith.mulf %773, %774 : vector<1x256xf32>
    %776 = arith.addf %768, %775 : vector<1x256xf32>
    %777 = vector.extract_strided_slice %4 {offsets = [0, 50], sizes = [1, 206], strides = [1, 1]} : vector<1x256xf32> to vector<1x206xf32>
    %cst_115 = arith.constant 0.000000e+00 : f32
    %778 = vector.broadcast %cst_115 : f32 to vector<1x50xf32>
    %779 = tpu.concatenate %777, %778 in 1 : vector<1x206xf32>, vector<1x50xf32> -> vector<1x256xf32>
    %c96 = arith.constant 96 : index
    %780 = memref.load %arg1[%c96] : memref<99xf32, #tpu.memory_space<smem>>
    %781 = arith.mulf %779, %12 : vector<1x256xf32>
    %782 = vector.broadcast %780 : f32 to vector<1x256xf32>
    %783 = arith.mulf %781, %782 : vector<1x256xf32>
    %784 = arith.addf %776, %783 : vector<1x256xf32>
    %785 = vector.extract_strided_slice %4 {offsets = [0, 51], sizes = [1, 205], strides = [1, 1]} : vector<1x256xf32> to vector<1x205xf32>
    %cst_116 = arith.constant 0.000000e+00 : f32
    %786 = vector.broadcast %cst_116 : f32 to vector<1x51xf32>
    %787 = tpu.concatenate %785, %786 in 1 : vector<1x205xf32>, vector<1x51xf32> -> vector<1x256xf32>
    %c97 = arith.constant 97 : index
    %788 = memref.load %arg1[%c97] : memref<99xf32, #tpu.memory_space<smem>>
    %789 = arith.mulf %787, %13 : vector<1x256xf32>
    %790 = vector.broadcast %788 : f32 to vector<1x256xf32>
    %791 = arith.mulf %789, %790 : vector<1x256xf32>
    %792 = arith.addf %784, %791 : vector<1x256xf32>
    %c98 = arith.constant 98 : index
    %793 = memref.load %arg1[%c98] : memref<99xf32, #tpu.memory_space<smem>>
    %794 = vector.broadcast %793 : f32 to vector<1x256xf32>
    %795 = arith.addf %792, %794 : vector<1x256xf32>
    %796 = arith.negf %795 : vector<1x256xf32>
    %797 = math.exp %796 : vector<1x256xf32>
    %cst_117 = arith.constant 1.000000e+00 : f32
    %798 = vector.broadcast %cst_117 : f32 to vector<1x256xf32>
    %799 = arith.addf %798, %797 : vector<1x256xf32>
    %800 = arith.divf %798, %799 : vector<1x256xf32>
    %c0_118 = arith.constant 0 : index
    %c0_119 = arith.constant 0 : index
    %c0_120 = arith.constant 0 : index
    %801 = vector.load %arg4[%c0_118, %c0_119, %c0_120] : memref<1x1x256xf32, #tpu.memory_space<vmem>>, vector<1x1x256xf32>
    %802 = vector.shape_cast %801 : vector<1x1x256xf32> to vector<1x256xf32>
    %803 = vector.shape_cast %800 : vector<1x256xf32> to vector<1x1x256xf32>
    tpu.vector_store %arg4[%c0_118, %c0_119, %c0_120], %803 {strides = array<i32>} : memref<1x1x256xf32, #tpu.memory_space<vmem>>, vector<1x1x256xf32>,
    return
  }
  func.func @transform_0(%arg0: i32) -> i32 {
    %c0_i32 = arith.constant 0 : i32
    %c0_i32_0 = arith.constant 0 : i32
    return %c0_i32 : i32
  }
  func.func @transform_1(%arg0: i32) -> (i32, i32) {
    %c0_i32 = arith.constant 0 : i32
    %c0_i32_0 = arith.constant 0 : i32
    %c0_i32_1 = arith.constant 0 : i32
    return %c0_i32, %c0_i32_0 : i32, i32
  }
  func.func @transform_2(%arg0: i32) -> (i32, i32, i32) {
    %c0_i32 = arith.constant 0 : i32
    %c0_i32_0 = arith.constant 0 : i32
    %c0_i32_1 = arith.constant 0 : i32
    return %arg0, %c0_i32, %c0_i32_0 : i32, i32, i32
  }
  func.func @transform_3(%arg0: i32) -> (i32, i32, i32) {
    %c0_i32 = arith.constant 0 : i32
    %c0_i32_0 = arith.constant 0 : i32
    %c0_i32_1 = arith.constant 0 : i32
    return %arg0, %c0_i32, %c0_i32_0 : i32, i32, i32
  }
}

</mosaic_0001>

<bundles_post_ra>
// kernel: tpu_custom_call.1
= control target key start
LH: loop header
LB: loop body
LE: loop exit
PB: predicated region body
PF: predicated region fallthrough
CT: control target
= control target key end

     0   :  { %s4542_s0 = inlined_call_operand.hbm [shape: f32[99], index: 0, kind: input, shape index: {}]   ;;  %s4543_s1 = inlined_call_operand.hbm [shape: f32[7,256], index: 1, kind: input, shape index: {}]   ;;  %s4544_s2 = inlined_call_operand.hbm [shape: f32[2,4,256], index: 2, kind: input, shape index: {}]   ;;  %s4545_s3 = inlined_call_operand.hbm [shape: f32[2,1,256], index: 3, kind: output, shape index: {}]  }
   0x1   :  { %4680 = sst [smem:[#allocation22_spill]] %s4542_s0 }
   0x2   :  { %4681 = sst [smem:[#allocation23_spill]] %s4543_s1 }
   0x3   :  { %4682 = sst [smem:[#allocation24_spill]] %s4544_s2 }
   0x4   :  { %8 = vsyncpa [#allocation5], 0 }
   0x5   :  { %9 = vsyncpa [#allocation3], 0 }
   0x6   :  { %10 = vsyncpa [#allocation8], 0 }
   0x7   :  { %12 = vsyncpa [#allocation8 + $0x1], 0 }
   0x8   :  { %13 = vsyncpa [#allocation4], 0 }
   0x9   :  { %15 = vsyncpa [#allocation4 + $0x1], 0  ;;  %s2556_s12 = smov 0   ;;  %s2558_s13 = smov 0  }
   0xa   :  { %s2560_s14 = smov 0   ;;  %s2562_s15 = smov 0  }
   0xb LB: > { %s2577_s16 = sadd.s32 4294967295, %s2481_s15   ;;  %s2091_s17 = sadd.s32 4294967294, %s2481_s15   ;;  %s2481_s15 = sphi %s2562_s15, %s4883_s15   ;;  %s2477_s14 = sphi %s2560_s14, %s4882_s14   ;;  %s2473_s13 = sphi %s2558_s13, %s4881_s13   ;;  %s2469_s12 = sphi %s2556_s12, %s4880_s12  }
   0xc   : > { %p83_p0 = scmp.ne.s32.totalorder %s2473_s13, %s2469_s12  ;;  %p4546_p1 = scmp.eq.s32.totalorder %s2577_s16, 0 }
   0xd   : > { %p113_p3 = scmp.eq.s32.totalorder %s2091_s17, 1  ;;  %p2092_p5 = scmp.ge.s32.totalorder %s2481_s15, 1 }
   0xe   : > { %p2586_p4 = por %p4546_p1, %p83_p0  ;;  %p120_p7 = scmp.lt.s32.totalorder %s2481_s15, 3 }
   0xf   : > { %p2591_p6 = por %p113_p3, %p83_p0  ;;  %s2483_s21 = smov [#allocation6]  }
  0x10   : > { %s4683_s18 = scalar_select %p2586_p4, 1, 0 }
  0x11   : > { %s4684_s19 = scalar_select %p2591_p6, 1, 0 }
  0x12   : > { %p2596_p8 = pnand %p2092_p5, %p120_p7  ;;  %s142_s22 = sshll.u32 %s2483_s21, 4  ;;  %s2603_s22 = int_to_ptr.vmem [resolvable:$true] %s142_s22 }
  0x13   : > { %s2612_s24 = sadd.s32 1, %s2481_s15   ;;  %s70_s26 = sadd.s32 1, %s2477_s14 }
  0x14   : > { %p2223_p10 = pneg %p2596_p8  ;;  %s67_s25 = ssub.s32 %s2481_s15, %s2612_s24 }
  0x15   : > { %p2617_p12 = scmp.eq.s32.totalorder %s67_s25, 0  ;;  %s4688_s0 = sld [smem:[#allocation22_spill]] }
  0x16   : > { %p2607_p11 = pnand %p2223_p10, %p4546_p1 }
  0x18   : > { %p2338_p0 = pneg %p2607_p11 }
  0x1b   : > { %s2336_s30 = scalar_lea.hbm %s4688_s0, 16 }
  0x1c   : > { %p2337_p13 = scmp.ne.s32.totalorder %s4688_s0, %s2336_s30  ;;  %p2343_p7 = scmp.lt.u32.totalorder %s2336_s30, %s4688_s0 }
  0x1e   : > { %p2339_p3 = pnand %p2338_p0, %p2337_p13 }
  0x20   : > { %p2340_p5 = pneg %p2339_p3 }
  0x22   : > { %p2345_p10 = pnand %p2343_p7, %p2340_p5 }
  0x24   : > { %2348 = shalt.err (!%p2345_p10)
}
  0x25   : > { %s2484_s8 = smov [#allocation2]   ;;  %s4689_s1 = sld [smem:[#allocation23_spill]] }
  0x26   : > { %2226 = dma.hbm_to_smem (!%p2607_p11), %s4688_s0, 16, %s2484_s8, [#allocation5]  }
  0x2b   : > { %s2349_s21 = scalar_lea.hbm %s4689_s1, 256 }
  0x2c   : > { %p2350_p13 = scmp.ne.s32.totalorder %s4689_s1, %s2349_s21  ;;  %p2356_p7 = scmp.lt.u32.totalorder %s2349_s21, %s4689_s1 }
  0x2e   : > { %p2352_p3 = pnand %p2350_p13, %p2338_p0 }
  0x30   : > { %p2353_p5 = pneg %p2352_p3 }
  0x32   : > { %p2358_p10 = pnand %p2356_p7, %p2353_p5 }
  0x34   : > { %2361 = shalt.err (!%p2358_p10)
}
  0x35   : > { %s2362_s4 = scalar_lea.vmem %s2603_s22, 256  ;;  %p2370_p6 = scmp.lt.s32.totalorder %s2603_s22, %s2603_s22 }
  0x36   : > { %p2363_p9 = scmp.ne.s32.totalorder %s2603_s22, %s2362_s4  ;;  %p2371_p13 = scmp.lt.s32.totalorder %s2362_s4, %s2362_s4 }
  0x38   : > { %p2365_p1 = pnand %p2363_p9, %p2338_p0  ;;  %p2372_p3 = por %p2371_p13, %p2370_p6 }
  0x3a   : > { %p2366_p2 = pneg %p2365_p1 }
  0x3c   : > { %p2373_p4 = pnand %p2372_p3, %p2366_p2 }
  0x3e   : > { %2376 = shalt.err (!%p2373_p4)
}
  0x3f   : > { %2229 = dma.hbm_to_vmem [thread:$0]  (!%p2607_p11), %s4689_s1, 256, %s2603_s22, [#allocation3]  }
  0x40   : > { %s2670_s7 = scalar_select %p2617_p12, %s2477_s14, %s70_s26  }
  0x41   : > { %p77_p1 = scmp.ne.s32.totalorder %s2477_s14, %s2473_s13  ;;  %p78_p2 = scmp.eq.s32.totalorder %s2481_s15, 0 }
  0x42   : > { %p2240_p4 = scmp.lt.s32.totalorder %s2481_s15, 2  ;;  %s153_s23 = sand.u32 1, %s2477_s14  }
  0x43   : > { %p79_p6 = por %p78_p2, %p77_p1  ;;  %p4690_p9 = scmp.eq.s32.totalorder %s2577_s16, 1 }
  0x44   : > { %s2096_s9 = sshll.u32 %s153_s23, 3  ;;  %s2209_s10 = sshll.u32 %s2481_s15, 7 }
  0x45   : > { %p2679_p0 = por %p4690_p9, %p77_p1  ;;  %s4692_s2 = sld [smem:[#allocation24_spill]] }
  0x46   : > { %s157_s26 = scalar_lea.vmem [#allocation7], %s2096_s9  ;;  %p2691_p11 = pnand %p2240_p4, %p79_p6 }
  0x47   : > { %s4691_s8 = scalar_select %p2679_p0, 1, 0 }
  0x48   : > { %s165_s27 = sshll.u32 %s157_s26, 4  ;;  %s154_s25 = scalar_lea.sflag [#allocation8], %s153_s23  ;;  %s2689_s27 = int_to_ptr.vmem [resolvable:$true] %s165_s27 }
  0x49   : > { %p2379_p5 = pneg %p2691_p11 }
  0x4b   : > { %s2687_s22 = scalar_lea.hbm %s4692_s2, %s2209_s10  ;;  %s2382_s4 = scalar_lea.hbm %s4692_s2, 256 }
  0x4c   : > { %s2377_s28 = scalar_lea.hbm %s2687_s22, 128  ;;  %p2383_p13 = scmp.lt.u32.totalorder %s2687_s22, %s4692_s2 }
  0x4d   : > { %p2378_p12 = scmp.ne.s32.totalorder %s2687_s22, %s2377_s28  ;;  %p2384_p3 = scmp.lt.u32.totalorder %s2382_s4, %s2377_s28 }
  0x4e   : > { %p2386_p2 = scmp.lt.u32.totalorder %s2377_s28, %s2687_s22 }
  0x4f   : > { %p2380_p7 = pnand %p2379_p5, %p2378_p12  ;;  %p2385_p1 = por %p2384_p3, %p2383_p13 }
  0x51   : > { %p2381_p10 = pneg %p2380_p7  ;;  %p2387_p4 = por %p2386_p2, %p2385_p1 }
  0x53   : > { %p2388_p6 = pnand %p2387_p4, %p2381_p10 }
  0x55   : > { %2391 = shalt.err (!%p2388_p6)
}
  0x56   : > { %s2392_s23 = scalar_lea.vmem %s2689_s27, 128  ;;  %s2485_s9 = smov [#allocation7]  }
  0x57   : > { %p2393_p9 = scmp.ne.s32.totalorder %s2689_s27, %s2392_s23  ;;  %s2397_s10 = sshll.u32 %s2485_s9, 4  ;;  %s2398_s10 = int_to_ptr.vmem [resolvable:$false] %s2397_s10 }
  0x58   : > { %s2399_s11 = scalar_lea.vmem %s2398_s10, 256  ;;  %p2400_p0 = scmp.lt.s32.totalorder %s2689_s27, %s2398_s10 }
  0x59   : > { %p2395_p12 = pnand %p2393_p9, %p2379_p5  ;;  %p2401_p13 = scmp.lt.s32.totalorder %s2399_s11, %s2392_s23 }
  0x5b   : > { %p2396_p7 = pneg %p2395_p12  ;;  %p2402_p3 = por %p2401_p13, %p2400_p0 }
  0x5d   : > { %p2403_p1 = pnand %p2402_p3, %p2396_p7 }
  0x5f   : > { %2406 = shalt.err (!%p2403_p1)
}
  0x60   : > { %2233 = dma.hbm_to_vmem [thread:$0]  (!%p2691_p11), %s2687_s22, 128, %s2689_s27, %s154_s25  }
  0x61   : > { %174 = sbr.rel (%p2596_p8) target bundleno = 685 (0x2ad), region = 32 }
  0x68   : > { %p4694_p5 = scmp.eq.s32.totalorder %s2577_s16, 0 }
  0x6a   : > { %2452 = dma.done.wait (%p4694_p5), [#allocation5], 16   ;;  %p4695_p10 = pmov %p4694_p5 }
  0x6b   : > { %p4696_p2 = pmov %p4694_p5 }
  0x6c   : > { %2454 = vsyncadd (%p4695_p10), [#allocation5], 4294967280 }
  0x6d   : > { %2456 = dma.done.wait (%p4696_p2), [#allocation3], 256   ;;  %p4697_p0 = pmov %p4696_p2 }
  0x6e   : > { %s2731_s17 = sand.u32 1, %s2473_s13   ;;  %p4698_p8 = scmp.ne.s32.totalorder %s4683_s18, 0 }
  0x6f   : > { %2458 = vsyncadd (%p4697_p0), [#allocation3], 4294967040  ;;  %s2102_s20 = sshll.u32 %s2731_s17, 3  ;;  %s185_s22 = scalar_lea.sflag [#allocation8], %s2731_s17 }
  0x70   : > { %s188_s26 = scalar_lea.vmem [#allocation7], %s2102_s20 }
  0x71   : > { %2460 = dma.done.wait (%p4698_p8), %s185_s22, 128  }
  0x72   : > { %2462 = vsyncadd (%p4698_p8), %s185_s22, 4294967168 }
  0x73   : > { %193 = sfence }
  0x74   : > { %v2739_v0 = vld [vmem:[%s188_s26] sm:$0xff]  ;;  %vm216_vm0 = vcmask 1043456   ;;  %s2486_s18 = smov 50   ;;  %s2487_s27 = smov 51   ;;  %v4631_v53 = vlaneseq  ;;  %vm268_vm1 = vcmask 416768   ;;  %vm296_vm2 = vcmask 408576  }
  0x75   : > { %v217_v1 = vsel %vm216_vm0, %v2739_v0, 0.0  ;;  %v2745_v2 = vcombine.high %v2739_v0, %v2739_v0  ;;  %s4644_s21 = smov 49   ;;  %s4642_s25 = smov 48   ;;  %v233_v47 = vsel %vm216_vm0, %v2739_v0, -inf  ;;  %vm324_vm3 = vcmask 400384  }
  0x76   : > { %v218_v3 = vrot.slane %v217_v1, 4  ;;  %s4640_s28 = smov 47   ;;  %s4638_s29 = smov 46   ;;  %v234_v49 = vrot.slane %v233_v47, 4  ;;  %v3000_v58 = vshrl.u32 %v4631_v53, 7  ;;  %vm352_vm4 = vcmask 392192  }
  0x77   : > { %v224_v4 = vsel %vm216_vm0, %v2745_v2, 0.0  ;;  %s4629_s30 = smov 45   ;;  %s4627_s4 = smov 35   ;;  %v240_v44 = vsel %vm216_vm0, %v2745_v2, -inf  ;;  %vm380_vm5 = vcmask 384000   ;;  %vm408_vm6 = vcmask 375808  }
  0x78   : > { %v219_v5 = vadd.f32 %v218_v3, %v217_v1  ;;  %v225_v6 = vrot.slane %v224_v4, 4  ;;  %s4625_s5 = smov 34   ;;  %s4623_s6 = smov 33   ;;  %v241_v48 = vrot.slane %v240_v44, 4  ;;  %v235_v54 = vmax.f32 %v233_v47, %v234_v49  ;;  %4701 = vst [vmem:[#allocation16_spill] sm:$0xff] %v3000_v58 }
  0x79   : > { %s4619_s23 = smov 32   ;;  %s4617_s9 = smov 31   ;;  %v3009_v62 = vsub.s32 1, %v3000_v58  ;;  %v249_v63 = vld [vmem:[#allocation6] ss:$8 sm:$0x3] }
  0x7a   : > { %v220_v7 = vrot.slane %v219_v5, 2  ;;  %v226_v8 = vadd.f32 %v225_v6, %v224_v4  ;;  %s4615_s10 = smov 30   ;;  %s4549_s11 = smov 29   ;;  %v242_v52 = vmax.f32 %v240_v44, %v241_v48  ;;  %v236_v59 = vrot.slane %v235_v54, 2 }
  0x7b   : > { %s4551_s20 = smov 19   ;;  %s4553_s22 = smov 18   ;;  %v3016_v1 = vrot.slane %v249_v63, %v3009_v62  ;;  %v251_v3 = vld [vmem:[#allocation6 + $0x1] ss:$8 sm:$0x3]  ;;  %v3021_v4 = vsub.s32 0, %v3000_v58 }
  0x7c   : > { %v221_v9 = vadd.f32 %v220_v7, %v219_v5  ;;  %v227_v10 = vrot.slane %v226_v8, 2  ;;  %s4555_s26 = smov 17   ;;  %v243_v57 = vrot.slane %v242_v52, 2  ;;  %v237_v2 = vmax.f32 %v235_v54, %v236_v59  ;;  %s3169_s0 = sld [smem:[#allocation2 + $0x11]] }
  0x7d   : > { %v3059_v44 = vrot.slane %v249_v63, %v3021_v4  ;;  %vm436_vm7 = vcmask 367616   ;;  %vm464_vm8 = vcmask 285696   ;;  %vm481_vm9 = vcmask 277504   ;;  %s4710_s1 = smov 49   ;;  %s3200_s2 = sld [smem:[#allocation2 + $0x13]] }
  0x7e   : > { %v222_v11 = vrot.slane %v221_v9, 1  ;;  %v228_v12 = vadd.f32 %v227_v10, %v226_v8  ;;  %v244_v0 = vmax.f32 %v242_v52, %v243_v57  ;;  %v3033_v8 = vrot.slane %v251_v3, %v3009_v62  ;;  %v257_v52 = vld [vmem:[#allocation6 + $0x4] ss:$8 sm:$0x3]  ;;  %p4877_p4 = scmp.ne.s32.totalorder %s4691_s8, 0 }
  0x7f   : > { %vm4648_vm10 = vcmask 269312   ;;  %vm4649_vm11 = vcmask 261120   ;;  %vm4650_vm12 = vcmask 252928   ;;  %vm4651_vm13 = vcmask 244736  }
  0x80   : > { %v223_v13 = vadd.f32 %v222_v11, %v221_v9  ;;  %v229_v14 = vrot.slane %v228_v12, 1  ;;  %v253_v9 = vld [vmem:[#allocation6 + $0x2] ss:$8 sm:$0x3]  ;;  %v245_v11 = vrot.slane %v244_v0, 1  ;;  %vm4652_vm14 = vcmask 236544  }
  0x81   : > { %v3062_v47 = vrot.slane %v253_v9, %v3021_v4  ;;  %v3066_v49 = vrot.slane %v253_v9, %v3009_v62  ;;  %vm4653_vm15 = vcmask 154624   ;;  %vm4654_vm0 = vcmask 146432  }
  0x82   : > { %v2749_v15 = vmul.f32 0.25, %v223_v13  ;;  %v230_v16 = vadd.f32 %v229_v14, %v228_v12  ;;  %v238_v13 = vrot.slane %v237_v2, 1  ;;  %v3050_v14 = vrot.slane %v251_v3, %v3021_v4 }
  0x83   : > { %v3076_v59 = vmax.f32 %v244_v0, %v245_v11  ;;  %v3091_v0 = vrot.slane %v257_v52, %v3021_v4  ;;  %v3097_v11 = vrot.slane %v257_v52, %v3009_v62 }
  0x84   : > { %4699 = vst [vmem:[#allocation14_spill] sm:$0xff] %v2749_v15  ;;  %292 = vrot.lane.b32.xlu1 %v2749_v15, %s2486_s18  ;;  %264 = vrot.lane.b32.xlu0 %v2749_v15, %s2487_s27  ;;  %v2755_v17 = vmul.f32 0.25, %v230_v16  ;;  %v255_v16 = vld [vmem:[#allocation6 + $0x3] ss:$8 sm:$0x3] }
  0x85   : > { %v3079_v63 = vrot.slane %v255_v16, %v3021_v4 }
  0x86   : > { %4700 = vst [vmem:[#allocation15_spill] sm:$0xff] %v2755_v17 }
  0x88   : > { %320 = vrot.lane.b32.xlu0 %v2749_v15, %s4644_s21  ;;  %294 = vrot.lane.b32.xlu1 %v2755_v17, %s2486_s18 }
  0x8c   : > { %348 = vrot.lane.b32.xlu0 %v2749_v15, %s4642_s25  ;;  %322 = vrot.lane.b32.xlu1 %v2755_v17, %s4644_s21  ;;  %s3167_s21 = sld [smem:[#allocation2 + $0x10]] }
  0x90   : > { %376 = vrot.lane.b32.xlu0 %v2749_v15, %s4640_s28  ;;  %350 = vrot.lane.b32.xlu1 %v2755_v17, %s4642_s25  ;;  %s3143_s25 = sld [smem:[#allocation2 + $0xe]] }
  0x94   : > { %378 = vrot.lane.b32.xlu1 %v2755_v17, %s4640_s28  ;;  %266 = vrot.lane.b32.xlu0 %v2755_v17, %s2487_s27  ;;  %s3141_s28 = sld [smem:[#allocation2 + $0xd]] }
  0x98   : > { %406 = vrot.lane.b32.xlu1 %v2755_v17, %s4638_s29  ;;  %404 = vrot.lane.b32.xlu0 %v2749_v15, %s4638_s29  ;;  %s3130_s29 = sld [smem:[#allocation2 + $0xc]] }
  0x9c   : > { %434 = vrot.lane.b32.xlu1 %v2755_v17, %s4629_s30  ;;  %432 = vrot.lane.b32.xlu0 %v2749_v15, %s4629_s30  ;;  %s3101_s30 = sld [smem:[#allocation2 + $0x9]] }
  0xa0   : > { %462 = vrot.lane.b32.xlu1 %v2755_v17, %s4627_s4  ;;  %460 = vrot.lane.b32.xlu0 %v2749_v15, %s4627_s4  ;;  %s3099_s4 = sld [smem:[#allocation2 + $0x8]] }
  0xa4   : > { %479 = vrot.lane.b32.xlu1 %v2755_v17, %s4625_s5  ;;  %477 = vrot.lane.b32.xlu0 %v2749_v15, %s4625_s5  ;;  %s3083_s5 = sld [smem:[#allocation2 + $0x7]] }
  0xa8   : > { %496 = vrot.lane.b32.xlu1 %v2755_v17, %s4623_s6  ;;  %494 = vrot.lane.b32.xlu0 %v2749_v15, %s4623_s6  ;;  %s4636_s6 = smov 77  }
  0xac   : > { %513 = vrot.lane.b32.xlu1 %v2755_v17, %s4619_s23  ;;  %511 = vrot.lane.b32.xlu0 %v2749_v15, %s4619_s23  ;;  %s3052_s23 = sld [smem:[#allocation2 + $0x5]] }
  0xb0   : > { %530 = vrot.lane.b32.xlu1 %v2755_v17, %s4617_s9  ;;  %528 = vrot.lane.b32.xlu0 %v2749_v15, %s4617_s9  ;;  %s3044_s9 = sld [smem:[#allocation2 + $0x4]] }
  0xb4   : > { %547 = vrot.lane.b32.xlu1 %v2755_v17, %s4615_s10  ;;  %545 = vrot.lane.b32.xlu0 %v2749_v15, %s4615_s10  ;;  %s4621_s10 = smov 78  }
  0xb8   : > { %564 = vrot.lane.b32.xlu1 %v2755_v17, %s4549_s11  ;;  %562 = vrot.lane.b32.xlu0 %v2749_v15, %s4549_s11  ;;  %s4557_s11 = smov 16  }
  0xbc   : > { %581 = vrot.lane.b32.xlu1 %v2755_v17, %s4551_s20  ;;  %579 = vrot.lane.b32.xlu0 %v2749_v15, %s4551_s20  ;;  %s4559_s20 = smov 15  }
  0xc0   : > { %598 = vrot.lane.b32.xlu1 %v2755_v17, %s4553_s22  ;;  %596 = vrot.lane.b32.xlu0 %v2749_v15, %s4553_s22  ;;  %s4561_s22 = smov 14  }
  0xc4   : > { %615 = vrot.lane.b32.xlu1 %v2755_v17, %s4555_s26  ;;  %613 = vrot.lane.b32.xlu0 %v2749_v15, %s4555_s26  ;;  %s4563_s26 = smov 13  }
  0xc8   : > { %632 = vrot.lane.b32.xlu1 %v2755_v17, %s4557_s11  ;;  %630 = vrot.lane.b32.xlu0 %v2749_v15, %s4557_s11  ;;  %s4565_s11 = smov 3  }
  0xcc   : > { %649 = vrot.lane.b32.xlu1 %v2755_v17, %s4559_s20  ;;  %647 = vrot.lane.b32.xlu0 %v2749_v15, %s4559_s20  ;;  %s4567_s20 = smov 2  }
  0xd0   : > { %666 = vrot.lane.b32.xlu1 %v2755_v17, %s4561_s22  ;;  %664 = vrot.lane.b32.xlu0 %v2749_v15, %s4561_s22  ;;  %s4569_s22 = smov 1  }
  0xd4   : > { %683 = vrot.lane.b32.xlu1 %v2755_v17, %s4563_s26  ;;  %681 = vrot.lane.b32.xlu0 %v2749_v15, %s4563_s26  ;;  %s4571_s26 = smov 127  }
  0xd8   : > { %700 = vrot.lane.b32.xlu1 %v2755_v17, %s4565_s11  ;;  %698 = vrot.lane.b32.xlu0 %v2749_v15, %s4565_s11  ;;  %s4573_s11 = smov 126  }
  0xdc   : > { %717 = vrot.lane.b32.xlu1 %v2755_v17, %s4567_s20  ;;  %715 = vrot.lane.b32.xlu0 %v2749_v15, %s4567_s20  ;;  %s4613_s20 = smov 125  }
  0xe0   : > { %734 = vrot.lane.b32.xlu1 %v2755_v17, %s4569_s22  ;;  %732 = vrot.lane.b32.xlu0 %v2749_v15, %s4569_s22  ;;  %s4575_s22 = smov 115  }
  0xe4   : > { %759 = vrot.lane.b32.xlu1 %v2755_v17, %s4571_s26  ;;  %757 = vrot.lane.b32.xlu0 %v2749_v15, %s4571_s26  ;;  %s4577_s26 = smov 114  }
  0xe8   : > { %776 = vrot.lane.b32.xlu1 %v2755_v17, %s4573_s11  ;;  %774 = vrot.lane.b32.xlu0 %v2749_v15, %s4573_s11  ;;  %s4579_s11 = smov 113  }
  0xec   : > { %793 = vrot.lane.b32.xlu1 %v2755_v17, %s4613_s20  ;;  %791 = vrot.lane.b32.xlu0 %v2749_v15, %s4613_s20  ;;  %s3040_s20 = sld [smem:[#allocation2 + $0x3]] }
  0xf0   : > { %810 = vrot.lane.b32.xlu1 %v2755_v17, %s4575_s22  ;;  %808 = vrot.lane.b32.xlu0 %v2749_v15, %s4575_s22  ;;  %s4581_s22 = smov 112  }
  0xf4   : > { %827 = vrot.lane.b32.xlu1 %v2755_v17, %s4577_s26  ;;  %825 = vrot.lane.b32.xlu0 %v2749_v15, %s4577_s26  ;;  %s4583_s26 = smov 111  }
  0xf6   : > { %v2869_v18 = vpop.permute.xlu1 %292  ;;  %v2871_v19 = vpop.permute.xlu0 %264 }
  0xf8   : > { %844 = vrot.lane.b32.xlu1 %v2755_v17, %s4579_s11  ;;  %842 = vrot.lane.b32.xlu0 %v2749_v15, %s4579_s11  ;;  %s4585_s11 = smov 110  }
  0xfa   : > { %v2877_v20 = vpop.permute.xlu0 %320  ;;  %v2879_v21 = vpop.permute.xlu1 %294 }
  0xfb   : > { %v297_v10 = vsel %vm296_vm2, %v2869_v18, %v2879_v21 }
  0xfc   : > { %861 = vrot.lane.b32.xlu1 %v2755_v17, %s4581_s22  ;;  %859 = vrot.lane.b32.xlu0 %v2749_v15, %s4581_s22  ;;  %s4587_s22 = smov 109   ;;  %v314_v48 = vmul.f32 %v3033_v8, %v297_v10  ;;  %v3094_v10 = vrot.slane %v255_v16, %v3009_v62  ;;  %v261_v16 = vld [vmem:[#allocation6 + $0x6] ss:$8 sm:$0x3] }
  0xfe   : > { %v2885_v22 = vpop.permute.xlu0 %348  ;;  %v2887_v23 = vpop.permute.xlu1 %322 }
  0xff   : > { %v325_v54 = vsel %vm324_vm3, %v2877_v20, %v2887_v23  ;;  %v3087_v23 = vmax.f32 %v237_v2, %v238_v13 }
 0x100   : > { %878 = vrot.lane.b32.xlu1 %v2755_v17, %s4583_s26  ;;  %876 = vrot.lane.b32.xlu0 %v2749_v15, %s4583_s26  ;;  %s4589_s26 = smov 99  }
 0x102   : > { %v2893_v24 = vpop.permute.xlu0 %376  ;;  %v2895_v25 = vpop.permute.xlu1 %350 }
 0x103   : > { %v353_v58 = vsel %vm352_vm4, %v2885_v22, %v2895_v25 }
 0x104   : > { %895 = vrot.lane.b32.xlu1 %v2755_v17, %s4585_s11  ;;  %893 = vrot.lane.b32.xlu0 %v2749_v15, %s4585_s11  ;;  %s4591_s11 = smov 98  }
 0x106   : > { %v2901_v26 = vpop.permute.xlu1 %378  ;;  %v2903_v27 = vpop.permute.xlu0 %266 }
 0x107   : > { %v269_v5 = vsel %vm268_vm1, %v2871_v19, %v2903_v27 }
 0x108   : > { %912 = vrot.lane.b32.xlu1 %v2755_v17, %s4587_s22  ;;  %910 = vrot.lane.b32.xlu0 %v2749_v15, %s4587_s22  ;;  %s4593_s22 = smov 97   ;;  %v286_v12 = vmul.f32 %v3016_v1, %v269_v5  ;;  %v259_v5 = vld [vmem:[#allocation6 + $0x5] ss:$8 sm:$0x3] }
 0x10a   : > { %v2909_v28 = vpop.permute.xlu1 %406  ;;  %v2911_v29 = vpop.permute.xlu0 %404 }
 0x10c   : > { %929 = vrot.lane.b32.xlu1 %v2755_v17, %s4589_s26  ;;  %927 = vrot.lane.b32.xlu0 %v2749_v15, %s4589_s26  ;;  %s4595_s26 = smov 96  }
 0x10e   : > { %v2917_v30 = vpop.permute.xlu1 %434  ;;  %v2919_v31 = vpop.permute.xlu0 %432 }
 0x110   : > { %946 = vrot.lane.b32.xlu1 %v2755_v17, %s4591_s11  ;;  %944 = vrot.lane.b32.xlu0 %v2749_v15, %s4591_s11  ;;  %s4597_s11 = smov 95  }
 0x112   : > { %v2925_v32 = vpop.permute.xlu1 %462  ;;  %v2927_v33 = vpop.permute.xlu0 %460 }
 0x114   : > { %963 = vrot.lane.b32.xlu1 %v2755_v17, %s4593_s22  ;;  %961 = vrot.lane.b32.xlu0 %v2749_v15, %s4593_s22  ;;  %s4607_s22 = smov 94  }
 0x116   : > { %v2933_v34 = vpop.permute.xlu1 %479  ;;  %v2935_v35 = vpop.permute.xlu0 %477 }
 0x118   : > { %980 = vrot.lane.b32.xlu1 %v2755_v17, %s4595_s26  ;;  %978 = vrot.lane.b32.xlu0 %v2749_v15, %s4595_s26  ;;  %s4599_s26 = smov 93  }
 0x11a   : > { %v2941_v36 = vpop.permute.xlu1 %496  ;;  %v2943_v37 = vpop.permute.xlu0 %494 }
 0x11c   : > { %997 = vrot.lane.b32.xlu1 %v2755_v17, %s4597_s11  ;;  %995 = vrot.lane.b32.xlu0 %v2749_v15, %s4597_s11  ;;  %s4601_s11 = smov 83  }
 0x11e   : > { %v2949_v38 = vpop.permute.xlu1 %513  ;;  %v2951_v39 = vpop.permute.xlu0 %511 }
 0x120   : > { %1014 = vrot.lane.b32.xlu1 %v2755_v17, %s4607_s22  ;;  %1012 = vrot.lane.b32.xlu0 %v2749_v15, %s4607_s22  ;;  %s4611_s22 = smov 79  }
 0x122   : > { %v2957_v40 = vpop.permute.xlu1 %530  ;;  %v2959_v41 = vpop.permute.xlu0 %528 }
 0x124   : > { %1031 = vrot.lane.b32.xlu1 %v2755_v17, %s4599_s26  ;;  %1029 = vrot.lane.b32.xlu0 %v2749_v15, %s4599_s26  ;;  %s4603_s26 = smov 82  }
 0x126   : > { %v2965_v42 = vpop.permute.xlu1 %547  ;;  %v2967_v43 = vpop.permute.xlu0 %545 }
 0x128   : > { %1048 = vrot.lane.b32.xlu1 %v2755_v17, %s4601_s11  ;;  %1046 = vrot.lane.b32.xlu0 %v2749_v15, %s4601_s11  ;;  %s4605_s11 = smov 81  }
 0x12a   : > { %v2975_v45 = vpop.permute.xlu1 %564  ;;  %v2977_v46 = vpop.permute.xlu0 %562 }
 0x12c   : > { %1065 = vrot.lane.b32.xlu1 %v2755_v17, %s4603_s26  ;;  %1063 = vrot.lane.b32.xlu0 %v2749_v15, %s4603_s26  ;;  %s4609_s26 = smov 80  }
 0x12e   : > { %v2985_v50 = vpop.permute.xlu1 %581  ;;  %v2987_v51 = vpop.permute.xlu0 %579 }
 0x130   : > { %1082 = vrot.lane.b32.xlu1 %v2755_v17, %s4605_s11  ;;  %1080 = vrot.lane.b32.xlu0 %v2749_v15, %s4605_s11  ;;  %s3011_s11 = sld [smem:[#allocation2]] }
 0x132   : > { %v2993_v55 = vpop.permute.xlu1 %598  ;;  %v2995_v56 = vpop.permute.xlu0 %596 }
 0x134   : > { %1099 = vrot.lane.b32.xlu1 %v2755_v17, %s4609_s26  ;;  %1097 = vrot.lane.b32.xlu0 %v2749_v15, %s4609_s26  ;;  %s3023_s26 = sld [smem:[#allocation2 + $0x1]] }
 0x136   : > { %v3004_v60 = vpop.permute.xlu1 %615  ;;  %v3006_v61 = vpop.permute.xlu0 %613  ;;  %v4632_v57 = vstv %s3011_s11 }
 0x137   : > { %v289_v3 = vmul.f32 %v4632_v57, %v286_v12  ;;  %v342_v57 = vmul.f32 %v3066_v49, %v325_v54  ;;  %v272_v54 = vsel %vm268_vm1, 0.0, %v2871_v19 }
 0x138   : > { %1116 = vrot.lane.b32.xlu1 %v2755_v17, %s4611_s22  ;;  %1114 = vrot.lane.b32.xlu0 %v2749_v15, %s4611_s22  ;;  %s3035_s22 = sld [smem:[#allocation2 + $0x2]] }
 0x13a   : > { %v3028_v6 = vpop.permute.xlu1 %632  ;;  %v3030_v7 = vpop.permute.xlu0 %630  ;;  %v315_v9 = vstv %s3023_s26  ;;  %s3109_s26 = sld [smem:[#allocation2 + $0xa]] }
 0x13b   : > { %v317_v2 = vmul.f32 %v315_v9, %v314_v48  ;;  %v300_v48 = vsel %vm296_vm2, 0.0, %v2869_v18  ;;  %v3139_v18 = vrot.slane %v261_v16, %v3009_v62 }
 0x13c   : > { %1133 = vrot.lane.b32.xlu1 %v2755_v17, %s4621_s10  ;;  %1131 = vrot.lane.b32.xlu0 %v2749_v15, %s4621_s10  ;;  %s3068_s10 = sld [smem:[#allocation2 + $0x6]] }
 0x13d   : > { %v319_v13 = vadd.f32 %v317_v2, %v289_v3  ;;  %v328_v2 = vsel %vm324_vm3, 0.0, %v2877_v20  ;;  %v356_v20 = vsel %vm352_vm4, 0.0, %v2885_v22 }
 0x13e   : > { %v3054_v21 = vpop.permute.xlu1 %649  ;;  %v3056_v27 = vpop.permute.xlu0 %647  ;;  %v4705_v25 = vstv %s3035_s22 }
 0x13f   : > { %v345_v52 = vmul.f32 %v4705_v25, %v342_v57 }
 0x140   : > { %1150 = vrot.lane.b32.xlu1 %v2755_v17, %s4636_s6  ;;  %1148 = vrot.lane.b32.xlu0 %v2749_v15, %s4636_s6  ;;  %v3116_v17 = vrot.slane %v259_v5, %v3021_v4  ;;  %v3119_v15 = vrot.slane %v259_v5, %v3009_v62  ;;  %s3128_s6 = sld [smem:[#allocation2 + $0xb]]  ;;  %v3136_v5 = vrot.slane %v261_v16, %v3021_v4 }
 0x141   : > { %v370_v4 = vmul.f32 %v3094_v10, %v353_v58  ;;  %v313_v62 = vmul.f32 %v3050_v14, %v300_v48  ;;  %v285_v16 = vmul.f32 %v3059_v44, %v272_v54  ;;  %v347_v58 = vadd.f32 %v345_v52, %v319_v13 }
 0x142   : > { %v3103_v12 = vpop.permute.xlu1 %666  ;;  %v3105_v53 = vpop.permute.xlu0 %664  ;;  %v384_v13 = vsel %vm380_vm5, 0.0, %v2893_v24  ;;  %v4708_v52 = vstv %s3040_s20  ;;  %v369_v54 = vmul.f32 %v3079_v63, %v356_v20  ;;  %v4709_v48 = vstv %s3011_s11  ;;  %s4714_s11 = smov 48  }
 0x143   : > { %4702 = vst [vmem:[#allocation17_spill] sm:$0xff] %v3103_v12  ;;  %v373_v57 = vmul.f32 %v4708_v52, %v370_v4 }
 0x144   : > { %1169 = vrot.lane.b32.xlu1 %v3076_v59, %s2487_s27  ;;  %1167 = vrot.lane.b32.xlu0 %v3087_v23, %s2487_s27  ;;  %s3155_s27 = sld [smem:[#allocation2 + $0xf]] }
 0x146   : > { %v3145_v19 = vpop.permute.xlu1 %683  ;;  %v3147_v3 = vpop.permute.xlu0 %681 }
 0x147   : > { %4703 = vst [vmem:[#allocation18_spill] sm:$0xff] %v3145_v19  ;;  %4704 = vst [vmem:[#allocation19_spill] sm:$0xff] %v3147_v3  ;;  %v381_v19 = vsel %vm380_vm5, %v2893_v24, %v2901_v26  ;;  %v341_v26 = vmul.f32 %v3062_v47, %v328_v2  ;;  %v316_v2 = vmul.f32 %v315_v9, %v313_v62  ;;  %v4711_v62 = vstv %s3035_s22  ;;  %s3508_s22 = sld [smem:[#allocation2 + $0x1b]] }
 0x148   : > { %1185 = vrot.lane.b32.xlu1 %v3076_v59, %s2486_s18  ;;  %1183 = vrot.lane.b32.xlu0 %v3087_v23, %s2486_s18  ;;  %v398_v12 = vmul.f32 %v3097_v11, %v381_v19  ;;  %s3186_s18 = sld [smem:[#allocation2 + $0x12]]  ;;  %v375_v24 = vadd.f32 %v373_v57, %v347_v58  ;;  %v412_v19 = vsel %vm408_vm6, 0.0, %v2911_v29  ;;  %v4712_v57 = vstv %s3044_s9  ;;  %s3251_s9 = sld [smem:[#allocation2 + $0x15]] }
 0x149   : > { %v440_v9 = vsel %vm436_vm7, 0.0, %v2919_v31  ;;  %v425_v20 = vmul.f32 %v3116_v17, %v412_v19  ;;  %v437_v3 = vsel %vm436_vm7, %v2919_v31, %v2917_v30  ;;  %v465_v31 = vsel %vm464_vm8, %v2927_v33, %v2925_v32 }
 0x14a   : > { %v3176_v25 = vpop.permute.xlu1 %700  ;;  %v3178_v22 = vpop.permute.xlu0 %698  ;;  %v401_v52 = vmul.f32 %v4712_v57, %v398_v12  ;;  %v453_v30 = vmul.f32 %v3136_v5, %v440_v9 }
 0x14b   : > { %4706 = vst [vmem:[#allocation20_spill] sm:$0xff] %v3176_v25  ;;  %4707 = vst [vmem:[#allocation21_spill] sm:$0xff] %v3178_v22  ;;  %v288_v25 = vmul.f32 %v4709_v48, %v285_v16  ;;  %v409_v22 = vsel %vm408_vm6, %v2911_v29, %v2909_v28  ;;  %v344_v28 = vmul.f32 %v4711_v62, %v341_v26  ;;  %v608_v26 = vstv %s3155_s27  ;;  %s3521_s27 = sld [smem:[#allocation2 + $0x1c]] }
 0x14c   : > { %1201 = vrot.lane.b32.xlu1 %v3076_v59, %s4710_s1  ;;  %1199 = vrot.lane.b32.xlu0 %v3087_v23, %s4710_s1  ;;  %v397_v16 = vmul.f32 %v3091_v0, %v384_v13  ;;  %v426_v4 = vmul.f32 %v3119_v15, %v409_v22  ;;  %s3219_s1 = sld [smem:[#allocation2 + $0x14]]  ;;  %v4713_v13 = vstv %s3040_s20  ;;  %v403_v12 = vadd.f32 %v401_v52, %v375_v24  ;;  %s4718_s20 = smov 47  }
 0x14d   : > { %v372_v62 = vmul.f32 %v4713_v13, %v369_v54  ;;  %v318_v48 = vadd.f32 %v316_v2, %v288_v25  ;;  %v468_v22 = vsel %vm464_vm8, 0.0, %v2927_v33  ;;  %v4715_v25 = vmov %v4712_v57 }
 0x14e   : > { %v3209_v58 = vpop.permute.xlu1 %717  ;;  %v3211_v29 = vpop.permute.xlu0 %715  ;;  %v400_v2 = vmul.f32 %v4715_v25, %v397_v16  ;;  %v4716_v13 = vstv %s3052_s23  ;;  %v454_v57 = vmul.f32 %v3139_v18, %v437_v3  ;;  %v470_v33 = vmul.f32 %v468_v22, %v3059_v44  ;;  %s4722_s23 = smov 46  }
 0x14f   : > { %v346_v19 = vadd.f32 %v344_v28, %v318_v48  ;;  %v429_v54 = vmul.f32 %v4716_v13, %v426_v4  ;;  %v485_v28 = vsel %vm481_vm9, 0.0, %v2935_v35  ;;  %v4717_v48 = vmov %v4716_v13 }
 0x150   : > { %1217 = vrot.lane.b32.xlu1 %v3076_v59, %s4714_s11  ;;  %1215 = vrot.lane.b32.xlu0 %v3087_v23, %s4714_s11  ;;  %v428_v32 = vmul.f32 %v4717_v48, %v425_v20  ;;  %v482_v25 = vsel %vm481_vm9, %v2935_v35, %v2933_v34  ;;  %v471_v4 = vmul.f32 %v465_v31, %v3016_v1  ;;  %s4760_s11 = smov 29  }
 0x151   : > { %v374_v9 = vadd.f32 %v372_v62, %v346_v19  ;;  %v431_v3 = vadd.f32 %v429_v54, %v403_v12  ;;  %v502_v62 = vsel %vm4648_vm10, 0.0, %v2943_v37  ;;  %v4719_v19 = vstv %s3068_s10  ;;  %s3501_s10 = sld [smem:[#allocation2 + $0x1a]] }
 0x152   : > { %v3241_v24 = vpop.permute.xlu1 %734  ;;  %v3243_v52 = vpop.permute.xlu0 %732  ;;  %v456_v13 = vmul.f32 %v4719_v19, %v453_v30  ;;  %v487_v34 = vmul.f32 %v485_v28, %v3050_v14  ;;  %v499_v35 = vsel %vm4648_vm10, %v2943_v37, %v2941_v36  ;;  %v4720_v31 = vmov %v4719_v19 }
 0x153   : > { %v402_v22 = vadd.f32 %v400_v2, %v374_v9  ;;  %v457_v48 = vmul.f32 %v4720_v31, %v454_v57  ;;  %v488_v20 = vmul.f32 %v482_v25, %v3033_v8  ;;  %v519_v2 = vsel %vm4649_vm11, 0.0, %v2951_v39 }
 0x154   : > { %1233 = vrot.lane.b32.xlu1 %v3076_v59, %s4718_s20  ;;  %1231 = vrot.lane.b32.xlu0 %v3087_v23, %s4718_s20  ;;  %v693_v30 = vstv %s3219_s1  ;;  %v4721_v9 = vstv %s3083_s5  ;;  %v504_v16 = vmul.f32 %v502_v62, %v3062_v47  ;;  %v516_v36 = vsel %vm4649_vm11, %v2951_v39, %v2949_v38  ;;  %s4737_s5 = smov 34   ;;  %s3529_s1 = sld [smem:[#allocation2 + $0x1e]] }
 0x155   : > { %v430_v28 = vadd.f32 %v428_v32, %v402_v22  ;;  %v473_v19 = vmul.f32 %v4721_v9, %v470_v33  ;;  %vm4655_vm10 = vcmask 138240   ;;  %v459_v37 = vadd.f32 %v457_v48, %v431_v3  ;;  %s3554_s20 = sld [smem:[#allocation2 + $0x20]] }
 0x156   : > { %v3273_v12 = vpop.permute.xlu1 %759  ;;  %v3275_v54 = vpop.permute.xlu0 %757  ;;  %v4723_v57 = vmov %v4721_v9  ;;  %v505_v32 = vmul.f32 %v499_v35, %v3066_v49  ;;  %v536_v33 = vsel %vm4650_vm12, 0.0, %v2959_v41  ;;  %v4724_v22 = vstv %s3099_s4  ;;  %s4727_s4 = smov 45  }
 0x157   : > { %v474_v25 = vmul.f32 %v4723_v57, %v471_v4  ;;  %v458_v62 = vadd.f32 %v456_v13, %v430_v28  ;;  %v490_v38 = vmul.f32 %v4724_v22, %v487_v34  ;;  %v521_v39 = vmul.f32 %v519_v2, %v3079_v63 }
 0x158   : > { %1249 = vrot.lane.b32.xlu1 %v3076_v59, %s4722_s23  ;;  %1247 = vrot.lane.b32.xlu0 %v3087_v23, %s4722_s23  ;;  %v533_v3 = vsel %vm4650_vm12, %v2959_v41, %v2957_v40  ;;  %vm634_vm11 = vcmask 130048   ;;  %v4725_v31 = vmov %v4724_v22  ;;  %v522_v9 = vmul.f32 %v516_v36, %v3094_v10  ;;  %s4761_s23 = smov 19  }
 0x159   : > { %v491_v48 = vmul.f32 %v4725_v31, %v488_v20  ;;  %v553_v13 = vsel %vm4651_vm13, 0.0, %v2967_v43  ;;  %v710_v34 = vstv %s3251_s9  ;;  %v475_v2 = vadd.f32 %v473_v19, %v458_v62  ;;  %s3540_s9 = sld [smem:[#allocation2 + $0x1f]] }
 0x15a   : > { %v3304_v4 = vpop.permute.xlu1 %776  ;;  %v3306_v35 = vpop.permute.xlu0 %774  ;;  %v4726_v28 = vstv %s3101_s30  ;;  %v538_v22 = vmul.f32 %v536_v33, %v3091_v0  ;;  %v550_v40 = vsel %vm4651_vm13, %v2967_v43, %v2965_v42  ;;  %vm651_vm12 = vcmask 121856   ;;  %s4732_s30 = smov 35  }
 0x15b   : > { %v507_v57 = vmul.f32 %v4726_v28, %v504_v16  ;;  %v476_v41 = vadd.f32 %v474_v25, %v459_v37  ;;  %v4728_v20 = vmov %v4726_v28  ;;  %v539_v31 = vmul.f32 %v533_v3, %v3097_v11 }
 0x15c   : > { %1265 = vrot.lane.b32.xlu1 %v3076_v59, %s4727_s4  ;;  %v508_v36 = vmul.f32 %v4728_v20, %v505_v32  ;;  %v570_v16 = vsel %vm4652_vm14, 0.0, %v2977_v46  ;;  %1263 = vrot.lane.b32.xlu0 %v3087_v23, %s4727_s4  ;;  %v492_v19 = vadd.f32 %v490_v38, %v475_v2  ;;  %v4729_v33 = vstv %s3109_s26  ;;  %s4758_s26 = smov 30   ;;  %s3560_s4 = sld [smem:[#allocation2 + $0x21]] }
 0x15d   : > { %v524_v42 = vmul.f32 %v4729_v33, %v521_v39  ;;  %v555_v43 = vmul.f32 %v553_v13, %v3116_v17  ;;  %v567_v37 = vsel %vm4652_vm14, %v2977_v46, %v2975_v45  ;;  %vm4662_vm13 = vcmask 113664  }
 0x15e   : > { %v3335_v25 = vpop.permute.xlu1 %793  ;;  %v3337_v32 = vpop.permute.xlu0 %791  ;;  %v493_v62 = vadd.f32 %v491_v48, %v476_v41  ;;  %v4730_v3 = vmov %v4729_v33  ;;  %v556_v38 = vmul.f32 %v550_v40, %v3119_v15  ;;  %v587_v39 = vsel %vm4653_vm15, 0.0, %v2987_v51 }
 0x15f   : > { %v525_v28 = vmul.f32 %v4730_v3, %v522_v9  ;;  %v509_v13 = vadd.f32 %v507_v57, %v492_v19  ;;  %v4731_v2 = vstv %s3128_s6  ;;  %v572_v33 = vmul.f32 %v570_v16, %v3136_v5  ;;  %s4755_s6 = smov 31  }
 0x160   : > { %v541_v20 = vmul.f32 %v4731_v2, %v538_v22  ;;  %v584_v45 = vsel %vm4653_vm15, %v2987_v51, %v2985_v50  ;;  %vm4661_vm14 = vcmask 105472   ;;  %1281 = vrot.lane.b32.xlu1 %v3076_v59, %s4732_s30  ;;  %v510_v46 = vadd.f32 %v508_v36, %v493_v62  ;;  %1279 = vrot.lane.b32.xlu0 %v3087_v23, %s4732_s30  ;;  %s4762_s30 = smov 18  }
 0x161   : > { %v4733_v48 = vmov %v4731_v2  ;;  %v573_v40 = vmul.f32 %v567_v37, %v3139_v18  ;;  %v604_v57 = vsel %vm4654_vm0, 0.0, %v2995_v56  ;;  %v526_v22 = vadd.f32 %v524_v42, %v509_v13 }
 0x162   : > { %v542_v9 = vmul.f32 %v4733_v48, %v539_v31  ;;  %v4734_v41 = vstv %s3130_s29  ;;  %v589_v51 = vmul.f32 %v587_v39, %v3059_v44  ;;  %v601_v36 = vsel %vm4654_vm0, %v2995_v56, %v2993_v55  ;;  %v3365_v31 = vpop.permute.xlu1 %810  ;;  %v3367_v16 = vpop.permute.xlu0 %808  ;;  %s4748_s29 = smov 32  }
 0x163   : > { %v558_v50 = vmul.f32 %v4734_v41, %v555_v43  ;;  %vm4658_vm15 = vcmask 23552   ;;  %v527_v19 = vadd.f32 %v525_v28, %v510_v46  ;;  %v4735_v37 = vmov %v4734_v41 }
 0x164   : > { %v559_v62 = vmul.f32 %v4735_v37, %v556_v38  ;;  %v590_v42 = vmul.f32 %v584_v45, %v3016_v1  ;;  %v621_v43 = vsel %vm4655_vm10, 0.0, %v3006_v61  ;;  %v543_v3 = vadd.f32 %v541_v20, %v526_v22  ;;  %1297 = vrot.lane.b32.xlu1 %v3076_v59, %s4737_s5  ;;  %1295 = vrot.lane.b32.xlu0 %v3087_v23, %s4737_s5  ;;  %s3585_s5 = sld [smem:[#allocation2 + $0x22]] }
 0x165   : > { %v4736_v39 = vstv %s3141_s28  ;;  %v606_v2 = vmul.f32 %v604_v57, %v3050_v14  ;;  %v618_v55 = vsel %vm4655_vm10, %v3006_v61, %v3004_v60  ;;  %vm4657_vm0 = vcmask 15360   ;;  %s4741_s28 = smov 33  }
 0x166   : > { %v575_v13 = vmul.f32 %v4736_v39, %v572_v33  ;;  %v544_v56 = vadd.f32 %v542_v9, %v527_v19  ;;  %v4738_v28 = vmov %v4736_v39  ;;  %v607_v45 = vmul.f32 %v601_v36, %v3033_v8  ;;  %v3395_v9 = vpop.permute.xlu1 %827 }
 0x167   : > { %v576_v38 = vmul.f32 %v4738_v28, %v573_v40  ;;  %v638_v20 = vsel %vm634_vm11, 0.0, %v3030_v7  ;;  %v560_v33 = vadd.f32 %v558_v50, %v543_v3  ;;  %v4739_v46 = vstv %s3143_s25  ;;  %v3397_v40 = vpop.permute.xlu0 %825  ;;  %s3434_s25 = sld [smem:[#allocation2 + $0x16]] }
 0x168   : > { %v592_v60 = vmul.f32 %v4739_v46, %v589_v51  ;;  %v623_v61 = vmul.f32 %v621_v43, %v3062_v47  ;;  %v635_v48 = vsel %vm634_vm11, %v3030_v7, %v3028_v6  ;;  %vm4656_vm10 = vcmask 7168   ;;  %1313 = vrot.lane.b32.xlu1 %v3076_v59, %s4741_s28  ;;  %1311 = vrot.lane.b32.xlu0 %v3087_v23, %s4741_s28  ;;  %s3604_s28 = sld [smem:[#allocation2 + $0x23]] }
 0x169   : > { %v561_v57 = vadd.f32 %v559_v62, %v544_v56  ;;  %v4740_v22 = vmov %v4739_v46  ;;  %v624_v50 = vmul.f32 %v618_v55, %v3066_v49  ;;  %v655_v51 = vsel %vm651_vm12, 0.0, %v3056_v27 }
 0x16a   : > { %v593_v41 = vmul.f32 %v4740_v22, %v590_v42  ;;  %v577_v36 = vadd.f32 %v575_v13, %v560_v33  ;;  %v609_v19 = vmul.f32 %v608_v26, %v606_v2  ;;  %v640_v6 = vmul.f32 %v638_v20, %v3079_v63  ;;  %v4745_v20 = vld [vmem:[#allocation19_spill] sm:$0xff] }
 0x16b   : > { %v652_v7 = vsel %vm651_vm12, %v3056_v27, %v3054_v21  ;;  %v578_v37 = vadd.f32 %v576_v38, %v561_v57  ;;  %v610_v62 = vmul.f32 %v608_v26, %v607_v45  ;;  %v641_v42 = vmul.f32 %v635_v48, %v3094_v10  ;;  %v4743_v27 = vld [vmem:[#allocation17_spill] sm:$0xff]  ;;  %v3425_v26 = vpop.permute.xlu1 %844  ;;  %v3427_v55 = vpop.permute.xlu0 %842  ;;  %v4747_v48 = vld [vmem:[#allocation18_spill] sm:$0xff] }
 0x16c   : > { %v672_v43 = vsel %vm4662_vm13, 0.0, %v3105_v53  ;;  %v594_v3 = vadd.f32 %v592_v60, %v577_v36  ;;  %v4742_v39 = vstv %s3167_s21  ;;  %v657_v21 = vmul.f32 %v655_v51, %v3091_v0  ;;  %1329 = vrot.lane.b32.xlu1 %v3076_v59, %s4748_s29  ;;  %v4750_v36 = vld [vmem:[#allocation21_spill] sm:$0xff]  ;;  %s3449_s21 = sld [smem:[#allocation2 + $0x17]]  ;;  %1327 = vrot.lane.b32.xlu0 %v3087_v23, %s4748_s29  ;;  %s3617_s29 = sld [smem:[#allocation2 + $0x24]] }
 0x16d   : > { %v626_v13 = vmul.f32 %v4742_v39, %v623_v61  ;;  %v669_v2 = vsel %vm4662_vm13, %v3105_v53, %v4743_v27  ;;  %v595_v56 = vadd.f32 %v593_v41, %v578_v37  ;;  %v4744_v28 = vmov %v4742_v39 }
 0x16e   : > { %v627_v38 = vmul.f32 %v4744_v28, %v624_v50  ;;  %v658_v45 = vmul.f32 %v652_v7, %v3097_v11  ;;  %v689_v33 = vsel %vm4661_vm14, 0.0, %v4745_v20  ;;  %v611_v46 = vadd.f32 %v609_v19, %v594_v3 }
 0x16f   : > { %v4746_v60 = vstv %s3169_s0  ;;  %v674_v53 = vmul.f32 %v672_v43, %v3116_v17  ;;  %v686_v57 = vsel %vm4661_vm14, %v4745_v20, %v4747_v48  ;;  %v612_v22 = vadd.f32 %v610_v62, %v595_v56  ;;  %v4752_v62 = vld [vmem:[#allocation20_spill] sm:$0xff]  ;;  %s3459_s0 = sld [smem:[#allocation2 + $0x18]]  ;;  %v3461_v3 = vpop.permute.xlu1 %861  ;;  %v3463_v39 = vpop.permute.xlu0 %859 }
 0x170   : > { %v643_v61 = vmul.f32 %v4746_v60, %v640_v6  ;;  %v4749_v41 = vmov %v4746_v60  ;;  %v675_v51 = vmul.f32 %v669_v2, %v3119_v15  ;;  %v706_v19 = vsel %vm4658_vm15, 0.0, %v4750_v36  ;;  %1345 = vrot.lane.b32.xlu1 %v3076_v59, %s4755_s6  ;;  %1343 = vrot.lane.b32.xlu0 %v3087_v23, %s4755_s6  ;;  %s4765_s6 = smov 15  }
 0x171   : > { %v644_v50 = vmul.f32 %v4749_v41, %v641_v42  ;;  %v628_v6 = vadd.f32 %v626_v13, %v611_v46  ;;  %v4751_v7 = vstv %s3186_s18  ;;  %v691_v43 = vmul.f32 %v689_v33, %v3136_v5  ;;  %s3523_s18 = sld [smem:[#allocation2 + $0x1d]] }
 0x172   : > { %v660_v37 = vmul.f32 %v4751_v7, %v657_v21  ;;  %v703_v42 = vsel %vm4658_vm15, %v4750_v36, %v4752_v62  ;;  %v629_v27 = vadd.f32 %v627_v38, %v612_v22  ;;  %v4753_v2 = vmov %v4751_v7 }
 0x173   : > { %v661_v56 = vmul.f32 %v4753_v2, %v658_v45  ;;  %v692_v13 = vmul.f32 %v686_v57, %v3139_v18  ;;  %v723_v21 = vsel %vm4657_vm0, 0.0, %v3211_v29  ;;  %v645_v28 = vadd.f32 %v643_v61, %v628_v6  ;;  %v3491_v41 = vpop.permute.xlu1 %878 }
 0x174   : > { %v4754_v20 = vstv %s3200_s2  ;;  %v708_v46 = vmul.f32 %v706_v19, %v3059_v44  ;;  %v720_v60 = vsel %vm4657_vm0, %v3211_v29, %v3209_v58  ;;  %v646_v38 = vadd.f32 %v644_v50, %v629_v27  ;;  %v3493_v50 = vpop.permute.xlu0 %876  ;;  %s3499_s2 = sld [smem:[#allocation2 + $0x19]]  ;;  %1361 = vrot.lane.b32.xlu1 %v3076_v59, %s4758_s26  ;;  %1359 = vrot.lane.b32.xlu0 %v3087_v23, %s4758_s26  ;;  %s3706_s26 = sld [smem:[#allocation2 + $0x28]] }
 0x175   : > { %v677_v33 = vmul.f32 %v4754_v20, %v674_v53  ;;  %v4756_v45 = vmov %v4754_v20  ;;  %v709_v57 = vmul.f32 %v703_v42, %v3016_v1  ;;  %v740_v61 = vsel %vm4656_vm10, 0.0, %v3243_v52 }
 0x176   : > { %v678_v48 = vmul.f32 %v4756_v45, %v675_v51  ;;  %v662_v53 = vadd.f32 %v660_v37, %v645_v28  ;;  %v694_v22 = vmul.f32 %v693_v30, %v691_v43  ;;  %v725_v58 = vmul.f32 %v723_v21, %v3050_v14  ;;  %v4759_v21 = vld [vmem:[#allocation15_spill] sm:$0xff] }
 0x177   : > { %v737_v29 = vsel %vm4656_vm10, %v3243_v52, %v3241_v24  ;;  %v663_v51 = vadd.f32 %v661_v56, %v646_v38  ;;  %v695_v36 = vmul.f32 %v693_v30, %v692_v13  ;;  %v727_v19 = vstv %s3434_s25  ;;  %v4757_v52 = vld [vmem:[#allocation14_spill] sm:$0xff]  ;;  %v3525_v20 = vpop.permute.xlu1 %895  ;;  %s4763_s25 = smov 17  }
 0x178   : > { %v726_v6 = vmul.f32 %v720_v60, %v3033_v8  ;;  %v679_v7 = vadd.f32 %v677_v33, %v662_v53  ;;  %v711_v24 = vmul.f32 %v710_v34, %v708_v46  ;;  %v750_v37 = vmul.f32 %v3079_v63, %v4757_v52  ;;  %v3527_v33 = vpop.permute.xlu0 %893  ;;  %1377 = vrot.lane.b32.xlu1 %v3076_v59, %s4760_s11 }
 0x179   : > { %v742_v43 = vmul.f32 %v740_v61, %v3062_v47  ;;  %v680_v30 = vadd.f32 %v678_v48, %v663_v51  ;;  %v712_v62 = vmul.f32 %v710_v34, %v709_v57  ;;  %v744_v42 = vstv %s3449_s21  ;;  %1375 = vrot.lane.b32.xlu0 %v3087_v23, %s4760_s11  ;;  %s4764_s21 = smov 16   ;;  %s4768_s11 = smov 3  }
 0x17a   : > { %v743_v27 = vmul.f32 %v737_v29, %v3066_v49  ;;  %v696_v2 = vadd.f32 %v694_v22, %v679_v7  ;;  %v728_v56 = vmul.f32 %v727_v19, %v725_v58  ;;  %v752_v13 = vstv %s3459_s0  ;;  %s3641_s0 = sld [smem:[#allocation2 + $0x25]] }
 0x17b   : > { %v751_v28 = vmul.f32 %v3094_v10, %v4759_v21  ;;  %v697_v34 = vadd.f32 %v695_v36, %v680_v30  ;;  %v729_v46 = vmul.f32 %v727_v19, %v726_v6  ;;  %vm4659_vm10 = vcmask 1039360   ;;  %v3542_v29 = vpop.permute.xlu1 %912 }
 0x17c   : > { %v713_v60 = vadd.f32 %v711_v24, %v696_v2  ;;  %v745_v38 = vmul.f32 %v744_v42, %v742_v43  ;;  %v753_v48 = vmul.f32 %v752_v13, %v750_v37  ;;  %v746_v57 = vmul.f32 %v744_v42, %v743_v27  ;;  %v3544_v51 = vpop.permute.xlu0 %910  ;;  %1393 = vrot.lane.b32.xlu1 %v3076_v59, %s4761_s23 }
 0x17d   : > { %v714_v45 = vadd.f32 %v712_v62, %v697_v34  ;;  %vm4660_vm0 = vcmask 1031168   ;;  %v754_v53 = vmul.f32 %v752_v13, %v751_v28  ;;  %v765_v22 = vsel %vm4659_vm10, %v3273_v12, 0.0  ;;  %1391 = vrot.lane.b32.xlu0 %v3087_v23, %s4761_s23  ;;  %s4770_s23 = smov 1  }
 0x17e   : > { %v730_v61 = vadd.f32 %v728_v56, %v713_v60  ;;  %v762_v58 = vsel %vm4659_vm10, %v3275_v54, %v3273_v12  ;;  %v769_v19 = vstv %s3499_s2  ;;  %v786_v6 = vstv %s3501_s10  ;;  %s3666_s2 = sld [smem:[#allocation2 + $0x26]]  ;;  %s3681_s10 = sld [smem:[#allocation2 + $0x27]] }
 0x17f   : > { %v731_v36 = vadd.f32 %v729_v46, %v714_v45  ;;  %vm4663_vm15 = vcmask 1022976   ;;  %v782_v24 = vsel %vm4660_vm0, %v3304_v4, 0.0  ;;  %v779_v12 = vsel %vm4660_vm0, %v3306_v35, %v3304_v4  ;;  %v3566_v35 = vpop.permute.xlu1 %929 }
 0x180   : > { %v747_v7 = vadd.f32 %v745_v38, %v730_v61  ;;  %v803_v54 = vstv %s3508_s22  ;;  %v768_v37 = vmul.f32 %v765_v22, %v3097_v11  ;;  %v767_v43 = vmul.f32 %v762_v58, %v3091_v0  ;;  %v3568_v62 = vpop.permute.xlu0 %927  ;;  %1409 = vrot.lane.b32.xlu1 %v3076_v59, %s4762_s30  ;;  %s4766_s22 = smov 14  }
 0x181   : > { %v748_v52 = vadd.f32 %v746_v57, %v731_v36  ;;  %vm4664_vm10 = vcmask 941056   ;;  %v820_v30 = vstv %s3521_s27  ;;  %vm4666_vm0 = vcmask 932864   ;;  %1407 = vrot.lane.b32.xlu0 %v3087_v23, %s4762_s30  ;;  %s4767_s27 = smov 13   ;;  %s4771_s30 = smov 127  }
 0x182   : > { %v837_v4 = vstv %s3523_s18  ;;  %vm4665_vm14 = vcmask 924672   ;;  %v785_v42 = vmul.f32 %v782_v24, %v3119_v15  ;;  %v784_v27 = vmul.f32 %v779_v12, %v3116_v17  ;;  %s3736_s18 = sld [smem:[#allocation2 + $0x29]] }
 0x183   : > { %v799_v2 = vsel %vm4663_vm15, %v3335_v25, 0.0  ;;  %v796_v56 = vsel %vm4663_vm15, %v3337_v32, %v3335_v25  ;;  %v755_v13 = vadd.f32 %v753_v48, %v747_v7  ;;  %v816_v21 = vsel %vm4664_vm10, %v3365_v31, 0.0  ;;  %v3592_v48 = vpop.permute.xlu1 %946 }
 0x184   : > { %v854_v28 = vstv %s3529_s1  ;;  %vm863_vm13 = vcmask 916480   ;;  %v756_v34 = vadd.f32 %v754_v53, %v748_v52  ;;  %v771_v46 = vmul.f32 %v769_v19, %v768_v37  ;;  %1425 = vrot.lane.b32.xlu1 %v3076_v59, %s4763_s25  ;;  %s3738_s1 = sld [smem:[#allocation2 + $0x2a]] }
 0x185   : > { %v770_v60 = vmul.f32 %v769_v19, %v767_v43  ;;  %v813_v38 = vsel %vm4664_vm10, %v3367_v16, %v3365_v31  ;;  %v802_v25 = vmul.f32 %v799_v2, %v3139_v18  ;;  %v801_v32 = vmul.f32 %v796_v56, %v3136_v5  ;;  %v3598_v16 = vpop.permute.xlu0 %944  ;;  %1423 = vrot.lane.b32.xlu0 %v3087_v23, %s4763_s25  ;;  %s4772_s25 = smov 126  }
 0x186   : > { %v871_v45 = vstv %s3540_s9  ;;  %vm4667_vm15 = vcmask 908288   ;;  %v788_v57 = vmul.f32 %v786_v6, %v785_v42  ;;  %v787_v61 = vmul.f32 %v786_v6, %v784_v27  ;;  %s4769_s9 = smov 2  }
 0x187   : > { %v819_v53 = vmul.f32 %v816_v21, %v3016_v1  ;;  %v830_v31 = vsel %vm4666_vm0, %v3397_v40, %v3395_v9  ;;  %v818_v22 = vmul.f32 %v813_v38, %v3059_v44  ;;  %v833_v58 = vsel %vm4666_vm0, %v3395_v9, 0.0  ;;  %v3619_v37 = vpop.permute.xlu1 %963 }
 0x188   : > { %v888_v36 = vstv %s3554_s20  ;;  %vm4668_vm10 = vcmask 900096   ;;  %v772_v19 = vadd.f32 %v770_v60, %v755_v13  ;;  %v773_v6 = vadd.f32 %v771_v46, %v756_v34  ;;  %1441 = vrot.lane.b32.xlu1 %v3076_v59, %s4764_s21  ;;  %s3769_s20 = sld [smem:[#allocation2 + $0x2b]] }
 0x189   : > { %v850_v7 = vsel %vm4665_vm14, %v3425_v26, 0.0  ;;  %v905_v40 = vstv %s3560_s4  ;;  %v805_v24 = vmul.f32 %v803_v54, %v802_v25  ;;  %v804_v12 = vmul.f32 %v803_v54, %v801_v32  ;;  %v3622_v56 = vpop.permute.xlu0 %961  ;;  %1439 = vrot.lane.b32.xlu0 %v3087_v23, %s4764_s21  ;;  %s3786_s4 = sld [smem:[#allocation2 + $0x2c]]  ;;  %s4773_s21 = smov 125  }
 0x18a   : > { %v835_v9 = vmul.f32 %v830_v31, %v3050_v14  ;;  %v847_v52 = vsel %vm4665_vm14, %v3427_v55, %v3425_v26  ;;  %v789_v43 = vadd.f32 %v787_v61, %v772_v19  ;;  %v790_v42 = vadd.f32 %v788_v57, %v773_v6 }
 0x18b   : > { %v822_v27 = vmul.f32 %v820_v30, %v819_v53  ;;  %v836_v2 = vmul.f32 %v833_v58, %v3033_v8  ;;  %v821_v54 = vmul.f32 %v820_v30, %v818_v22  ;;  %v853_v13 = vmul.f32 %v850_v7, %v3066_v49 }
 0x18c   : > { %v867_v21 = vsel %vm863_vm13, %v3461_v3, 0.0  ;;  %v864_v26 = vsel %vm863_vm13, %v3463_v39, %v3461_v3  ;;  %v852_v55 = vmul.f32 %v847_v52, %v3062_v47  ;;  %vm4669_vm14 = vcmask 891904   ;;  %v3643_v39 = vpop.permute.xlu1 %980  ;;  %1457 = vrot.lane.b32.xlu1 %v3076_v59, %s4765_s6 }
 0x18d   : > { %v922_v34 = vstv %s3585_s5  ;;  %vm4676_vm0 = vcmask 809984   ;;  %v806_v30 = vadd.f32 %v804_v12, %v789_v43  ;;  %v807_v46 = vadd.f32 %v805_v24, %v790_v42  ;;  %v3651_v61 = vpop.permute.xlu0 %978  ;;  %1455 = vrot.lane.b32.xlu0 %v3087_v23, %s4765_s6  ;;  %s3802_s5 = sld [smem:[#allocation2 + $0x2d]]  ;;  %s4774_s6 = smov 115  }
 0x18e   : > { %v838_v60 = vmul.f32 %v837_v4, %v835_v9  ;;  %v881_v3 = vsel %vm4667_vm15, %v3493_v50, %v3491_v41  ;;  %v839_v38 = vmul.f32 %v837_v4, %v836_v2  ;;  %v870_v25 = vmul.f32 %v867_v21, %v3094_v10 }
 0x18f   : > { %v869_v32 = vmul.f32 %v864_v26, %v3079_v63  ;;  %v884_v57 = vsel %vm4667_vm15, %v3491_v41, 0.0  ;;  %v823_v53 = vadd.f32 %v821_v54, %v806_v30  ;;  %v824_v31 = vadd.f32 %v822_v27, %v807_v46 }
 0x190   : > { %v856_v50 = vmul.f32 %v854_v28, %v853_v13  ;;  %v939_v22 = vstv %s3604_s28  ;;  %v855_v4 = vmul.f32 %v854_v28, %v852_v55  ;;  %v886_v58 = vmul.f32 %v881_v3, %v3091_v0  ;;  %v3672_v24 = vpop.permute.xlu1 %997  ;;  %1473 = vrot.lane.b32.xlu1 %v3076_v59, %s4766_s22  ;;  %s3807_s28 = sld [smem:[#allocation2 + $0x2e]] }
 0x191   : > { %v901_v41 = vsel %vm4668_vm10, %v3525_v20, 0.0  ;;  %v898_v19 = vsel %vm4668_vm10, %v3527_v33, %v3525_v20  ;;  %v840_v6 = vadd.f32 %v838_v60, %v823_v53  ;;  %v887_v7 = vmul.f32 %v884_v57, %v3097_v11  ;;  %v3683_v33 = vpop.permute.xlu0 %995  ;;  %1471 = vrot.lane.b32.xlu0 %v3087_v23, %s4766_s22  ;;  %s3855_s22 = sld [smem:[#allocation2 + $0x32]] }
 0x192   : > { %vm4670_vm15 = vcmask 801792   ;;  %v956_v28 = vstv %s3617_s29  ;;  %v841_v12 = vadd.f32 %v839_v38, %v824_v31  ;;  %v873_v9 = vmul.f32 %v871_v45, %v870_v25  ;;  %s3821_s29 = sld [smem:[#allocation2 + $0x2f]] }
 0x193   : > { %v872_v52 = vmul.f32 %v871_v45, %v869_v32  ;;  %v915_v20 = vsel %vm4669_vm14, %v3544_v51, %v3542_v29  ;;  %v904_v43 = vmul.f32 %v901_v41, %v3119_v15  ;;  %v903_v42 = vmul.f32 %v898_v19, %v3116_v17 }
 0x194   : > { %v918_v27 = vsel %vm4669_vm14, %v3542_v29, 0.0  ;;  %vm4671_vm10 = vcmask 793600   ;;  %v857_v45 = vadd.f32 %v855_v4, %v840_v6  ;;  %v858_v2 = vadd.f32 %v856_v50, %v841_v12  ;;  %v3704_v55 = vpop.permute.xlu1 %1014  ;;  %1489 = vrot.lane.b32.xlu1 %v3076_v59, %s4767_s27 }
 0x195   : > { %v889_v51 = vmul.f32 %v888_v36, %v886_v58  ;;  %v932_v54 = vsel %vm4676_vm0, %v3568_v62, %v3566_v35  ;;  %v890_v13 = vmul.f32 %v888_v36, %v887_v7  ;;  %v920_v29 = vmul.f32 %v915_v20, %v3136_v5  ;;  %v1013_v60 = vpop.permute.xlu0 %1012  ;;  %1487 = vrot.lane.b32.xlu0 %v3087_v23, %s4767_s27  ;;  %s3865_s27 = sld [smem:[#allocation2 + $0x33]] }
 0x196   : > { %v935_v21 = vsel %vm4676_vm0, %v3566_v35, 0.0  ;;  %v973_v26 = vstv %s3641_s0  ;;  %v874_v30 = vadd.f32 %v872_v52, %v857_v45  ;;  %v875_v46 = vadd.f32 %v873_v9, %v858_v2  ;;  %s3829_s0 = sld [smem:[#allocation2 + $0x30]] }
 0x197   : > { %v921_v62 = vmul.f32 %v918_v27, %v3139_v18  ;;  %vm4672_vm14 = vcmask 785408   ;;  %v907_v36 = vmul.f32 %v905_v40, %v904_v43  ;;  %v906_v3 = vmul.f32 %v905_v40, %v903_v42 }
 0x198   : > { %v937_v35 = vmul.f32 %v932_v54, %v3059_v44  ;;  %v952_v38 = vsel %vm4670_vm15, %v3592_v48, 0.0  ;;  %v891_v25 = vadd.f32 %v889_v51, %v874_v30  ;;  %v938_v32 = vmul.f32 %v935_v21, %v3016_v1  ;;  %v1032_v58 = vpop.permute.xlu1 %1031  ;;  %1505 = vrot.lane.b32.xlu1 %v3076_v59, %s4768_s11 }
 0x199   : > { %v949_v57 = vsel %vm4670_vm15, %v3598_v16, %v3592_v48  ;;  %v990_v53 = vstv %s3666_s2  ;;  %v892_v40 = vadd.f32 %v890_v13, %v875_v46  ;;  %v923_v31 = vmul.f32 %v922_v34, %v920_v29  ;;  %v1030_v19 = vpop.permute.xlu0 %1029  ;;  %1503 = vrot.lane.b32.xlu0 %v3087_v23, %s4768_s11  ;;  %s3842_s2 = sld [smem:[#allocation2 + $0x31]]  ;;  %s4778_s11 = smov 111  }
 0x19a   : > { %v969_v50 = vsel %vm4671_vm10, %v3619_v37, 0.0  ;;  %v966_v4 = vsel %vm4671_vm10, %v3622_v56, %v3619_v37  ;;  %v924_v41 = vmul.f32 %v922_v34, %v921_v62  ;;  %v955_v48 = vmul.f32 %v952_v38, %v3033_v8 }
 0x19b   : > { %vm4673_vm15 = vcmask 777216   ;;  %v1007_v16 = vstv %s3681_s10  ;;  %v908_v6 = vadd.f32 %v906_v3, %v891_v25  ;;  %v909_v7 = vadd.f32 %v907_v36, %v892_v40  ;;  %s4775_s10 = smov 114  }
 0x19c   : > { %v940_v12 = vmul.f32 %v939_v22, %v937_v35  ;;  %v954_v37 = vmul.f32 %v949_v57, %v3050_v14  ;;  %v941_v56 = vmul.f32 %v939_v22, %v938_v32  ;;  %v972_v34 = vmul.f32 %v969_v50, %v3066_v49  ;;  %v1049_v27 = vpop.permute.xlu1 %1048  ;;  %1521 = vrot.lane.b32.xlu1 %v3076_v59, %s4769_s9 }
 0x19d   : > { %v971_v9 = vmul.f32 %v966_v4, %v3062_v47  ;;  %v986_v52 = vsel %vm4672_vm14, %v3643_v39, 0.0  ;;  %v925_v20 = vadd.f32 %v923_v31, %v908_v6  ;;  %v983_v43 = vsel %vm4672_vm14, %v3651_v61, %v3643_v39  ;;  %v1047_v54 = vpop.permute.xlu0 %1046  ;;  %1519 = vrot.lane.b32.xlu0 %v3087_v23, %s4769_s9  ;;  %s3887_s9 = sld [smem:[#allocation2 + $0x35]] }
 0x19e   : > { %vm4674_vm10 = vcmask 769024   ;;  %v1024_v42 = vstv %s3706_s26  ;;  %v926_v22 = vadd.f32 %v924_v41, %v909_v7  ;;  %v958_v45 = vmul.f32 %v956_v28, %v955_v48  ;;  %s4776_s26 = smov 113  }
 0x19f   : > { %v1003_v2 = vsel %vm4673_vm15, %v3672_v24, 0.0  ;;  %v1000_v51 = vsel %vm4673_vm15, %v3683_v33, %v3672_v24  ;;  %v942_v13 = vadd.f32 %v940_v12, %v925_v20  ;;  %v957_v29 = vmul.f32 %v956_v28, %v954_v37 }
 0x1a0   : > { %v989_v39 = vmul.f32 %v986_v52, %v3094_v10  ;;  %vm4675_vm14 = vcmask 760832   ;;  %v943_v61 = vadd.f32 %v941_v56, %v926_v22  ;;  %v975_v21 = vmul.f32 %v973_v26, %v972_v34  ;;  %v1066_v36 = vpop.permute.xlu1 %1065  ;;  %1537 = vrot.lane.b32.xlu1 %v3076_v59, %s4770_s23 }
 0x1a1   : > { %v974_v30 = vmul.f32 %v973_v26, %v971_v9  ;;  %v988_v46 = vmul.f32 %v983_v43, %v3079_v63  ;;  %v1006_v28 = vmul.f32 %v1003_v2, %v3097_v11  ;;  %v1005_v24 = vmul.f32 %v1000_v51, %v3091_v0  ;;  %v1064_v38 = vpop.permute.xlu0 %1063  ;;  %1535 = vrot.lane.b32.xlu0 %v3087_v23, %s4770_s23  ;;  %s3898_s23 = sld [smem:[#allocation2 + $0x36]] }
 0x1a2   : > { %v1020_v33 = vsel %vm4674_vm10, %v3704_v55, 0.0  ;;  %v1017_v62 = vsel %vm4674_vm10, %v1013_v60, %v3704_v55  ;;  %v960_v3 = vadd.f32 %v958_v45, %v943_v61  ;;  %v1041_v35 = vstv %s3736_s18  ;;  %s4777_s18 = smov 112  }
 0x1a3   : > { %vm4677_vm15 = vcmask 678912   ;;  %v1058_v26 = vstv %s3738_s1  ;;  %v959_v25 = vadd.f32 %v957_v29, %v942_v13  ;;  %v992_v32 = vmul.f32 %v990_v53, %v989_v39  ;;  %s3876_s1 = sld [smem:[#allocation2 + $0x34]] }
 0x1a4   : > { %v1037_v57 = vsel %vm4675_vm14, %v1032_v58, 0.0  ;;  %v1034_v40 = vsel %vm4675_vm14, %v1030_v19, %v1032_v58  ;;  %v991_v31 = vmul.f32 %v990_v53, %v988_v46  ;;  %v1023_v55 = vmul.f32 %v1020_v33, %v3119_v15  ;;  %v1083_v58 = vpop.permute.xlu1 %1082  ;;  %1561 = vrot.lane.b32.xlu1 %v3076_v59, %s4771_s30 }
 0x1a5   : > { %v1022_v60 = vmul.f32 %v1017_v62, %v3116_v17  ;;  %vm1067_vm10 = vcmask 670720   ;;  %v976_v50 = vadd.f32 %v974_v30, %v959_v25  ;;  %v977_v4 = vadd.f32 %v975_v21, %v960_v3  ;;  %v1081_v12 = vpop.permute.xlu0 %1080  ;;  %1559 = vrot.lane.b32.xlu0 %v3087_v23, %s4771_s30  ;;  %s3909_s30 = sld [smem:[#allocation2 + $0x37]] }
 0x1a6   : > { %v1009_v41 = vmul.f32 %v1007_v16, %v1006_v28  ;;  %v1008_v48 = vmul.f32 %v1007_v16, %v1005_v24  ;;  %v1040_v19 = vmul.f32 %v1037_v57, %v3139_v18  ;;  %v1039_v6 = vmul.f32 %v1034_v40, %v3136_v5 }
 0x1a7   : > { %v1054_v53 = vsel %vm4677_vm15, %v1049_v27, 0.0  ;;  %v1051_v7 = vsel %vm4677_vm15, %v1047_v54, %v1049_v27  ;;  %v994_v37 = vadd.f32 %v992_v32, %v977_v4  ;;  %v1075_v56 = vstv %s3769_s20  ;;  %s4779_s20 = smov 110  }
 0x1a8   : > { %vm4678_vm14 = vcmask 662528   ;;  %vm1101_vm0 = vcmask 654336   ;;  %v993_v34 = vadd.f32 %v991_v31, %v976_v50  ;;  %v1026_v9 = vmul.f32 %v1024_v42, %v1023_v55  ;;  %v1100_v45 = vpop.permute.xlu1 %1099  ;;  %1577 = vrot.lane.b32.xlu1 %v3076_v59, %s4772_s25 }
 0x1a9   : > { %v1025_v16 = vmul.f32 %v1024_v42, %v1022_v60  ;;  %v1071_v52 = vsel %vm1067_vm10, %v1066_v36, 0.0  ;;  %v1011_v20 = vadd.f32 %v1009_v41, %v994_v37  ;;  %v1057_v43 = vmul.f32 %v1054_v53, %v3016_v1  ;;  %v1098_v13 = vpop.permute.xlu0 %1097  ;;  %1575 = vrot.lane.b32.xlu0 %v3087_v23, %s4772_s25  ;;  %s4782_s25 = smov 98  }
 0x1aa   : > { %v1056_v27 = vmul.f32 %v1051_v7, %v3059_v44  ;;  %v1068_v22 = vsel %vm1067_vm10, %v1064_v38, %v1066_v36  ;;  %v1010_v2 = vadd.f32 %v1008_v48, %v993_v34  ;;  %v1043_v42 = vmul.f32 %v1041_v35, %v1040_v19 }
 0x1ab   : > { %v1042_v51 = vmul.f32 %v1041_v35, %v1039_v6  ;;  %v1088_v54 = vsel %vm4678_vm14, %v1083_v58, 0.0  ;;  %v1074_v29 = vmul.f32 %v1071_v52, %v3033_v8  ;;  %v1092_v39 = vstv %s3786_s4  ;;  %s4780_s4 = smov 109  }
 0x1ac   : > { %v1085_v61 = vsel %vm4678_vm14, %v1081_v12, %v1083_v58  ;;  %vm4679_vm15 = vcmask 646144   ;;  %v1027_v21 = vadd.f32 %v1025_v16, %v1010_v2  ;;  %v1028_v30 = vadd.f32 %v1026_v9, %v1011_v20  ;;  %v1117_v3 = vpop.permute.xlu1 %1116  ;;  %1593 = vrot.lane.b32.xlu1 %v3076_v59, %s4773_s21 }
 0x1ad   : > { %v1073_v46 = vmul.f32 %v1068_v22, %v3050_v14  ;;  %v1105_v28 = vsel %vm1101_vm0, %v1100_v45, 0.0  ;;  %v1060_v24 = vmul.f32 %v1058_v26, %v1057_v43  ;;  %v1059_v33 = vmul.f32 %v1058_v26, %v1056_v27  ;;  %v1115_v32 = vpop.permute.xlu0 %1114  ;;  %1591 = vrot.lane.b32.xlu0 %v3087_v23, %s4773_s21  ;;  %s4783_s21 = smov 97  }
 0x1ae   : > { %v1091_v62 = vmul.f32 %v1088_v54, %v3066_v49  ;;  %v1102_v36 = vsel %vm1101_vm0, %v1098_v13, %v1100_v45  ;;  %v1044_v35 = vadd.f32 %v1042_v51, %v1027_v21  ;;  %v1045_v38 = vadd.f32 %v1043_v42, %v1028_v30 }
 0x1af   : > { %v1090_v25 = vmul.f32 %v1085_v61, %v3062_v47  ;;  %vm1135_vm14 = vcmask 637952   ;;  %v1077_v57 = vmul.f32 %v1075_v56, %v1074_v29  ;;  %v1108_v40 = vmul.f32 %v1105_v28, %v3094_v10 }
 0x1b0   : > { %v1122_v26 = vsel %vm4679_vm15, %v1117_v3, 0.0  ;;  %v1119_v31 = vsel %vm4679_vm15, %v1115_v32, %v1117_v3  ;;  %v1076_v55 = vmul.f32 %v1075_v56, %v1073_v46  ;;  %v1109_v60 = vstv %s3802_s5  ;;  %v1134_v19 = vpop.permute.xlu1 %1133  ;;  %1609 = vrot.lane.b32.xlu1 %v3076_v59, %s4774_s6  ;;  %s4781_s5 = smov 99  }
 0x1b1   : > { %v1107_v50 = vmul.f32 %v1102_v36, %v3079_v63  ;;  %v1061_v4 = vadd.f32 %v1059_v33, %v1044_v35  ;;  %v1062_v41 = vadd.f32 %v1060_v24, %v1045_v38  ;;  %v1094_v48 = vmul.f32 %v1092_v39, %v1091_v62  ;;  %v1132_v37 = vpop.permute.xlu0 %1131  ;;  %1607 = vrot.lane.b32.xlu0 %v3087_v23, %s4774_s6  ;;  %s4784_s6 = smov 96  }
 0x1b2   : > { %v1126_v58 = vstv %s3807_s28  ;;  %v1093_v6 = vmul.f32 %v1092_v39, %v1090_v25  ;;  %v1125_v53 = vmul.f32 %v1122_v26, %v3097_v11  ;;  %v1124_v7 = vmul.f32 %v1119_v31, %v3091_v0  ;;  %s3920_s28 = sld [smem:[#allocation2 + $0x38]] }
 0x1b3   : > { %v1139_v12 = vsel %vm1135_vm14, %v1134_v19, 0.0  ;;  %v1079_v56 = vadd.f32 %v1077_v57, %v1062_v41  ;;  %v1111_v34 = vmul.f32 %v1109_v60, %v1108_v40  ;;  %v1136_v9 = vsel %vm1135_vm14, %v1132_v37, %v1134_v19 }
 0x1b4   : > { %vm1152_vm15 = vcmask 629760   ;;  %v1078_v16 = vadd.f32 %v1076_v55, %v1061_v4  ;;  %v1110_v52 = vmul.f32 %v1109_v60, %v1107_v50  ;;  %v1142_v20 = vmul.f32 %v1139_v12, %v3119_v15  ;;  %v1151_v45 = vpop.permute.xlu1 %1150  ;;  %1625 = vrot.lane.b32.xlu1 %v3076_v59, %s4775_s10 }
 0x1b5   : > { %v1141_v43 = vmul.f32 %v1136_v9, %v3116_v17  ;;  %v1096_v27 = vadd.f32 %v1094_v48, %v1079_v56  ;;  %v1143_v22 = vstv %s3821_s29  ;;  %v1128_v42 = vmul.f32 %v1126_v58, %v1125_v53  ;;  %v1149_v13 = vpop.permute.xlu0 %1148  ;;  %1623 = vrot.lane.b32.xlu0 %v3087_v23, %s4775_s10  ;;  %s3931_s29 = sld [smem:[#allocation2 + $0x39]]  ;;  %s4787_s10 = smov 95  }
 0x1b6   : > { %v1095_v2 = vadd.f32 %v1093_v6, %v1078_v16  ;;  %v1127_v51 = vmul.f32 %v1126_v58, %v1124_v7  ;;  %v1156_v54 = vsel %vm1152_vm15, %v1151_v45, 0.0  ;;  %v1160_v39 = vstv %s3829_s0  ;;  %s3942_s0 = sld [smem:[#allocation2 + $0x3a]] }
 0x1b7   : > { %v1113_v29 = vadd.f32 %v1111_v34, %v1096_v27  ;;  %v1159_v61 = vmul.f32 %v1156_v54, %v3139_v18  ;;  %v1153_v21 = vsel %vm1152_vm15, %v1149_v13, %v1151_v45  ;;  %v1145_v46 = vmul.f32 %v1143_v22, %v1142_v20 }
 0x1b8   : > { %v1112_v30 = vadd.f32 %v1110_v52, %v1095_v2  ;;  %v1144_v28 = vmul.f32 %v1143_v22, %v1141_v43  ;;  %v1158_v24 = vmul.f32 %v1153_v21, %v3136_v5  ;;  %v1170_v33 = vpop.permute.xlu1 %1169  ;;  %v1178_v25 = vstv %s3842_s2  ;;  %1641 = vrot.lane.b32.xlu1 %v3076_v59, %s4776_s26  ;;  %s3953_s2 = sld [smem:[#allocation2 + $0x3b]] }
 0x1b9   : > { %v1130_v36 = vadd.f32 %v1128_v42, %v1113_v29  ;;  %v1162_v3 = vmul.f32 %v1160_v39, %v1159_v61  ;;  %v1168_v38 = vpop.permute.xlu0 %1167  ;;  %1639 = vrot.lane.b32.xlu0 %v3087_v23, %s4776_s26  ;;  %v1194_v19 = vstv %s3855_s22  ;;  %v1210_v20 = vstv %s3865_s27  ;;  %s3964_s22 = sld [smem:[#allocation2 + $0x3c]]  ;;  %s4790_s26 = smov 94  }
 0x1ba   : > { %v1129_v62 = vadd.f32 %v1127_v51, %v1112_v30  ;;  %v1161_v35 = vmul.f32 %v1160_v39, %v1158_v24  ;;  %v1171_v32 = vsel %vm268_vm1, %v1168_v38, %v1170_v33  ;;  %v1174_v57 = vsel %vm268_vm1, 0.0, %v1168_v38  ;;  %s3975_s27 = sld [smem:[#allocation2 + $0x3d]] }
 0x1bb   : > { %v1147_v26 = vadd.f32 %v1145_v46, %v1130_v36  ;;  %v1176_v31 = vmul.f32 %v1174_v57, %v3059_v44  ;;  %v1177_v55 = vmul.f32 %v1171_v32, %v3016_v1  ;;  %v1226_v39 = vstv %s3876_s1  ;;  %s3986_s1 = sld [smem:[#allocation2 + $0x3e]] }
 0x1bc   : > { %v1146_v40 = vadd.f32 %v1144_v28, %v1129_v62  ;;  %v1186_v60 = vpop.permute.xlu1 %1185  ;;  %1657 = vrot.lane.b32.xlu1 %v3076_v59, %s4777_s18  ;;  %vm4785_vm1 = vcmask 269312  }
 0x1bd   : > { %v1164_v50 = vadd.f32 %v1162_v3, %v1147_v26  ;;  %v1179_v41 = vmul.f32 %v1178_v25, %v1176_v31  ;;  %v1180_v48 = vmul.f32 %v1178_v25, %v1177_v55  ;;  %v1184_v58 = vpop.permute.xlu0 %1183  ;;  %1655 = vrot.lane.b32.xlu0 %v3087_v23, %s4777_s18  ;;  %s4793_s18 = smov 93  }
 0x1be   : > { %v1163_v4 = vadd.f32 %v1161_v35, %v1146_v40  ;;  %v1187_v6 = vsel %vm296_vm2, %v1184_v58, %v1186_v60  ;;  %v1190_v53 = vsel %vm296_vm2, 0.0, %v1184_v58  ;;  %v1242_v35 = vstv %s3887_s9  ;;  %vm4786_vm2 = vmmov %vm4785_vm1  ;;  %s3997_s9 = sld [smem:[#allocation2 + $0x3f]] }
 0x1bf   : > { %v1182_v12 = vadd.f32 %v1180_v48, %v1164_v50  ;;  %v1192_v37 = vmul.f32 %v1190_v53, %v3050_v14  ;;  %v1193_v56 = vmul.f32 %v1187_v6, %v3033_v8 }
 0x1c0   : > { %v1181_v7 = vadd.f32 %v1179_v41, %v1163_v4  ;;  %v1202_v34 = vpop.permute.xlu1 %1201  ;;  %1673 = vrot.lane.b32.xlu1 %v3076_v59, %s4778_s11  ;;  %v1258_v4 = vstv %s3898_s23  ;;  %s4802_s23 = smov 81  }
 0x1c1   : > { %v1195_v9 = vmul.f32 %v1194_v19, %v1192_v37  ;;  %v1196_v16 = vmul.f32 %v1194_v19, %v1193_v56  ;;  %v1200_v52 = vpop.permute.xlu0 %1199  ;;  %1671 = vrot.lane.b32.xlu0 %v3087_v23, %s4778_s11  ;;  %s4796_s11 = smov 83  }
 0x1c2   : > { %v1203_v43 = vsel %vm324_vm3, %v1200_v52, %v1202_v34  ;;  %v1206_v27 = vsel %vm324_vm3, 0.0, %v1200_v52  ;;  %v1274_v34 = vstv %s3909_s30  ;;  %vm4788_vm3 = vcmask 261120   ;;  %s4804_s30 = smov 79  }
 0x1c3   : > { %v1197_v22 = vadd.f32 %v1195_v9, %v1181_v7  ;;  %v1198_v45 = vadd.f32 %v1196_v16, %v1182_v12  ;;  %v1208_v2 = vmul.f32 %v1206_v27, %v3062_v47  ;;  %v1209_v42 = vmul.f32 %v1203_v43, %v3066_v49 }
 0x1c4   : > { %v1218_v51 = vpop.permute.xlu1 %1217  ;;  %1689 = vrot.lane.b32.xlu1 %v3076_v59, %s4779_s20 }
 0x1c5   : > { %v1211_v54 = vmul.f32 %v1210_v20, %v1208_v2  ;;  %v1212_v13 = vmul.f32 %v1210_v20, %v1209_v42  ;;  %v1216_v29 = vpop.permute.xlu0 %1215  ;;  %1687 = vrot.lane.b32.xlu0 %v3087_v23, %s4779_s20  ;;  %s4799_s20 = smov 82  }
 0x1c6   : > { %v1219_v61 = vsel %vm352_vm4, %v1216_v29, %v1218_v51  ;;  %v1222_v21 = vsel %vm352_vm4, 0.0, %v1216_v29  ;;  %v1290_v51 = vstv %s3920_s28  ;;  %vm4789_vm4 = vmmov %vm4788_vm3  ;;  %s4806_s28 = smov 77  }
 0x1c7   : > { %v1213_v30 = vadd.f32 %v1211_v54, %v1197_v22  ;;  %v1214_v46 = vadd.f32 %v1212_v13, %v1198_v45  ;;  %v1224_v28 = vmul.f32 %v1222_v21, %v3079_v63  ;;  %v1225_v24 = vmul.f32 %v1219_v61, %v3094_v10 }
 0x1c8   : > { %v1234_v33 = vpop.permute.xlu1 %1233  ;;  %1705 = vrot.lane.b32.xlu1 %v3076_v59, %s4780_s4 }
 0x1c9   : > { %v1227_v62 = vmul.f32 %v1226_v39, %v1224_v28  ;;  %v1228_v36 = vmul.f32 %v1226_v39, %v1225_v24  ;;  %v1232_v3 = vpop.permute.xlu0 %1231  ;;  %1703 = vrot.lane.b32.xlu0 %v3087_v23, %s4780_s4  ;;  %s4803_s4 = smov 80  }
 0x1ca   : > { %v1235_v38 = vsel %vm380_vm5, %v1232_v3, %v1234_v33  ;;  %v1238_v25 = vsel %vm380_vm5, 0.0, %v1232_v3  ;;  %v1306_v33 = vstv %s3931_s29  ;;  %vm4791_vm5 = vcmask 252928   ;;  %s4073_s29 = sld [smem:[#allocation2 + $0x41]] }
 0x1cb   : > { %v1229_v32 = vadd.f32 %v1227_v62, %v1213_v30  ;;  %v1230_v57 = vadd.f32 %v1228_v36, %v1214_v46  ;;  %v1240_v40 = vmul.f32 %v1238_v25, %v3091_v0  ;;  %v1241_v26 = vmul.f32 %v1235_v38, %v3097_v11 }
 0x1cc   : > { %v1250_v31 = vpop.permute.xlu1 %1249  ;;  %1721 = vrot.lane.b32.xlu1 %v3076_v59, %s4781_s5 }
 0x1cd   : > { %v1243_v55 = vmul.f32 %v1242_v35, %v1240_v40  ;;  %v1244_v60 = vmul.f32 %v1242_v35, %v1241_v26  ;;  %v1248_v50 = vpop.permute.xlu0 %1247  ;;  %1719 = vrot.lane.b32.xlu0 %v3087_v23, %s4781_s5  ;;  %s4805_s5 = smov 78  }
 0x1ce   : > { %v1251_v41 = vsel %vm408_vm6, %v1248_v50, %v1250_v31  ;;  %v1254_v48 = vsel %vm408_vm6, 0.0, %v1248_v50  ;;  %v1322_v31 = vstv %s3942_s0  ;;  %vm4792_vm6 = vmmov %vm4791_vm5  ;;  %s4079_s0 = sld [smem:[#allocation2 + $0x43]] }
 0x1cf   : > { %v1245_v58 = vadd.f32 %v1243_v55, %v1229_v32  ;;  %v1246_v19 = vadd.f32 %v1244_v60, %v1230_v57  ;;  %v1256_v6 = vmul.f32 %v1254_v48, %v3116_v17  ;;  %v1257_v53 = vmul.f32 %v1251_v41, %v3119_v15 }
 0x1d0   : > { %v1266_v7 = vpop.permute.xlu1 %1265  ;;  %1737 = vrot.lane.b32.xlu1 %v3076_v59, %s4782_s25 }
 0x1d1   : > { %v1259_v12 = vmul.f32 %v1258_v4, %v1256_v6  ;;  %v1260_v37 = vmul.f32 %v1258_v4, %v1257_v53  ;;  %v1264_v56 = vpop.permute.xlu0 %1263  ;;  %1735 = vrot.lane.b32.xlu0 %v3087_v23, %s4782_s25  ;;  %s4069_s25 = sld [smem:[#allocation2 + $0x40]] }
 0x1d2   : > { %v1267_v9 = vsel %vm436_vm7, %v1264_v56, %v1266_v7  ;;  %v1270_v16 = vsel %vm436_vm7, 0.0, %v1264_v56  ;;  %v1338_v7 = vstv %s3953_s2  ;;  %vm4794_vm7 = vcmask 244736   ;;  %s4083_s2 = sld [smem:[#allocation2 + $0x45]] }
 0x1d3   : > { %v1261_v52 = vadd.f32 %v1259_v12, %v1245_v58  ;;  %v1262_v20 = vadd.f32 %v1260_v37, %v1246_v19  ;;  %v1272_v43 = vmul.f32 %v1270_v16, %v3136_v5  ;;  %v1273_v27 = vmul.f32 %v1267_v9, %v3139_v18 }
 0x1d4   : > { %v1282_v22 = vpop.permute.xlu1 %1281  ;;  %1753 = vrot.lane.b32.xlu1 %v3076_v59, %s4783_s21 }
 0x1d5   : > { %v1275_v45 = vmul.f32 %v1274_v34, %v1272_v43  ;;  %v1276_v2 = vmul.f32 %v1274_v34, %v1273_v27  ;;  %v1280_v42 = vpop.permute.xlu0 %1279  ;;  %1751 = vrot.lane.b32.xlu0 %v3087_v23, %s4783_s21  ;;  %s4075_s21 = sld [smem:[#allocation2 + $0x42]] }
 0x1d6   : > { %v1283_v54 = vsel %vm464_vm8, %v1280_v42, %v1282_v22  ;;  %v1286_v13 = vsel %vm464_vm8, 0.0, %v1280_v42  ;;  %v1354_v22 = vstv %s3964_s22  ;;  %vm4795_vm8 = vmmov %vm4794_vm7  ;;  %s4087_s22 = sld [smem:[#allocation2 + $0x47]] }
 0x1d7   : > { %v1277_v29 = vadd.f32 %v1275_v45, %v1261_v52  ;;  %v1278_v39 = vadd.f32 %v1276_v2, %v1262_v20  ;;  %v1288_v61 = vmul.f32 %v1286_v13, %v3059_v44  ;;  %v1289_v21 = vmul.f32 %v1283_v54, %v3016_v1 }
 0x1d8   : > { %v1298_v30 = vpop.permute.xlu1 %1297  ;;  %1769 = vrot.lane.b32.xlu1 %v3076_v59, %s4784_s6 }
 0x1d9   : > { %v1291_v46 = vmul.f32 %v1290_v51, %v1288_v61  ;;  %v1292_v28 = vmul.f32 %v1290_v51, %v1289_v21  ;;  %v1296_v24 = vpop.permute.xlu0 %1295  ;;  %1767 = vrot.lane.b32.xlu0 %v3087_v23, %s4784_s6  ;;  %s4081_s6 = sld [smem:[#allocation2 + $0x44]] }
 0x1da   : > { %v1299_v62 = vsel %vm481_vm9, %v1296_v24, %v1298_v30  ;;  %v1302_v36 = vsel %vm481_vm9, 0.0, %v1296_v24  ;;  %v1370_v30 = vstv %s3975_s27  ;;  %vm4797_vm9 = vcmask 236544   ;;  %s4136_s27 = sld [smem:[#allocation2 + $0x48]] }
 0x1db   : > { %v1293_v3 = vadd.f32 %v1291_v46, %v1277_v29  ;;  %v1294_v35 = vadd.f32 %v1292_v28, %v1278_v39  ;;  %v1304_v38 = vmul.f32 %v1302_v36, %v3050_v14  ;;  %v1305_v25 = vmul.f32 %v1299_v62, %v3033_v8 }
 0x1dc   : > { %v1314_v32 = vpop.permute.xlu1 %1313  ;;  %1785 = vrot.lane.b32.xlu1 %v3076_v59, %s4787_s10 }
 0x1dd   : > { %v1307_v57 = vmul.f32 %v1306_v33, %v1304_v38  ;;  %v1308_v40 = vmul.f32 %v1306_v33, %v1305_v25  ;;  %v1312_v26 = vpop.permute.xlu0 %1311  ;;  %1783 = vrot.lane.b32.xlu0 %v3087_v23, %s4787_s10  ;;  %s4085_s10 = sld [smem:[#allocation2 + $0x46]] }
 0x1de   : > { %v1315_v55 = vsel %vm4785_vm1, %v1312_v26, %v1314_v32  ;;  %v1318_v60 = vsel %vm4786_vm2, 0.0, %v1312_v26  ;;  %v1386_v32 = vstv %s3986_s1  ;;  %vm4798_vm1 = vmmov %vm4797_vm9  ;;  %vm4800_vm2 = vcmask 154624   ;;  %s4157_s1 = sld [smem:[#allocation2 + $0x4b]] }
 0x1df   : > { %v1309_v50 = vadd.f32 %v1307_v57, %v1293_v3  ;;  %v1310_v4 = vadd.f32 %v1308_v40, %v1294_v35  ;;  %v1320_v41 = vmul.f32 %v1318_v60, %v3062_v47  ;;  %v1321_v48 = vmul.f32 %v1315_v55, %v3066_v49 }
 0x1e0   : > { %v1330_v58 = vpop.permute.xlu1 %1329  ;;  %1801 = vrot.lane.b32.xlu1 %v3076_v59, %s4790_s26 }
 0x1e1   : > { %v1323_v19 = vmul.f32 %v1322_v31, %v1320_v41  ;;  %v1324_v6 = vmul.f32 %v1322_v31, %v1321_v48  ;;  %v1328_v53 = vpop.permute.xlu0 %1327  ;;  %1799 = vrot.lane.b32.xlu0 %v3087_v23, %s4790_s26  ;;  %s4096_s26 = sld [smem:[#allocation2 + $0x49]] }
 0x1e2   : > { %v1331_v12 = vsel %vm4788_vm3, %v1328_v53, %v1330_v58  ;;  %v1334_v37 = vsel %vm4789_vm4, 0.0, %v1328_v53  ;;  %v1402_v58 = vstv %s3997_s9  ;;  %vm4801_vm3 = vmmov %vm4800_vm2  ;;  %vm4807_vm4 = vcmask 146432   ;;  %s4165_s9 = sld [smem:[#allocation2 + $0x4d]] }
 0x1e3   : > { %v1325_v56 = vadd.f32 %v1323_v19, %v1309_v50  ;;  %v1326_v34 = vadd.f32 %v1324_v6, %v1310_v4  ;;  %v1336_v9 = vmul.f32 %v1334_v37, %v3079_v63  ;;  %v1337_v16 = vmul.f32 %v1331_v12, %v3094_v10 }
 0x1e4   : > { %v1346_v52 = vpop.permute.xlu1 %1345  ;;  %1817 = vrot.lane.b32.xlu1 %v3076_v59, %s4793_s18 }
 0x1e5   : > { %v1339_v20 = vmul.f32 %v1338_v7, %v1336_v9  ;;  %v1340_v43 = vmul.f32 %v1338_v7, %v1337_v16  ;;  %v1344_v27 = vpop.permute.xlu0 %1343  ;;  %1815 = vrot.lane.b32.xlu0 %v3087_v23, %s4793_s18  ;;  %s4155_s18 = sld [smem:[#allocation2 + $0x4a]] }
 0x1e6   : > { %v1347_v45 = vsel %vm4791_vm5, %v1344_v27, %v1346_v52  ;;  %v1350_v2 = vsel %vm4792_vm6, 0.0, %v1344_v27  ;;  %vm4808_vm5 = vmmov %vm4807_vm4  ;;  %vm4809_vm6 = vcmask 138240  }
 0x1e7   : > { %v1341_v42 = vadd.f32 %v1339_v20, %v1325_v56  ;;  %v1342_v51 = vadd.f32 %v1340_v43, %v1326_v34  ;;  %v1352_v54 = vmul.f32 %v1350_v2, %v3091_v0  ;;  %v1353_v13 = vmul.f32 %v1347_v45, %v3097_v11 }
 0x1e8   : > { %v1362_v29 = vpop.permute.xlu1 %1361  ;;  %1833 = vrot.lane.b32.xlu1 %v3076_v59, %s4796_s11 }
 0x1e9   : > { %v1355_v39 = vmul.f32 %v1354_v22, %v1352_v54  ;;  %v1356_v61 = vmul.f32 %v1354_v22, %v1353_v13  ;;  %v1360_v21 = vpop.permute.xlu0 %1359  ;;  %1831 = vrot.lane.b32.xlu0 %v3087_v23, %s4796_s11  ;;  %s4163_s11 = sld [smem:[#allocation2 + $0x4c]] }
 0x1ea   : > { %v1363_v46 = vsel %vm4794_vm7, %v1360_v21, %v1362_v29  ;;  %v1366_v28 = vsel %vm4795_vm8, 0.0, %v1360_v21  ;;  %vm4810_vm7 = vmmov %vm4809_vm6 }
 0x1eb   : > { %v1357_v24 = vadd.f32 %v1355_v39, %v1341_v42  ;;  %v1358_v33 = vadd.f32 %v1356_v61, %v1342_v51  ;;  %v1368_v62 = vmul.f32 %v1366_v28, %v3116_v17  ;;  %v1369_v36 = vmul.f32 %v1363_v46, %v3119_v15 }
 0x1ec   : > { %v1378_v3 = vpop.permute.xlu1 %1377  ;;  %1849 = vrot.lane.b32.xlu1 %v3076_v59, %s4799_s20 }
 0x1ed   : > { %v1371_v35 = vmul.f32 %v1370_v30, %v1368_v62  ;;  %v1372_v38 = vmul.f32 %v1370_v30, %v1369_v36  ;;  %v1376_v25 = vpop.permute.xlu0 %1375  ;;  %1847 = vrot.lane.b32.xlu0 %v3087_v23, %s4799_s20  ;;  %s4170_s20 = sld [smem:[#allocation2 + $0x4e]] }
 0x1ee   : > { %v1379_v57 = vsel %vm4797_vm9, %v1376_v25, %v1378_v3  ;;  %v1382_v40 = vsel %vm4798_vm1, 0.0, %v1376_v25  ;;  %vm4816_vm1 = vcmask 23552  }
 0x1ef   : > { %v1373_v26 = vadd.f32 %v1371_v35, %v1357_v24  ;;  %v1374_v31 = vadd.f32 %v1372_v38, %v1358_v33  ;;  %v1384_v55 = vmul.f32 %v1382_v40, %v3136_v5  ;;  %v1385_v60 = vmul.f32 %v1379_v57, %v3139_v18 }
 0x1f0   : > { %v1394_v50 = vpop.permute.xlu1 %1393  ;;  %1865 = vrot.lane.b32.xlu1 %v3076_v59, %s4802_s23 }
 0x1f1   : > { %v1387_v4 = vmul.f32 %v1386_v32, %v1384_v55  ;;  %v1388_v41 = vmul.f32 %v1386_v32, %v1385_v60  ;;  %v1392_v48 = vpop.permute.xlu0 %1391  ;;  %1863 = vrot.lane.b32.xlu0 %v3087_v23, %s4802_s23  ;;  %v1418_v55 = vstv %s4069_s25  ;;  %s4172_s23 = sld [smem:[#allocation2 + $0x4f]]  ;;  %s4199_s25 = sld [smem:[#allocation2 + $0x54]] }
 0x1f2   : > { %v1395_v19 = vsel %vm4800_vm2, %v1392_v48, %v1394_v50  ;;  %v1398_v6 = vsel %vm4801_vm3, 0.0, %v1392_v48  ;;  %v1434_v48 = vstv %s4073_s29  ;;  %vm4817_vm2 = vmmov %vm4816_vm1  ;;  %vm4818_vm3 = vcmask 15360   ;;  %s4206_s29 = sld [smem:[#allocation2 + $0x55]] }
 0x1f3   : > { %v1389_v53 = vadd.f32 %v1387_v4, %v1373_v26  ;;  %v1390_v7 = vadd.f32 %v1388_v41, %v1374_v31  ;;  %v1400_v12 = vmul.f32 %v1398_v6, %v3059_v44  ;;  %v1401_v37 = vmul.f32 %v1395_v19, %v3016_v1 }
 0x1f4   : > { %v1410_v56 = vpop.permute.xlu1 %1409  ;;  %1881 = vrot.lane.b32.xlu1 %v3076_v59, %s4803_s4 }
 0x1f5   : > { %v1403_v34 = vmul.f32 %v1402_v58, %v1400_v12  ;;  %v1404_v9 = vmul.f32 %v1402_v58, %v1401_v37  ;;  %v1408_v16 = vpop.permute.xlu0 %1407  ;;  %1879 = vrot.lane.b32.xlu0 %v3087_v23, %s4803_s4  ;;  %v1450_v58 = vstv %s4075_s21  ;;  %v1466_v12 = vstv %s4079_s0  ;;  %s4180_s4 = sld [smem:[#allocation2 + $0x50]]  ;;  %s4213_s21 = sld [smem:[#allocation2 + $0x56]] }
 0x1f6   : > { %v1411_v57 = vsel %vm4807_vm4, %v1408_v16, %v1410_v56  ;;  %v1414_v26 = vsel %vm4808_vm5, 0.0, %v1408_v16  ;;  %v1482_v37 = vstv %s4081_s6  ;;  %vm4819_vm4 = vmmov %vm4818_vm3  ;;  %vm4820_vm5 = vcmask 7168   ;;  %s4219_s0 = sld [smem:[#allocation2 + $0x57]]  ;;  %s4221_s6 = sld [smem:[#allocation2 + $0x58]] }
 0x1f7   : > { %v4023_v52 = vadd.f32 %v1403_v34, %v1389_v53  ;;  %v4025_v20 = vadd.f32 %v1404_v9, %v1390_v7  ;;  %v1417_v60 = vmul.f32 %v1411_v57, %v3033_v8  ;;  %v1416_v41 = vmul.f32 %v1414_v26, %v3050_v14 }
 0x1f8   : > { %v1426_v43 = vpop.permute.xlu1 %1425  ;;  %1897 = vrot.lane.b32.xlu1 %v3076_v59, %s4804_s30  ;;  %v1498_v9 = vstv %s4083_s2  ;;  %s4227_s2 = sld [smem:[#allocation2 + $0x59]] }
 0x1f9   : > { %v1424_v27 = vpop.permute.xlu0 %1423  ;;  %1895 = vrot.lane.b32.xlu0 %v3087_v23, %s4804_s30  ;;  %s4189_s30 = sld [smem:[#allocation2 + $0x51]] }
 0x1fa   : > { %v1427_v31 = vsel %vm4809_vm6, %v1424_v27, %v1426_v43  ;;  %v1430_v50 = vsel %vm4810_vm7, 0.0, %v1424_v27  ;;  %v1420_v43 = vmul.f32 %v1418_v55, %v1417_v60  ;;  %vm4821_vm6 = vmmov %vm4820_vm5  ;;  %vm4826_vm7 = vcmask 1039360  }
 0x1fb   : > { %v1433_v53 = vmul.f32 %v1427_v31, %v3066_v49  ;;  %v1432_v56 = vmul.f32 %v1430_v50, %v3062_v47  ;;  %v1419_v31 = vmul.f32 %v1418_v55, %v1416_v41  ;;  %v1553_v50 = vmul.f32 %v3094_v10, %v3076_v59 }
 0x1fc   : > { %v1442_v22 = vpop.permute.xlu1 %1441  ;;  %1913 = vrot.lane.b32.xlu1 %v3076_v59, %s4805_s5  ;;  %v1422_v41 = vadd.f32 %v1420_v43, %v4025_v20 }
 0x1fd   : > { %v1440_v45 = vpop.permute.xlu0 %1439  ;;  %1911 = vrot.lane.b32.xlu0 %v3087_v23, %s4805_s5  ;;  %v1436_v16 = vmul.f32 %v1434_v48, %v1433_v53  ;;  %s4191_s5 = sld [smem:[#allocation2 + $0x52]] }
 0x1fe   : > { %v1443_v19 = vsel %vm634_vm11, %v1440_v45, %v1442_v22  ;;  %v1446_v7 = vsel %vm634_vm11, 0.0, %v1440_v45  ;;  %vm4812_vm11 = vcmask 113664   ;;  %v1435_v22 = vmul.f32 %v1434_v48, %v1432_v56 }
 0x1ff   : > { %v1449_v27 = vmul.f32 %v1443_v19, %v3094_v10  ;;  %v1448_v45 = vmul.f32 %v1446_v7, %v3079_v63  ;;  %vm4813_vm8 = vmmov %vm4812_vm11  ;;  %v1438_v20 = vadd.f32 %v1436_v16, %v1422_v41 }
 0x200   : > { %v1458_v2 = vpop.permute.xlu1 %1457  ;;  %1929 = vrot.lane.b32.xlu1 %v3076_v59, %s4806_s28  ;;  %v1554_v59 = vstv %s4096_s26  ;;  %s4251_s26 = sld [smem:[#allocation2 + $0x5c]] }
 0x201   : > { %v1456_v42 = vpop.permute.xlu0 %1455  ;;  %1927 = vrot.lane.b32.xlu0 %v3087_v23, %s4806_s28  ;;  %v1452_v53 = vmul.f32 %v1450_v58, %v1449_v27  ;;  %v1451_v48 = vmul.f32 %v1450_v58, %v1448_v45  ;;  %s4197_s28 = sld [smem:[#allocation2 + $0x53]] }
 0x202   : > { %v1459_v34 = vsel %vm651_vm12, %v1456_v42, %v1458_v2  ;;  %v1462_v57 = vsel %vm651_vm12, 0.0, %v1456_v42  ;;  %v1552_v42 = vmul.f32 %v3079_v63, %v3087_v23  ;;  %vm4814_vm12 = vcmask 105472  }
 0x203   : > { %v1465_v60 = vmul.f32 %v1459_v34, %v3097_v11  ;;  %v1464_v55 = vmul.f32 %v1462_v57, %v3091_v0  ;;  %vm4815_vm9 = vmmov %vm4814_vm12  ;;  %v1421_v23 = vadd.f32 %v1419_v31, %v4023_v52  ;;  %v1454_v16 = vadd.f32 %v1452_v53, %v1438_v20 }
 0x204   : > { %v1474_v51 = vpop.permute.xlu1 %1473 }
 0x205   : > { %v1472_v54 = vpop.permute.xlu0 %1471  ;;  %v1468_v43 = vmul.f32 %v1466_v12, %v1465_v60  ;;  %v1437_v52 = vadd.f32 %v1435_v22, %v1421_v23  ;;  %v1467_v58 = vmul.f32 %v1466_v12, %v1464_v55 }
 0x206   : > { %v1478_v19 = vsel %vm4813_vm8, 0.0, %v1472_v54  ;;  %vm4828_vm8 = vcmask 1031168  }
 0x207   : > { %v1480_v56 = vmul.f32 %v1478_v19, %v3116_v17  ;;  %v1470_v55 = vadd.f32 %v1468_v43, %v1454_v16  ;;  %v1570_v16 = vstv %s4155_s18  ;;  %s4433_s18 = sld [smem:[#allocation2 + $0x5e]] }
 0x208   : > { %v4041_v13 = vpop.permute.xlu1 %1489 }
 0x209   : > { %v4043_v29 = vpop.permute.xlu0 %1487  ;;  %v1483_v22 = vmul.f32 %v1482_v37, %v1480_v56 }
 0x20c   : > { %v4045_v39 = vpop.permute.xlu1 %1505 }
 0x20d   : > { %v4047_v61 = vpop.permute.xlu0 %1503 }
 0x210   : > { %v4049_v21 = vpop.permute.xlu1 %1521 }
 0x211   : > { %v4051_v30 = vpop.permute.xlu0 %1519 }
 0x212   : > { %v1526_v45 = vsel %vm4819_vm4, 0.0, %v4051_v30  ;;  %vm4834_vm4 = vcmask 932864  }
 0x214   : > { %v4053_v46 = vpop.permute.xlu1 %1537 }
 0x215   : > { %v4055_v28 = vpop.permute.xlu0 %1535 }
 0x216   : > { %v1539_v19 = vsel %vm4820_vm5, %v4055_v28, %v4053_v46  ;;  %v1542_v53 = vsel %vm4821_vm6, 0.0, %v4055_v28  ;;  %v4822_v28 = vstv %s4085_s10  ;;  %s4229_s10 = sld [smem:[#allocation2 + $0x5a]]  ;;  %vm4835_vm5 = vmmov %vm4834_vm4  ;;  %vm4836_vm6 = vcmask 924672  }
 0x217   : > { %v1545_v56 = vmul.f32 %v1539_v19, %v3066_v49  ;;  %v4823_v43 = vmov %v4822_v28  ;;  %v1634_v19 = vstv %s4170_s20  ;;  %s2201_s20 = sld [smem:[#allocation2 + $0x62]] }
 0x218   : > { %v4057_v24 = vpop.permute.xlu1 %1561 }
 0x219   : > { %v4059_v33 = vpop.permute.xlu0 %1559 }
 0x21c   : > { %v4061_v62 = vpop.permute.xlu1 %1577 }
 0x21d   : > { %v4063_v36 = vpop.permute.xlu0 %1575 }
 0x220   : > { %v4065_v3 = vpop.permute.xlu1 %1593 }
 0x221   : > { %v4067_v35 = vpop.permute.xlu0 %1591 }
 0x224   : > { %v4071_v38 = vpop.permute.xlu1 %1609 }
 0x225   : > { %v4077_v25 = vpop.permute.xlu0 %1607 }
 0x228   : > { %v4089_v32 = vpop.permute.xlu1 %1625 }
 0x229   : > { %v4092_v40 = vpop.permute.xlu0 %1623 }
 0x22c   : > { %v4101_v4 = vpop.permute.xlu1 %1641 }
 0x22d   : > { %v4107_v6 = vpop.permute.xlu0 %1639 }
 0x22e   : > { %4811 = vst [vmem:[#allocation17_spill] sm:$0xff] %v4107_v6  ;;  %v1475_v6 = vsel %vm4812_vm11, %v1472_v54, %v1474_v51  ;;  %v1491_v51 = vsel %vm4814_vm12, %v4043_v29, %v4041_v13  ;;  %v1494_v54 = vsel %vm4815_vm9, 0.0, %v4043_v29  ;;  %v1507_v13 = vsel %vm4816_vm1, %v4047_v61, %v4045_v39  ;;  %vm4827_vm11 = vmmov %vm4826_vm7 }
 0x22f   : > { %v1481_v7 = vmul.f32 %v1475_v6, %v3119_v15  ;;  %v1497_v6 = vmul.f32 %v1491_v51, %v3139_v18  ;;  %v1510_v29 = vsel %vm4817_vm2, 0.0, %v4047_v61  ;;  %v1496_v27 = vmul.f32 %v1494_v54, %v3136_v5  ;;  %vm4829_vm12 = vmmov %vm4828_vm8 }
 0x230   : > { %v4120_v26 = vpop.permute.xlu1 %1657  ;;  %v1523_v39 = vsel %vm4818_vm3, %v4051_v30, %v4049_v21  ;;  %v1513_v61 = vmul.f32 %v1507_v13, %v3016_v1  ;;  %v1453_v21 = vadd.f32 %v1451_v48, %v1437_v52  ;;  %v1512_v60 = vmul.f32 %v1510_v29, %v3059_v44 }
 0x231   : > { %v4126_v2 = vpop.permute.xlu0 %1655  ;;  %v1484_v31 = vmul.f32 %v1482_v37, %v1481_v7  ;;  %v1500_v51 = vmul.f32 %v1498_v9, %v1497_v6  ;;  %v1529_v41 = vmul.f32 %v1523_v39, %v3033_v8  ;;  %v1499_v46 = vmul.f32 %v1498_v9, %v1496_v27 }
 0x232   : > { %v1469_v37 = vadd.f32 %v1467_v58, %v1453_v21  ;;  %v1528_v7 = vmul.f32 %v1526_v45, %v3050_v14  ;;  %v1546_v54 = vstv %s4136_s27  ;;  %v1516_v48 = vmul.f32 %v4822_v28, %v1513_v61  ;;  %s4427_s27 = sld [smem:[#allocation2 + $0x5d]] }
 0x233   : > { %v1486_v23 = vadd.f32 %v1484_v31, %v1470_v55  ;;  %v1556_v13 = vmul.f32 %v1554_v59, %v1553_v50  ;;  %v1515_v6 = vmul.f32 %v4823_v43, %v1512_v60  ;;  %v1544_v29 = vmul.f32 %v1542_v53, %v3062_v47 }
 0x234   : > { %v4143_v34 = vpop.permute.xlu1 %1673  ;;  %v1485_v9 = vadd.f32 %v1483_v22, %v1469_v37  ;;  %v1555_v52 = vmul.f32 %v1554_v59, %v1552_v42  ;;  %v4824_v27 = vstv %s4087_s22  ;;  %v1586_v31 = vstv %s4157_s1  ;;  %s4245_s22 = sld [smem:[#allocation2 + $0x5b]]  ;;  %s4447_s1 = sld [smem:[#allocation2 + $0x5f]] }
 0x235   : > { %v4150_v57 = vpop.permute.xlu0 %1671  ;;  %v1502_v50 = vadd.f32 %v1500_v51, %v1486_v23  ;;  %v1532_v39 = vmul.f32 %v4824_v27, %v1529_v41  ;;  %v4825_v45 = vmov %v4824_v27  ;;  %v1602_v42 = vstv %s4163_s11  ;;  %s4457_s11 = sld [smem:[#allocation2 + $0x60]] }
 0x236   : > { %v1501_v61 = vadd.f32 %v1499_v46, %v1485_v9  ;;  %v1531_v21 = vmul.f32 %v4825_v45, %v1528_v7  ;;  %v1618_v59 = vstv %s4165_s9  ;;  %v1548_v60 = vmul.f32 %v1546_v54, %v1545_v56  ;;  %s4475_s9 = sld [smem:[#allocation2 + $0x61]] }
 0x237   : > { %v1518_v22 = vadd.f32 %v1516_v48, %v1502_v50  ;;  %v1650_v55 = vstv %s4172_s23  ;;  %v1547_v53 = vmul.f32 %v1546_v54, %v1544_v29  ;;  %v1566_v37 = vsel %vm4826_vm7, %v4057_v24, 0.0  ;;  %vm4838_vm7 = vmmov %vm4836_vm6  ;;  %s2103_s23 = sshll.u32 %s2731_s17, 1 }
 0x238   : > { %v4174_v12 = vpop.permute.xlu1 %1689  ;;  %v1517_v41 = vadd.f32 %v1515_v6, %v1501_v61  ;;  %v1666_v46 = vstv %s4180_s4  ;;  %v1563_v28 = vsel %vm4827_vm11, %v4059_v33, %v4057_v24  ;;  %v1682_v48 = vstv %s4189_s30  ;;  %s2210_s4 = sshll.u32 %s2577_s16, 5  ;;  %s211_s30 = scalar_lea.vmem [#allocation9], %s2103_s23 }
 0x239   : > { %v4182_v30 = vpop.permute.xlu0 %1687  ;;  %v1534_v23 = vadd.f32 %v1532_v39, %v1518_v22  ;;  %v1698_v56 = vstv %s4191_s5  ;;  %v1582_v54 = vsel %vm4828_vm8, %v4061_v62, 0.0  ;;  %v1714_v43 = vstv %s4197_s28  ;;  %s1997_s5 = sshll.u32 %s211_s30, 4  ;;  %s2535_s16 = smov [#allocation9]   ;;  %s4500_s5 = int_to_ptr.vmem [resolvable:$true] %s1997_s5 }
 0x23a   : > { %v1533_v9 = vadd.f32 %v1531_v21, %v1517_v41  ;;  %v1730_v6 = vstv %s4199_s25  ;;  %v1569_v50 = vmul.f32 %v1566_v37, %v3097_v11  ;;  %v1579_v24 = vsel %vm4829_vm12, %v4063_v36, %v4061_v62 }
 0x23b   : > { %v1550_v29 = vadd.f32 %v1548_v60, %v1534_v23  ;;  %v1568_v61 = vmul.f32 %v1563_v28, %v3091_v0  ;;  %vm4830_vm9 = vcmask 1022976   ;;  %v1585_v60 = vmul.f32 %v1582_v54, %v3119_v15 }
 0x23c   : > { %v4204_v20 = vpop.permute.xlu1 %1705  ;;  %v1549_v39 = vadd.f32 %v1547_v53, %v1533_v9  ;;  %v1598_v45 = vsel %vm4830_vm9, %v4065_v3, 0.0  ;;  %vm4831_vm1 = vmmov %vm4830_vm9  ;;  %v1778_v37 = vstv %s4219_s0  ;;  %v1584_v36 = vmul.f32 %v1579_v24, %v3116_v17  ;;  %s2407_s0 = scalar_lea.vmem %s4500_s5, 32 }
 0x23d   : > { %v4211_v58 = vpop.permute.xlu0 %1703  ;;  %v1595_v41 = vsel %vm4831_vm1, %v4067_v35, %v4065_v3  ;;  %vm4832_vm2 = vcmask 941056   ;;  %v1558_v9 = vadd.f32 %v1556_v13, %v1550_v29  ;;  %v1572_v33 = vmul.f32 %v1570_v16, %v1569_v50  ;;  %p2408_p11 = scmp.ne.s32.totalorder %s4500_s5, %s2407_s0 }
 0x23e   : > { %v1614_v53 = vsel %vm4832_vm2, %v4071_v38, 0.0  ;;  %v1601_v22 = vmul.f32 %v1598_v45, %v3139_v18  ;;  %vm4833_vm3 = vmmov %vm4832_vm2  ;;  %v1557_v35 = vadd.f32 %v1555_v52, %v1549_v39  ;;  %v1571_v24 = vmul.f32 %v1570_v16, %v1568_v61 }
 0x23f   : > { %v1611_v54 = vsel %vm4833_vm3, %v4077_v25, %v4071_v38  ;;  %v1600_v62 = vmul.f32 %v1595_v41, %v3136_v5  ;;  %v1630_v23 = vsel %vm4834_vm4, %v4089_v32, 0.0  ;;  %v1588_v29 = vmul.f32 %v1586_v31, %v1585_v60  ;;  %p2409_p6 = pnand %p2408_p11, %p4877_p4 }
 0x240   : > { %v4233_v51 = vpop.permute.xlu1 %1721  ;;  %v1617_v50 = vmul.f32 %v1614_v53, %v3016_v1  ;;  %v1627_v38 = vsel %vm4835_vm5, %v4092_v40, %v4089_v32  ;;  %v1842_v25 = vstv %s4245_s22  ;;  %v1587_v45 = vmul.f32 %v1586_v31, %v1584_v36  ;;  %v4837_v53 = vld [vmem:[#allocation17_spill] sm:$0xff] }
 0x241   : > { %v4238_v7 = vpop.permute.xlu0 %1719  ;;  %v1616_v52 = vmul.f32 %v1611_v54, %v3059_v44  ;;  %v1646_v16 = vsel %vm4836_vm6, %v4101_v4, 0.0  ;;  %v1858_v39 = vstv %s4251_s26  ;;  %v1574_v61 = vadd.f32 %v1572_v33, %v1558_v9  ;;  %p2410_p9 = pneg %p2409_p6 }
 0x242   : > { %v1604_v41 = vmul.f32 %v1602_v42, %v1601_v22  ;;  %v1633_v60 = vmul.f32 %v1630_v23, %v3033_v8  ;;  %v1643_v28 = vsel %vm4838_vm7, %v4837_v53, %v4101_v4  ;;  %v1573_v40 = vadd.f32 %v1571_v24, %v1557_v35 }
 0x243   : > { %v1603_v31 = vmul.f32 %v1602_v42, %v1600_v62  ;;  %v1632_v36 = vmul.f32 %v1627_v38, %v3050_v14  ;;  %v1662_v54 = vsel %vm863_vm13, %v4120_v26, 0.0  ;;  %v1590_v22 = vadd.f32 %v1588_v29, %v1574_v61 }
 0x244   : > { %v4258_v27 = vpop.permute.xlu1 %1737  ;;  %v1620_v23 = vmul.f32 %v1618_v59, %v1617_v50  ;;  %v1649_v9 = vmul.f32 %v1646_v16, %v3066_v49  ;;  %v1659_v4 = vsel %vm863_vm13, %v4126_v2, %v4120_v26  ;;  %v1589_v35 = vadd.f32 %v1587_v45, %v1573_v40 }
 0x245   : > { %v4263_v21 = vpop.permute.xlu0 %1735  ;;  %v1619_v42 = vmul.f32 %v1618_v59, %v1616_v52  ;;  %v1648_v62 = vmul.f32 %v1643_v28, %v3062_v47  ;;  %vm4839_vm11 = vcmask 908288   ;;  %v1606_v38 = vadd.f32 %v1604_v41, %v1590_v22 }
 0x246   : > { %v1678_v24 = vsel %vm4839_vm11, %v4143_v34, 0.0  ;;  %v1636_v29 = vmul.f32 %v1634_v19, %v1633_v60  ;;  %v1665_v50 = vmul.f32 %v1662_v54, %v3094_v10  ;;  %vm4840_vm8 = vmmov %vm4839_vm11  ;;  %v1605_v2 = vadd.f32 %v1603_v31, %v1589_v35 }
 0x247   : > { %v1675_v16 = vsel %vm4840_vm8, %v4150_v57, %v4143_v34  ;;  %v1635_v59 = vmul.f32 %v1634_v19, %v1632_v36  ;;  %v1664_v28 = vmul.f32 %v1659_v4, %v3079_v63  ;;  %vm4841_vm13 = vcmask 900096  }
 0x248   : > { %v4281_v3 = vpop.permute.xlu1 %1753  ;;  %v1694_v45 = vsel %vm4841_vm13, %v4174_v12, 0.0  ;;  %v1622_v61 = vadd.f32 %v1620_v23, %v1606_v38  ;;  %v1652_v41 = vmul.f32 %v1650_v55, %v1649_v9  ;;  %v1681_v60 = vmul.f32 %v1678_v24, %v3097_v11  ;;  %vm4842_vm12 = vmmov %vm4841_vm13 }
 0x249   : > { %v4286_v13 = vpop.permute.xlu0 %1751  ;;  %v1691_v34 = vsel %vm4842_vm12, %v4182_v30, %v4174_v12  ;;  %v1621_v57 = vadd.f32 %v1619_v42, %v1605_v2  ;;  %v1651_v19 = vmul.f32 %v1650_v55, %v1648_v62  ;;  %v1680_v53 = vmul.f32 %v1675_v16, %v3091_v0 }
 0x24a   : > { %vm4843_vm9 = vcmask 891904   ;;  %v1638_v31 = vadd.f32 %v1636_v29, %v1622_v61  ;;  %v1668_v36 = vmul.f32 %v1666_v46, %v1665_v50  ;;  %v1697_v54 = vmul.f32 %v1694_v45, %v3119_v15 }
 0x24b   : > { %v1710_v40 = vsel %vm4843_vm9, %v4204_v20, 0.0  ;;  %vm4844_vm1 = vmmov %vm4843_vm9  ;;  %v1637_v30 = vadd.f32 %v1635_v59, %v1621_v57  ;;  %v1667_v55 = vmul.f32 %v1666_v46, %v1664_v28  ;;  %v1696_v23 = vmul.f32 %v1691_v34, %v3116_v17 }
 0x24c   : > { %v4303_v32 = vpop.permute.xlu1 %1769  ;;  %v1707_v22 = vsel %vm4844_vm1, %v4211_v58, %v4204_v20  ;;  %vm4845_vm2 = vcmask 809984   ;;  %v1654_v35 = vadd.f32 %v1652_v41, %v1638_v31  ;;  %v1684_v42 = vmul.f32 %v1682_v48, %v1681_v60 }
 0x24d   : > { %v4310_v33 = vpop.permute.xlu0 %1767  ;;  %v1726_v9 = vsel %vm4845_vm2, %v4233_v51, 0.0  ;;  %v1713_v62 = vmul.f32 %v1710_v40, %v3139_v18  ;;  %vm4846_vm3 = vmmov %vm4845_vm2  ;;  %v1653_v58 = vadd.f32 %v1651_v19, %v1637_v30  ;;  %v1683_v46 = vmul.f32 %v1682_v48, %v1680_v53 }
 0x24e   : > { %v1723_v20 = vsel %vm4846_vm3, %v4238_v7, %v4233_v51  ;;  %v1712_v24 = vmul.f32 %v1707_v22, %v3136_v5  ;;  %vm4847_vm4 = vcmask 801792   ;;  %v1670_v29 = vadd.f32 %v1668_v36, %v1654_v35 }
 0x24f   : > { %v1742_v38 = vsel %vm4847_vm4, %v4258_v27, 0.0  ;;  %v1700_v50 = vmul.f32 %v1698_v56, %v1697_v54  ;;  %v1729_v16 = vmul.f32 %v1726_v9, %v3016_v1  ;;  %vm4848_vm5 = vmmov %vm4847_vm4  ;;  %v1669_v7 = vadd.f32 %v1667_v55, %v1653_v58 }
 0x250   : > { %v4329_v26 = vpop.permute.xlu1 %1785  ;;  %v1739_v2 = vsel %vm4848_vm5, %v4263_v21, %v4258_v27  ;;  %v1699_v48 = vmul.f32 %v1698_v56, %v1696_v23  ;;  %v1728_v59 = vmul.f32 %v1723_v20, %v3059_v44  ;;  %vm4849_vm6 = vcmask 793600  }
 0x251   : > { %v1784_v52 = vpop.permute.xlu0 %1783  ;;  %v1758_v28 = vsel %vm4849_vm6, %v4281_v3, 0.0  ;;  %v1686_v61 = vadd.f32 %v1684_v42, %v1670_v29  ;;  %v1716_v41 = vmul.f32 %v1714_v43, %v1713_v62  ;;  %v1745_v60 = vmul.f32 %v1742_v38, %v3033_v8  ;;  %vm4850_vm7 = vmmov %vm4849_vm6 }
 0x252   : > { %v1755_v27 = vsel %vm4850_vm7, %v4286_v13, %v4281_v3  ;;  %v1685_v21 = vadd.f32 %v1683_v46, %v1669_v7  ;;  %v1715_v56 = vmul.f32 %v1714_v43, %v1712_v24  ;;  %v1744_v34 = vmul.f32 %v1739_v2, %v3050_v14 }
 0x253   : > { %vm4851_vm11 = vcmask 785408   ;;  %v1702_v19 = vadd.f32 %v1700_v50, %v1686_v61  ;;  %v1732_v53 = vmul.f32 %v1730_v6, %v1729_v16  ;;  %v1761_v40 = vmul.f32 %v1758_v28, %v3066_v49 }
 0x254   : > { %v1802_v12 = vpop.permute.xlu1 %1801  ;;  %v1774_v57 = vsel %vm4851_vm11, %v4303_v32, 0.0  ;;  %vm4852_vm8 = vmmov %vm4851_vm11  ;;  %v1701_v13 = vadd.f32 %v1699_v48, %v1685_v21  ;;  %v1731_v43 = vmul.f32 %v1730_v6, %v1728_v59  ;;  %v1760_v36 = vmul.f32 %v1755_v27, %v3062_v47 }
 0x255   : > { %v1800_v4 = vpop.permute.xlu0 %1799  ;;  %v1771_v31 = vsel %vm4852_vm8, %v4310_v33, %v4303_v32  ;;  %vm4853_vm13 = vcmask 777216   ;;  %v1718_v30 = vadd.f32 %v1716_v41, %v1702_v19  ;;  %v4854_v55 = vstv %s4206_s29  ;;  %s4498_s29 = scalar_lea.hbm %s4545_s3, %s2210_s4 }
 0x256   : > { %v1790_v54 = vsel %vm4853_vm13, %v4329_v26, 0.0  ;;  %v1748_v23 = vmul.f32 %v4854_v55, %v1745_v60  ;;  %v1777_v9 = vmul.f32 %v1774_v57, %v3094_v10  ;;  %vm4855_vm12 = vmmov %vm4853_vm13  ;;  %v1717_v33 = vadd.f32 %v1715_v56, %v1701_v13 }
 0x257   : > { %v1787_v32 = vsel %vm4855_vm12, %v1784_v52, %v4329_v26  ;;  %v4856_v35 = vmov %v4854_v55  ;;  %v1776_v6 = vmul.f32 %v1771_v31, %v3079_v63  ;;  %vm4857_vm9 = vcmask 769024  }
 0x258   : > { %v1818_v51 = vpop.permute.xlu1 %1817  ;;  %v1747_v42 = vmul.f32 %v4856_v35, %v1744_v34  ;;  %v1806_v62 = vsel %vm4857_vm9, %v1802_v12, 0.0  ;;  %v1734_v20 = vadd.f32 %v1732_v53, %v1718_v30  ;;  %v4858_v58 = vstv %s4213_s21  ;;  %vm4859_vm1 = vmmov %vm4857_vm9  ;;  %s1983_s21 = scalar_lea.sflag [#allocation4], %s2731_s17 }
 0x259   : > { %v1816_v45 = vpop.permute.xlu0 %1815  ;;  %v1764_v46 = vmul.f32 %v4858_v58, %v1761_v40  ;;  %v1793_v24 = vmul.f32 %v1790_v54, %v3097_v11  ;;  %v1803_v38 = vsel %vm4859_vm1, %v1800_v4, %v1802_v12  ;;  %v1733_v50 = vadd.f32 %v1731_v43, %v1717_v33 }
 0x25a   : > { %v4860_v26 = vmov %v4858_v58  ;;  %v1792_v16 = vmul.f32 %v1787_v32, %v3091_v0  ;;  %vm4861_vm2 = vcmask 760832   ;;  %v1750_v48 = vadd.f32 %v1748_v23, %v1734_v20 }
 0x25b   : > { %v1763_v52 = vmul.f32 %v4860_v26, %v1760_v36  ;;  %v1822_v2 = vsel %vm4861_vm2, %v1818_v51, 0.0  ;;  %v1780_v59 = vmul.f32 %v1778_v37, %v1777_v9  ;;  %v1809_v28 = vmul.f32 %v1806_v62, %v3119_v15  ;;  %vm4862_vm3 = vmmov %vm4861_vm2 }
 0x25c   : > { %v1834_v3 = vpop.permute.xlu1 %1833  ;;  %v1819_v61 = vsel %vm4862_vm3, %v1816_v45, %v1818_v51  ;;  %v1749_v41 = vadd.f32 %v1747_v42, %v1733_v50  ;;  %v1779_v12 = vmul.f32 %v1778_v37, %v1776_v6  ;;  %v1808_v4 = vmul.f32 %v1803_v38, %v3116_v17 }
 0x25d   : > { %v1832_v22 = vpop.permute.xlu0 %1831  ;;  %vm4863_vm4 = vcmask 678912   ;;  %v1766_v27 = vadd.f32 %v1764_v46, %v1750_v48  ;;  %v4864_v21 = vstv %s4221_s6  ;;  %v1825_v34 = vmul.f32 %v1822_v2, %v3139_v18  ;;  %s2411_s6 = sshll.u32 %s2535_s16, 4  ;;  %s2412_s6 = int_to_ptr.vmem [resolvable:$false] %s2411_s6 }
 0x25e   : > { %v1838_v60 = vsel %vm4863_vm4, %v1834_v3, 0.0  ;;  %v1796_v56 = vmul.f32 %v4864_v21, %v1793_v24  ;;  %vm4865_vm5 = vmmov %vm4863_vm4  ;;  %v1765_v37 = vadd.f32 %v1763_v52, %v1749_v41  ;;  %v4866_v51 = vmov %v4864_v21  ;;  %p2414_p12 = scmp.lt.s32.totalorder %s4500_s5, %s2412_s6 }
 0x25f   : > { %v1835_v57 = vsel %vm4865_vm5, %v1832_v22, %v1834_v3  ;;  %v1795_v45 = vmul.f32 %v4866_v51, %v1792_v16  ;;  %v1824_v53 = vmul.f32 %v1819_v61, %v3136_v5  ;;  %v1782_v13 = vadd.f32 %v1780_v59, %v1766_v27 }
 0x260   : > { %v1850_v29 = vpop.permute.xlu1 %1849  ;;  %v4867_v43 = vstv %s4227_s2  ;;  %v1841_v54 = vmul.f32 %v1838_v60, %v3016_v1  ;;  %v1781_v22 = vadd.f32 %v1779_v12, %v1765_v37  ;;  %v1840_v23 = vmul.f32 %v1835_v57, %v3059_v44  ;;  %s2413_s2 = scalar_lea.vmem %s2412_s6, 64 }
 0x261   : > { %v1848_v7 = vpop.permute.xlu0 %1847  ;;  %v1854_v40 = vsel %vm1067_vm10, %v1850_v29, 0.0  ;;  %v1812_v36 = vmul.f32 %v4867_v43, %v1809_v28  ;;  %v4868_v30 = vmov %v4867_v43  ;;  %vm4869_vm6 = vcmask 662528   ;;  %p2415_p7 = scmp.lt.s32.totalorder %s2413_s2, %s2407_s0 }
 0x262   : > { %v1851_v3 = vsel %vm1067_vm10, %v1848_v7, %v1850_v29  ;;  %v1811_v55 = vmul.f32 %v4868_v30, %v1808_v4  ;;  %v1798_v32 = vadd.f32 %v1796_v56, %v1782_v13  ;;  %v4870_v33 = vstv %s4229_s10  ;;  %vm4871_vm7 = vmmov %vm4869_vm6 }
 0x263   : > { %v1828_v35 = vmul.f32 %v4870_v33, %v1825_v34  ;;  %v1857_v42 = vmul.f32 %v1854_v40, %v3033_v8  ;;  %v1797_v62 = vadd.f32 %v1795_v45, %v1781_v22  ;;  %v4872_v20 = vmov %v4870_v33  ;;  %p2416_p13 = por %p2415_p7, %p2414_p12 }
 0x264   : > { %v1866_v19 = vpop.permute.xlu1 %1865  ;;  %v1827_v58 = vmul.f32 %v4872_v20, %v1824_v53  ;;  %v1856_v44 = vmul.f32 %v1851_v3, %v3050_v14  ;;  %v1814_v38 = vadd.f32 %v1812_v36, %v1798_v32  ;;  %v1844_v29 = vmul.f32 %v1842_v25, %v1841_v54 }
 0x265   : > { %v1864_v31 = vpop.permute.xlu0 %1863  ;;  %v1870_v9 = vsel %vm4869_vm6, %v1866_v19, 0.0  ;;  %v1813_v26 = vadd.f32 %v1811_v55, %v1797_v62  ;;  %v1843_v52 = vmul.f32 %v1842_v25, %v1840_v23  ;;  %v1874_v16 = vstv %s4427_s27  ;;  %p2417_p3 = pnand %p2416_p13, %p2410_p9 }
 0x266   : > { %v1867_v1 = vsel %vm4871_vm7, %v1864_v31, %v1866_v19  ;;  %v1873_v8 = vmul.f32 %v1870_v9, %v3066_v49  ;;  %v1830_v14 = vadd.f32 %v1828_v35, %v1814_v38  ;;  %v1860_v7 = vmul.f32 %v1858_v39, %v1857_v42 }
 0x267   : > { %v1872_v2 = vmul.f32 %v1867_v1, %v3062_v47  ;;  %v1890_v48 = vstv %s4433_s18  ;;  %v1829_v61 = vadd.f32 %v1827_v58, %v1813_v26  ;;  %v1859_v41 = vmul.f32 %v1858_v39, %v1856_v44 }
 0x268   : > { %v1882_v6 = vpop.permute.xlu1 %1881  ;;  %vm4873_vm10 = vcmask 646144   ;;  %v1846_v47 = vadd.f32 %v1844_v29, %v1830_v14  ;;  %v1876_v4 = vmul.f32 %v1874_v16, %v1873_v8  ;;  %v1906_v56 = vstv %s4447_s1 }
 0x269   : > { %v1886_v46 = vsel %vm1101_vm0, %v1882_v6, 0.0  ;;  %v1880_v24 = vpop.permute.xlu0 %1879  ;;  %v1845_v21 = vadd.f32 %v1843_v52, %v1829_v61  ;;  %v1922_v51 = vstv %s4457_s11  ;;  %v1938_v23 = vstv %s4475_s9 }
 0x26a   : > { %v1883_v50 = vsel %vm1101_vm0, %v1880_v24, %v1882_v6  ;;  %v1889_v59 = vmul.f32 %v1886_v46, %v3094_v10  ;;  %vm4874_vm0 = vmmov %vm4873_vm10  ;;  %v1875_v10 = vmul.f32 %v1874_v16, %v1872_v2  ;;  %v1862_v39 = vadd.f32 %v1860_v7, %v1846_v47  ;;  %v4875_v7 = vld [vmem:[#allocation16_spill] sm:$0xff] }
 0x26b   : > { %v1888_v49 = vmul.f32 %v1883_v50, %v3079_v63  ;;  %v1861_v19 = vadd.f32 %v1859_v41, %v1845_v21  ;;  %v1944_v20 = vstv %s2201_s20  ;;  %v4876_v41 = vlaneseq }
 0x26c   : > { %v1898_v28 = vpop.permute.xlu1 %1897  ;;  %v1892_v57 = vmul.f32 %v1890_v48, %v1889_v59  ;;  %v1878_v40 = vadd.f32 %v1876_v4, %v1862_v39 }
 0x26d   : > { %v1902_v12 = vsel %vm4873_vm10, %v1898_v28, 0.0  ;;  %v1896_v25 = vpop.permute.xlu0 %1895  ;;  %v1891_v37 = vmul.f32 %v1890_v48, %v1888_v49  ;;  %v1877_v43 = vadd.f32 %v1875_v10, %v1861_v19 }
 0x26e   : > { %v1905_v60 = vmul.f32 %v1902_v12, %v3097_v11  ;;  %v1899_v27 = vsel %vm4874_vm0, %v1896_v25, %v1898_v28  ;;  %v1894_v54 = vadd.f32 %v1892_v57, %v1878_v40 }
 0x26f   : > { %v1904_v34 = vmul.f32 %v1899_v27, %v3091_v0  ;;  %v1893_v30 = vadd.f32 %v1891_v37, %v1877_v43 }
 0x270   : > { %v1914_v63 = vpop.permute.xlu1 %1913  ;;  %v1908_v11 = vmul.f32 %v1906_v56, %v1905_v60 }
 0x271   : > { %v1918_v45 = vsel %vm1135_vm14, %v1914_v63, 0.0  ;;  %v1912_v53 = vpop.permute.xlu0 %1911  ;;  %v1907_v36 = vmul.f32 %v1906_v56, %v1904_v34 }
 0x272   : > { %v1921_v31 = vmul.f32 %v1918_v45, %v3119_v15  ;;  %v1915_v13 = vsel %vm1135_vm14, %v1912_v53, %v1914_v63  ;;  %v1910_v33 = vadd.f32 %v1908_v11, %v1894_v54  ;;  %vm1979_vm14 = vcmp.lt.s32.totalorder %v4876_v41, 256 }
 0x273   : > { %v1920_v0 = vmul.f32 %v1915_v13, %v3116_v17  ;;  %v1909_v42 = vadd.f32 %v1907_v36, %v1893_v30 }
 0x274   : > { %v1924_v3 = vmul.f32 %v1922_v51, %v1921_v31  ;;  %v1930_v22 = vpop.permute.xlu1 %1929 }
 0x275   : > { %v1923_v55 = vmul.f32 %v1922_v51, %v1920_v0  ;;  %v1934_v9 = vsel %vm1152_vm15, %v1930_v22, 0.0  ;;  %v1928_v32 = vpop.permute.xlu0 %1927 }
 0x276   : > { %v1937_v35 = vmul.f32 %v1934_v9, %v3139_v18  ;;  %v1931_v15 = vsel %vm1152_vm15, %v1928_v32, %v1930_v22  ;;  %v1926_v6 = vadd.f32 %v1924_v3, %v1910_v33 }
 0x277   : > { %v1936_v1 = vmul.f32 %v1931_v15, %v3136_v5  ;;  %v1925_v17 = vadd.f32 %v1923_v55, %v1909_v42  ;;  %v2534_v5 = vmov 1966171168  }
 0x278   : > { %v1940_v62 = vmul.f32 %v1938_v23, %v1937_v35  ;;  %v1963_v16 = vunpack.c.l.s4 %v2534_v5 }
 0x279   : > { %v1939_v58 = vmul.f32 %v1938_v23, %v1936_v1 }
 0x27a   : > { %v1942_v44 = vadd.f32 %v1940_v62, %v1926_v6  ;;  %v1964_v2 = vunpack.c.0.s8 %v1963_v16 }
 0x27b   : > { %v1941_v46 = vadd.f32 %v1939_v58, %v1925_v17 }
 0x27c   : > { %v1946_v24 = vadd.f32 %v1944_v20, %v1942_v44  ;;  %v1967_v48 = vsub.s32 %v1964_v2, %v4875_v7 }
 0x27d   : > { %v1945_v38 = vadd.f32 %v1944_v20, %v1941_v46 }
 0x27e   : > { %v2203_v29 = vmul.f32 -1.442695, %v1946_v24 }
 0x27f   : > { %v2202_v8 = vmul.f32 -1.442695, %v1945_v38 }
 0x280   : > { %2328 = vpow2.f32 %v2203_v29 }
 0x281   : > { %2330 = vpow2.f32 %v2202_v8 }
 0x28a   : > { %v2329_v18 = vpop.eup %2328 }
 0x28b   : > { %v2331_v50 = vpop.eup %2330  ;;  %v1954_v26 = vadd.f32 1.0, %v2329_v18 }
 0x28c   : > { %v1953_v52 = vadd.f32 1.0, %v2331_v50 }
 0x28d   : > { %2332 = vrcp.f32 %v1954_v26 }
 0x28e   : > { %2334 = vrcp.f32 %v1953_v52 }
 0x297   : > { %v2333_v14 = vpop.eup %2332 }
 0x298   : > { %v2335_v59 = vpop.eup %2334 }
 0x299   : > { %v1961_v28 = vcombine.low %v2335_v59, %v2333_v14 }
 0x29b   : > { %v1968_v61 = vrot.slane %v1961_v28, %v1967_v48 }
 0x29d   : > { %v1975_v49 = vrot.slane %v1968_v61, %v1967_v48 }
 0x29f   : > { %1981 = vst.msk [vmem:[%s211_s30] sm:$0x3] %vm1979_vm14, %v1975_v49 }
 0x2a0   : > { %2420 = shalt.err (!%p2417_p3)
}
 0x2a1   : > { %s2421_s17 = scalar_lea.hbm %s4498_s29, 32  ;;  %s2425_s26 = scalar_lea.hbm %s4545_s3, 64 }
 0x2a2   : > { %p2422_p1 = scmp.ne.s32.totalorder %s4498_s29, %s2421_s17  ;;  %p2426_p2 = scmp.lt.u32.totalorder %s4498_s29, %s4545_s3 }
 0x2a3   : > { %p2427_p0 = scmp.lt.u32.totalorder %s2425_s26, %s2421_s17  ;;  %p2429_p11 = scmp.lt.u32.totalorder %s2421_s17, %s4498_s29 }
 0x2a4   : > { %p2423_p5 = pnand %p2422_p1, %p4877_p4 }
 0x2a5   : > { %p2428_p8 = por %p2427_p0, %p2426_p2 }
 0x2a6   : > { %p2424_p10 = pneg %p2423_p5 }
 0x2a7   : > { %p2430_p6 = por %p2429_p11, %p2428_p8 }
 0x2a9   : > { %p2431_p9 = pnand %p2430_p6, %p2424_p10 }
 0x2ab   : > { %2434 = shalt.err (!%p2431_p9)
}
 0x2ac   : > { %2221 = dma.vmem_to_hbm [thread:$0]  (%p4877_p4), %s4500_s5, 32, %s4498_s29, %s1983_s21  }
 0x2ad PF: > { %s2009_s1 = sand.u32 1, %s2469_s12   ;;  %p4878_p12 = scmp.ne.s32.totalorder %s4684_s19, 0 }
 0x2ae   : > { %p4879_p7 = scmp.ge.s32.totalorder %s2481_s15, 2  ;;  %s2010_s11 = scalar_lea.sflag [#allocation4], %s2009_s1 }
 0x2b0   : > { %p2235_p13 = pnand %p4879_p7, %p4878_p12 }
 0x2b2   : > { %2464 = dma.done.wait (!%p2235_p13), %s2010_s11, 32  }
 0x2b3   : > { %2466 = vsyncadd (!%p2235_p13), %s2010_s11, 4294967264  ;;  %p18_p3 = scmp.ge.s32.totalorder %s2612_s24, 4   ;;  %s4880_s12 = smov %s2473_s13 }
 0x2b4   : > { %s4881_s13 = smov %s2477_s14  ;;  %s4882_s14 = smov %s2670_s7 }
 0x2b5   : > { %s4883_s15 = smov %s2612_s24  ;;  %20 = sbr.rel (!%p18_p3) target bundleno = 11 (0xb), region = 93 }
 0x2bc   :  { %2015 = vsyncpa [#allocation3], 1 }
 0x2bd   :  { %2017 = vsyncpa [#allocation3 + $0x1], 1 }
 0x2be   :  { %2018 = vsyncpa [#allocation8], 1 }
 0x2bf   :  { %2020 = vsyncpa [#allocation8 + $0x1], 1 }
 0x2c0   :  { %2021 = vsyncpa [#allocation4], 1 }
 0x2c1   :  { %2023 = vsyncpa [#allocation4 + $0x1], 1 }
 0x2c2   :  { %2024 = vsyncpa [#allocation5], 1 }
 0x2c3   :  { %2026 = vsyncpa [#allocation5 + $0x1], 1 }

</bundles_post_ra>
